<compile_context>
chip_gen: v7x
topology: tpu7x:2x2x1
jax: 0.10.0
libtpu: 0.0.40
codegen_flags: <defaults>
</compile_context>

<pallas_src>
import functools

import jax
import jax.numpy as jnp
from jax.experimental import pallas as pl
from jax.experimental.pallas import tpu as pltpu


def _round_up(x, m):
    return (x + m - 1) // m * m


def _residual_ffn_kernel(x_ref, w1_ref, b1_ref, w2_ref, b2_ref, o_ref, *,
                         pointwise_dtype):
    """One (TM, D) row-tile: out = gelu(x @ W1 + b1) @ W2 + b2 + x."""
    x = x_ref[...]
    # First matmul: bf16 MXU operands, f32 accumulation.
    h = jnp.dot(x.astype(w1_ref.dtype), w1_ref[...],
                preferred_element_type=jnp.float32)
    # Pointwise chain (bias add + GELU): bf16 on v6e/v7x, f32 on v5e.
    h = h.astype(pointwise_dtype) + b1_ref[...]
    h = jax.nn.gelu(h)                      # tanh approximation (EUP-friendly)
    # Second matmul: bf16 MXU operands again, f32 accumulation.
    y = jnp.dot(h.astype(w2_ref.dtype), w2_ref[...],
                preferred_element_type=jnp.float32)
    y = y + b2_ref[...]                     # b2 is passed in f32
    # The residual add that defines ResidualAdd.forward.
    o_ref[...] = (y + x.astype(jnp.float32)).astype(o_ref.dtype)


def _pointwise_dtype():
    """bf16 pointwise math on chips with a bf16 VPU/EUP (v6e, v7x); f32 otherwise."""
    try:
        kind = jax.devices()[0].device_kind.lower()
    except Exception:
        return jnp.float32
    if any(v in kind for v in ("v2", "v3", "v4", "v5")):
        return jnp.float32
    return jnp.bfloat16


def _choose_tm(M, Dh, x_itemsize, requested=None):
    """Row-tile: big enough to amortize per-step overhead and reuse MXU-loaded
    weights, small enough that the (tm, Dh) f32 intermediate stays VMEM-safe on
    v7x, and (when auto) yielding >= 2 grid steps for pipelining / megacore."""
    sub = max(8, 32 // max(1, x_itemsize))           # sublane pack for x dtype
    m_full = _round_up(M, sub)
    # Cap: (tm, Dh) f32 intermediate <= 8 MiB (v7x VMEM is 64 MiB per TC).
    cap = max(sub, ((8 * 1024 * 1024) // (Dh * 4)) // sub * sub)
    tm = 512 if requested is None else int(requested)
    tm = max(sub, min(_round_up(tm, sub), cap, m_full))
    if requested is None and tm >= m_full and m_full >= 2 * sub:
        # Prefer >= 2 grid steps so x/out DMAs pipeline and both v7x TCs get work.
        tm = _round_up(m_full // 2, sub)
    return tm


def _vmem_limit_bytes(tm, D, Dh, x_itemsize, out_itemsize, pw_itemsize):
    weights = 2 * D * Dh * 2                         # W1 + W2 in bf16
    biases = Dh * pw_itemsize + D * 4
    io = 2 * tm * D * (x_itemsize + out_itemsize)    # double-buffered x / out tiles
    inter = 2 * tm * Dh * 4                          # f32 matmul acc + pointwise temps
    need = 2 * (weights + biases) + io + inter       # 2x weights if fallback double-buffers
    limit = max(int(need * 1.5), 16 * 1024 * 1024)
    return min(limit, 48 * 1024 * 1024)              # headroom on v7x (64 MiB VMEM/TC)


def _build_call(tm, m_pad, D, Dh, out_dtype, pw_dtype, vmem_limit, cost,
                single_buffer_weights):
    # Weights/biases: constant index_map -> resident in VMEM across the grid.
    resident = (
        dict(pipeline_mode=pl.Buffered(1)) if single_buffer_weights else {}
    )
    kernel = functools.partial(_residual_ffn_kernel, pointwise_dtype=pw_dtype)
    return pl.pallas_call(
        kernel,
        out_shape=jax.ShapeDtypeStruct((m_pad, D), out_dtype),
        grid_spec=pl.GridSpec(
            grid=(m_pad // tm,),
            in_specs=[
                # x: one (TM, D) row tile per grid step (double-buffered).
                pl.BlockSpec((tm, D), lambda i: (i, 0)),
                pl.BlockSpec((D, Dh), lambda i: (0, 0), **resident),
                pl.BlockSpec((1, Dh), lambda i: (0, 0), **resident),
                pl.BlockSpec((Dh, D), lambda i: (0, 0), **resident),
                pl.BlockSpec((1, D), lambda i: (0, 0), **resident),
            ],
            out_specs=pl.BlockSpec((tm, D), lambda i: (i, 0)),
        ),
        compiler_params=pltpu.CompilerParams(
            # Row tiles are independent -> parallel (2x on v7x's 2 TCs).
            dimension_semantics=("parallel",),
            vmem_limit_bytes=vmem_limit,
        ),
        cost_estimate=cost,
    )


def residual_add_ffn(x, w1, b1, w2, b2, *, tm=None):
    """x: (B, N, D). Returns fn(x) + x with fn = Linear -> GELU -> Linear."""
    B, N, D = x.shape
    Dh = w1.shape[1]
    M = B * N
    x_itemsize = jnp.dtype(x.dtype).itemsize
    pw_dtype = _pointwise_dtype()
    pw_itemsize = jnp.dtype(pw_dtype).itemsize

    tm = _choose_tm(M, Dh, x_itemsize, tm)
    m_pad = _round_up(M, tm)

    x2d = x.reshape(M, D)
    if m_pad != M:
        x2d = jnp.pad(x2d, ((0, m_pad - M), (0, 0)))

    # MXU operands in bf16 (accumulation stays f32 in-kernel); pointwise bias
    # in the pointwise dtype; final bias / residual stay f32.
    w1_mx = w1.astype(jnp.bfloat16)
    w2_mx = w2.astype(jnp.bfloat16)
    b1_2d = b1.reshape(1, Dh).astype(pw_dtype)
    b2_2d = b2.reshape(1, D).astype(jnp.float32)

    cost = pl.CostEstimate(
        flops=4 * m_pad * D * Dh,                    # two matmuls, 2*M*D*Dh each
        transcendentals=m_pad * Dh,                  # GELU
        bytes_accessed=(m_pad * D * 2 * x_itemsize   # x in, out
                        + 2 * D * Dh * 2             # bf16 W1, W2
                        + Dh * pw_itemsize + D * 4),
    )
    vmem_limit = _vmem_limit_bytes(tm, D, Dh, x_itemsize, x_itemsize, pw_itemsize)

    args = (x2d, w1_mx, b1_2d, w2_mx, b2_2d)
    try:
        out2d = _build_call(tm, m_pad, D, Dh, x.dtype, pw_dtype, vmem_limit,
                            cost, single_buffer_weights=True)(*args)
    except Exception:
        # pipeline_mode=pl.Buffered(1) unsupported -> default double-buffering.
        out2d = _build_call(tm, m_pad, D, Dh, x.dtype, pw_dtype, vmem_limit,
                            cost, single_buffer_weights=False)(*args)

    if m_pad != M:
        out2d = out2d[:M]
    return out2d.reshape(B, N, D)


def _reference(x, w1, b1, w2, b2):
    """Pure-JAX (f32) reference of ResidualAdd(FeedForward)."""
    h = jax.nn.gelu(jnp.einsum("bnd,dh->bnh", x, w1) + b1)
    y = jnp.einsum("bnh,hd->bnd", h, w2) + b2
    return y + x


if __name__ == "__main__":
    # Lane-aligned transformer-style shapes: hidden = 128, FFN expansion 4x,
    # enough rows (B*N = 512) for the grid to tile over M (2 row tiles of 256).
    B, N, D = 2, 256, 128
    Dh = 4 * D

    key = jax.random.PRNGKey(0)
    kx, kw1, kb1, kw2, kb2 = jax.random.split(key, 5)

    x = jax.random.normal(kx, (B, N, D), dtype=jnp.float32)
    # Deterministic synthetic parameters (nn.Linear-shaped, stored as (in, out)).
    w1 = jax.random.normal(kw1, (D, Dh), dtype=jnp.float32) * 0.05
    b1 = jax.random.normal(kb1, (Dh,), dtype=jnp.float32) * 0.01
    w2 = jax.random.normal(kw2, (Dh, D), dtype=jnp.float32) * 0.05
    b2 = jax.random.normal(kb2, (D,), dtype=jnp.float32) * 0.01

    out = residual_add_ffn(x, w1, b1, w2, b2)
    out = jax.block_until_ready(out)

    ref = _reference(x, w1, b1, w2, b2)
    assert out.shape == x.shape and out.dtype == x.dtype
    max_err = float(jnp.max(jnp.abs(out - ref)))
    # bf16 MXU operands (f32 accumulation) vs. the pure-f32 reference.
    assert jnp.allclose(out, ref, atol=2e-2, rtol=2e-2), max_err
    print("KERNEL_OK")
</pallas_src>

<mosaic_0001>
module attributes {stable_mosaic.version = 11 : i64} {
  func.func @_residual_ffn_kernel(%arg0: i32, %arg1: memref<256x128xf32, #tpu.memory_space<vmem>>, %arg2: memref<128x512xbf16, #tpu.memory_space<vmem>>, %arg3: memref<1x512xbf16, #tpu.memory_space<vmem>>, %arg4: memref<512x128xbf16, #tpu.memory_space<vmem>>, %arg5: memref<1x128xf32, #tpu.memory_space<vmem>>, %arg6: memref<256x128xf32, #tpu.memory_space<vmem>>) attributes {dimension_semantics = [#tpu.dimension_semantics<parallel>], iteration_bounds = array<i64: 2>, scalar_prefetch = 0 : i64, scratch_operands = 0 : i64, tpu.core_type = #tpu.core_type<tc>, window_params = [{transform_indices = @transform_0, window_bounds = array<i64: 256, 128>}, {pipeline_mode = #tpu.pipeline_mode<synchronous>, transform_indices = @transform_1, window_bounds = array<i64: 128, 512>}, {pipeline_mode = #tpu.pipeline_mode<synchronous>, transform_indices = @transform_2, window_bounds = array<i64: 1, 512>}, {pipeline_mode = #tpu.pipeline_mode<synchronous>, transform_indices = @transform_3, window_bounds = array<i64: 512, 128>}, {pipeline_mode = #tpu.pipeline_mode<synchronous>, transform_indices = @transform_4, window_bounds = array<i64: 1, 128>}, {transform_indices = @transform_5, window_bounds = array<i64: 256, 128>}]} {
    %c0 = arith.constant 0 : index
    %c0_0 = arith.constant 0 : index
    %0 = vector.load %arg1[%c0, %c0_0] : memref<256x128xf32, #tpu.memory_space<vmem>>, vector<256x128xf32>
    %1 = arith.truncf %0 : vector<256x128xf32> to vector<256x128xbf16>
    %c0_1 = arith.constant 0 : index
    %c0_2 = arith.constant 0 : index
    %2 = vector.load %arg2[%c0_1, %c0_2] : memref<128x512xbf16, #tpu.memory_space<vmem>>, vector<128x512xbf16>
    %cst = arith.constant dense<0.000000e+00> : vector<256x512xf32>
    %3 = tpu.matmul %1, %2, %cst {dimension_numbers = #tpu.dot_dimension_numbers<[1], [0], [0], [1], [0, 0, 1, 1], [], []>} : vector<256x128xbf16>, vector<128x512xbf16>, vector<256x512xf32> -> vector<256x512xf32>
    %4 = arith.truncf %3 : vector<256x512xf32> to vector<256x512xbf16>
    %c0_3 = arith.constant 0 : index
    %c0_4 = arith.constant 0 : index
    %5 = vector.load %arg3[%c0_3, %c0_4] : memref<1x512xbf16, #tpu.memory_space<vmem>>, vector<1x512xbf16>
    %6 = vector.broadcast %5 : vector<1x512xbf16> to vector<256x512xbf16>
    %7 = arith.addf %4, %6 : vector<256x512xbf16>
    %8 = arith.mulf %7, %7 : vector<256x512xbf16>
    %9 = arith.mulf %7, %8 : vector<256x512xbf16>
    %cst_5 = arith.constant 4.467770e-02 : bf16
    %10 = vector.broadcast %cst_5 : bf16 to vector<256x512xbf16>
    %11 = arith.mulf %10, %9 : vector<256x512xbf16>
    %12 = arith.addf %7, %11 : vector<256x512xbf16>
    %cst_6 = arith.constant 7.968750e-01 : bf16
    %13 = vector.broadcast %cst_6 : bf16 to vector<256x512xbf16>
    %14 = arith.mulf %13, %12 : vector<256x512xbf16>
    %15 = math.tanh %14 : vector<256x512xbf16>
    %cst_7 = arith.constant 1.000000e+00 : bf16
    %16 = vector.broadcast %cst_7 : bf16 to vector<256x512xbf16>
    %17 = arith.addf %16, %15 : vector<256x512xbf16>
    %cst_8 = arith.constant 5.000000e-01 : bf16
    %18 = vector.broadcast %cst_8 : bf16 to vector<256x512xbf16>
    %19 = arith.mulf %18, %17 : vector<256x512xbf16>
    %20 = arith.mulf %7, %19 : vector<256x512xbf16>
    %c0_9 = arith.constant 0 : index
    %c0_10 = arith.constant 0 : index
    %21 = vector.load %arg4[%c0_9, %c0_10] : memref<512x128xbf16, #tpu.memory_space<vmem>>, vector<512x128xbf16>
    %cst_11 = arith.constant dense<0.000000e+00> : vector<256x128xf32>
    %22 = tpu.matmul %20, %21, %cst_11 {dimension_numbers = #tpu.dot_dimension_numbers<[1], [0], [0], [1], [0, 0, 1, 1], [], []>} : vector<256x512xbf16>, vector<512x128xbf16>, vector<256x128xf32> -> vector<256x128xf32>
    %c0_12 = arith.constant 0 : index
    %c0_13 = arith.constant 0 : index
    %23 = vector.load %arg5[%c0_12, %c0_13] : memref<1x128xf32, #tpu.memory_space<vmem>>, vector<1x128xf32>
    %24 = vector.broadcast %23 : vector<1x128xf32> to vector<256x128xf32>
    %25 = arith.addf %22, %24 : vector<256x128xf32>
    %26 = arith.addf %25, %0 : vector<256x128xf32>
    %c0_14 = arith.constant 0 : index
    %c0_15 = arith.constant 0 : index
    %27 = vector.load %arg6[%c0_14, %c0_15] : memref<256x128xf32, #tpu.memory_space<vmem>>, vector<256x128xf32>
    tpu.vector_store %arg6[%c0_14, %c0_15], %26 {strides = array<i32>} : memref<256x128xf32, #tpu.memory_space<vmem>>, vector<256x128xf32>,
    return
  }
  func.func @transform_0(%arg0: i32) -> (i32, i32) {
    %c0_i32 = arith.constant 0 : i32
    %c0_i32_0 = arith.constant 0 : i32
    return %arg0, %c0_i32 : i32, i32
  }
  func.func @transform_1(%arg0: i32) -> (i32, i32) {
    %c0_i32 = arith.constant 0 : i32
    %c0_i32_0 = arith.constant 0 : i32
    %c0_i32_1 = arith.constant 0 : i32
    return %c0_i32, %c0_i32_0 : i32, i32
  }
  func.func @transform_2(%arg0: i32) -> (i32, i32) {
    %c0_i32 = arith.constant 0 : i32
    %c0_i32_0 = arith.constant 0 : i32
    %c0_i32_1 = arith.constant 0 : i32
    return %c0_i32, %c0_i32_0 : i32, i32
  }
  func.func @transform_3(%arg0: i32) -> (i32, i32) {
    %c0_i32 = arith.constant 0 : i32
    %c0_i32_0 = arith.constant 0 : i32
    %c0_i32_1 = arith.constant 0 : i32
    return %c0_i32, %c0_i32_0 : i32, i32
  }
  func.func @transform_4(%arg0: i32) -> (i32, i32) {
    %c0_i32 = arith.constant 0 : i32
    %c0_i32_0 = arith.constant 0 : i32
    %c0_i32_1 = arith.constant 0 : i32
    return %c0_i32, %c0_i32_0 : i32, i32
  }
  func.func @transform_5(%arg0: i32) -> (i32, i32) {
    %c0_i32 = arith.constant 0 : i32
    %c0_i32_0 = arith.constant 0 : i32
    return %arg0, %c0_i32 : i32, i32
  }
}

module attributes {stable_mosaic.version = 11 : i64} {
  func.func @_residual_ffn_kernel(%arg0: i32, %arg1: memref<256x128xf32, #tpu.memory_space<vmem>>, %arg2: memref<128x512xbf16, #tpu.memory_space<vmem>>, %arg3: memref<1x512xbf16, #tpu.memory_space<vmem>>, %arg4: memref<512x128xbf16, #tpu.memory_space<vmem>>, %arg5: memref<1x128xf32, #tpu.memory_space<vmem>>, %arg6: memref<256x128xf32, #tpu.memory_space<vmem>>) attributes {dimension_semantics = [#tpu.dimension_semantics<parallel>], iteration_bounds = array<i64: 2>, scalar_prefetch = 0 : i64, scratch_operands = 0 : i64, tpu.core_type = #tpu.core_type<tc>, window_params = [{transform_indices = @transform_0, window_bounds = array<i64: 256, 128>}, {pipeline_mode = #tpu.pipeline_mode<synchronous>, transform_indices = @transform_1, window_bounds = array<i64: 128, 512>}, {pipeline_mode = #tpu.pipeline_mode<synchronous>, transform_indices = @transform_2, window_bounds = array<i64: 1, 512>}, {pipeline_mode = #tpu.pipeline_mode<synchronous>, transform_indices = @transform_3, window_bounds = array<i64: 512, 128>}, {pipeline_mode = #tpu.pipeline_mode<synchronous>, transform_indices = @transform_4, window_bounds = array<i64: 1, 128>}, {transform_indices = @transform_5, window_bounds = array<i64: 256, 128>}]} {
    %c0 = arith.constant 0 : index
    %c0_0 = arith.constant 0 : index
    %0 = vector.load %arg1[%c0, %c0_0] : memref<256x128xf32, #tpu.memory_space<vmem>>, vector<256x128xf32>
    %1 = arith.truncf %0 : vector<256x128xf32> to vector<256x128xbf16>
    %c0_1 = arith.constant 0 : index
    %c0_2 = arith.constant 0 : index
    %2 = vector.load %arg2[%c0_1, %c0_2] : memref<128x512xbf16, #tpu.memory_space<vmem>>, vector<128x512xbf16>
    %cst = arith.constant dense<0.000000e+00> : vector<256x512xf32>
    %3 = tpu.matmul %1, %2, %cst {dimension_numbers = #tpu.dot_dimension_numbers<[1], [0], [0], [1], [0, 0, 1, 1], [], []>} : vector<256x128xbf16>, vector<128x512xbf16>, vector<256x512xf32> -> vector<256x512xf32>
    %4 = arith.truncf %3 : vector<256x512xf32> to vector<256x512xbf16>
    %c0_3 = arith.constant 0 : index
    %c0_4 = arith.constant 0 : index
    %5 = vector.load %arg3[%c0_3, %c0_4] : memref<1x512xbf16, #tpu.memory_space<vmem>>, vector<1x512xbf16>
    %6 = vector.broadcast %5 : vector<1x512xbf16> to vector<256x512xbf16>
    %7 = arith.addf %4, %6 : vector<256x512xbf16>
    %8 = arith.mulf %7, %7 : vector<256x512xbf16>
    %9 = arith.mulf %7, %8 : vector<256x512xbf16>
    %cst_5 = arith.constant 4.467770e-02 : bf16
    %10 = vector.broadcast %cst_5 : bf16 to vector<256x512xbf16>
    %11 = arith.mulf %10, %9 : vector<256x512xbf16>
    %12 = arith.addf %7, %11 : vector<256x512xbf16>
    %cst_6 = arith.constant 7.968750e-01 : bf16
    %13 = vector.broadcast %cst_6 : bf16 to vector<256x512xbf16>
    %14 = arith.mulf %13, %12 : vector<256x512xbf16>
    %15 = math.tanh %14 : vector<256x512xbf16>
    %cst_7 = arith.constant 1.000000e+00 : bf16
    %16 = vector.broadcast %cst_7 : bf16 to vector<256x512xbf16>
    %17 = arith.addf %16, %15 : vector<256x512xbf16>
    %cst_8 = arith.constant 5.000000e-01 : bf16
    %18 = vector.broadcast %cst_8 : bf16 to vector<256x512xbf16>
    %19 = arith.mulf %18, %17 : vector<256x512xbf16>
    %20 = arith.mulf %7, %19 : vector<256x512xbf16>
    %c0_9 = arith.constant 0 : index
    %c0_10 = arith.constant 0 : index
    %21 = vector.load %arg4[%c0_9, %c0_10] : memref<512x128xbf16, #tpu.memory_space<vmem>>, vector<512x128xbf16>
    %cst_11 = arith.constant dense<0.000000e+00> : vector<256x128xf32>
    %22 = tpu.matmul %20, %21, %cst_11 {dimension_numbers = #tpu.dot_dimension_numbers<[1], [0], [0], [1], [0, 0, 1, 1], [], []>} : vector<256x512xbf16>, vector<512x128xbf16>, vector<256x128xf32> -> vector<256x128xf32>
    %c0_12 = arith.constant 0 : index
    %c0_13 = arith.constant 0 : index
    %23 = vector.load %arg5[%c0_12, %c0_13] : memref<1x128xf32, #tpu.memory_space<vmem>>, vector<1x128xf32>
    %24 = vector.broadcast %23 : vector<1x128xf32> to vector<256x128xf32>
    %25 = arith.addf %22, %24 : vector<256x128xf32>
    %26 = arith.addf %25, %0 : vector<256x128xf32>
    %c0_14 = arith.constant 0 : index
    %c0_15 = arith.constant 0 : index
    %27 = vector.load %arg6[%c0_14, %c0_15] : memref<256x128xf32, #tpu.memory_space<vmem>>, vector<256x128xf32>
    tpu.vector_store %arg6[%c0_14, %c0_15], %26 {strides = array<i32>} : memref<256x128xf32, #tpu.memory_space<vmem>>, vector<256x128xf32>,
    return
  }
  func.func @transform_0(%arg0: i32) -> (i32, i32) {
    %c0_i32 = arith.constant 0 : i32
    %c0_i32_0 = arith.constant 0 : i32
    return %arg0, %c0_i32 : i32, i32
  }
  func.func @transform_1(%arg0: i32) -> (i32, i32) {
    %c0_i32 = arith.constant 0 : i32
    %c0_i32_0 = arith.constant 0 : i32
    %c0_i32_1 = arith.constant 0 : i32
    return %c0_i32, %c0_i32_0 : i32, i32
  }
  func.func @transform_2(%arg0: i32) -> (i32, i32) {
    %c0_i32 = arith.constant 0 : i32
    %c0_i32_0 = arith.constant 0 : i32
    %c0_i32_1 = arith.constant 0 : i32
    return %c0_i32, %c0_i32_0 : i32, i32
  }
  func.func @transform_3(%arg0: i32) -> (i32, i32) {
    %c0_i32 = arith.constant 0 : i32
    %c0_i32_0 = arith.constant 0 : i32
    %c0_i32_1 = arith.constant 0 : i32
    return %c0_i32, %c0_i32_0 : i32, i32
  }
  func.func @transform_4(%arg0: i32) -> (i32, i32) {
    %c0_i32 = arith.constant 0 : i32
    %c0_i32_0 = arith.constant 0 : i32
    %c0_i32_1 = arith.constant 0 : i32
    return %c0_i32, %c0_i32_0 : i32, i32
  }
  func.func @transform_5(%arg0: i32) -> (i32, i32) {
    %c0_i32 = arith.constant 0 : i32
    %c0_i32_0 = arith.constant 0 : i32
    return %arg0, %c0_i32 : i32, i32
  }
}

</mosaic_0001>

<bundles_post_ra>
// kernel: tpu_custom_call.1
= control target key start
LH: loop header
LB: loop body
LE: loop exit
PB: predicated region body
PF: predicated region fallthrough
CT: control target
= control target key end

     0   :  { %10 = vsyncpa [#allocation3], 0  ;;  %s4557_s0 = inlined_call_operand.hbm [shape: f32[512,128], index: 0, kind: input, shape index: {}]   ;;  %s4558_s1 = inlined_call_operand.hbm [shape: bf16[128,512], index: 1, kind: input, shape index: {}]   ;;  %s4559_s2 = inlined_call_operand.vmem [shape: bf16[1,512], index: 2, kind: input, shape index: {}]   ;;  %s4560_s3 = inlined_call_operand.hbm [shape: bf16[512,128], index: 3, kind: input, shape index: {}]   ;;  %s4561_s4 = inlined_call_operand.vmem [shape: f32[1,128], index: 4, kind: input, shape index: {}]   ;;  %s4562_s5 = inlined_call_operand.hbm [shape: f32[512,128], index: 5, kind: output, shape index: {}]  }
   0x1   :  { %12 = vsyncpa [#allocation3 + $0x1], 0 }
   0x2   :  { %13 = vsyncpa [#allocation6], 0 }
   0x3   :  { %14 = vsyncpa [#allocation4], 0 }
   0x4   :  { %16 = vsyncpa [#allocation4 + $0x1], 0  ;;  %s3247_s18 = smov 0   ;;  %s3249_s19 = smov 0  }
   0x5   :  { %s3251_s20 = smov 0   ;;  %s3253_s21 = smov 0  }
   0x6 LB: > { %s3268_s22 = sadd.s32 4294967295, %s3201_s21   ;;  %s2418_s23 = sadd.s32 4294967294, %s3201_s21   ;;  %s3201_s21 = sphi %s3253_s21, %s4681_s21   ;;  %s3197_s20 = sphi %s3251_s20, %s4680_s20   ;;  %s3193_s19 = sphi %s3249_s19, %s4679_s19   ;;  %s3189_s18 = sphi %s3247_s18, %s4678_s18  }
   0x7   : > { %p42_p0 = scmp.ne.s32.totalorder %s3193_s19, %s3189_s18  ;;  %p4563_p1 = scmp.eq.s32.totalorder %s3268_s22, 0 }
   0x8   : > { %p156_p3 = scmp.eq.s32.totalorder %s2418_s23, 1  ;;  %p2419_p5 = scmp.ge.s32.totalorder %s3201_s21, 1 }
   0x9   : > { %p3277_p4 = por %p4563_p1, %p42_p0  ;;  %p163_p7 = scmp.lt.s32.totalorder %s3201_s21, 3 }
   0xa   : > { %p3282_p6 = por %p156_p3, %p42_p0  ;;  %s3203_s27 = smov [#allocation5]  }
   0xb   : > { %s4595_s24 = scalar_select %p3277_p4, 1, 0 }
   0xc   : > { %s4596_s25 = scalar_select %p3282_p6, 1, 0 }
   0xd   : > { %p3287_p8 = pnand %p2419_p5, %p163_p7  ;;  %s175_s28 = sshll.u32 %s3203_s27, 4  ;;  %s3291_s28 = int_to_ptr.vmem [resolvable:$true] %s175_s28 }
   0xe   : > { %s3204_s30 = smov [#allocation7]   ;;  %s3045_s9 = scalar_lea.hbm %s4558_s1, 4096 }
   0xf   : > { %p2740_p9 = pneg %p3287_p8  ;;  %s191_s6 = sshll.u32 %s3204_s30, 4  ;;  %s3302_s6 = int_to_ptr.vmem [resolvable:$true] %s191_s6 }
  0x10   : > { %p3046_p12 = scmp.ne.s32.totalorder %s4558_s1, %s3045_s9  ;;  %p3052_p5 = scmp.lt.u32.totalorder %s3045_s9, %s4558_s1 }
  0x11   : > { %p3298_p11 = pnand %p2740_p9, %p4563_p1 }
  0x13   : > { %p3047_p13 = pneg %p3298_p11 }
  0x15   : > { %p3048_p0 = pnand %p3047_p13, %p3046_p12 }
  0x17   : > { %p3049_p3 = pneg %p3048_p0 }
  0x19   : > { %p3054_p7 = pnand %p3052_p5, %p3049_p3 }
  0x1b   : > { %3057 = shalt.err (!%p3054_p7)
}
  0x1c   : > { %s3058_s14 = scalar_lea.vmem %s3291_s28, 4096  ;;  %p3066_p2 = scmp.lt.s32.totalorder %s3291_s28, %s3291_s28 }
  0x1d   : > { %p3059_p9 = scmp.ne.s32.totalorder %s3291_s28, %s3058_s14  ;;  %p3067_p12 = scmp.lt.s32.totalorder %s3058_s14, %s3058_s14 }
  0x1f   : > { %p3061_p10 = pnand %p3059_p9, %p3047_p13  ;;  %p3068_p0 = por %p3067_p12, %p3066_p2 }
  0x21   : > { %p3062_p1 = pneg %p3061_p10 }
  0x23   : > { %p3069_p6 = pnand %p3068_p0, %p3062_p1 }
  0x25   : > { %3072 = shalt.err (!%p3069_p6)
}
  0x26   : > { %s3205_s15 = smov 256   ;;  %s3206_s16 = smov 16  }
  0x27   : > { %2743 = dma.hbm_to_vmem [thread:$0]  (!%p3298_p11), %s4558_s1, 4096, %s3291_s28, [#allocation6], %s3205_s15, %s3205_s15, %s3206_s16  }
  0x28   : > { %s3073_s7 = scalar_lea.hbm %s4560_s3, 4096 }
  0x29   : > { %p3074_p2 = scmp.ne.s32.totalorder %s4560_s3, %s3073_s7  ;;  %p3080_p10 = scmp.lt.u32.totalorder %s3073_s7, %s4560_s3 }
  0x2b   : > { %p3076_p1 = pnand %p3074_p2, %p3047_p13 }
  0x2d   : > { %p3077_p6 = pneg %p3076_p1 }
  0x2f   : > { %p3082_p3 = pnand %p3080_p10, %p3077_p6 }
  0x31   : > { %3085 = shalt.err (!%p3082_p3)
}
  0x32   : > { %s3086_s28 = scalar_lea.vmem %s3302_s6, 4096  ;;  %p3094_p12 = scmp.lt.s32.totalorder %s3302_s6, %s3302_s6 }
  0x33   : > { %p3087_p5 = scmp.ne.s32.totalorder %s3302_s6, %s3086_s28  ;;  %p3095_p0 = scmp.lt.s32.totalorder %s3086_s28, %s3086_s28 }
  0x35   : > { %p3089_p7 = pnand %p3087_p5, %p3047_p13  ;;  %p3096_p2 = por %p3095_p0, %p3094_p12 }
  0x37   : > { %p3090_p9 = pneg %p3089_p7 }
  0x39   : > { %p3097_p1 = pnand %p3096_p2, %p3090_p9 }
  0x3b   : > { %3100 = shalt.err (!%p3097_p1)
}
  0x3c   : > { %s3207_s12 = smov 64   ;;  %s3208_s13 = smov 4  }
  0x3d   : > { %2746 = dma.hbm_to_vmem [thread:$0]  (!%p3298_p11), %s4560_s3, 4096, %s3302_s6, [#allocation6], %s3207_s12, %s3207_s12, %s3208_s13  }
  0x3e   : > { %s3357_s16 = sadd.s32 1, %s3201_s21   ;;  %s29_s23 = sadd.s32 1, %s3197_s20 }
  0x3f   : > { %s26_s17 = ssub.s32 %s3201_s21, %s3357_s16  ;;  %p36_p6 = scmp.ne.s32.totalorder %s3197_s20, %s3193_s19 }
  0x40   : > { %p27_p13 = scmp.eq.s32.totalorder %s26_s17, 0  ;;  %p37_p10 = scmp.eq.s32.totalorder %s3201_s21, 0 }
  0x41   : > { %p4599_p5 = scmp.eq.s32.totalorder %s3268_s22, 1  ;;  %p2757_p9 = scmp.lt.s32.totalorder %s3201_s21, 2 }
  0x42   : > { %s3366_s27 = scalar_select %p27_p13, %s3197_s20, %s29_s23  }
  0x43   : > { %p38_p3 = por %p37_p10, %p36_p6  ;;  %p3370_p7 = por %p4599_p5, %p36_p6 }
  0x44   : > { %s208_s29 = sand.u32 1, %s3197_s20   ;;  %s2502_s6 = sshll.u32 %s3201_s21, 12 }
  0x45   : > { %s4600_s30 = scalar_select %p3370_p7, 1, 0 }
  0x46   : > { %s2423_s7 = sshll.u32 %s208_s29, 8  ;;  %s3380_s10 = scalar_lea.hbm %s4557_s0, %s2502_s6 }
  0x47   : > { %s212_s11 = scalar_lea.vmem [#allocation2], %s2423_s7  ;;  %p3384_p11 = pnand %p2757_p9, %p38_p3 }
  0x48   : > { %s219_s28 = sshll.u32 %s212_s11, 4  ;;  %s3388_s13 = scalar_lea.sflag [#allocation3], %s208_s29  ;;  %s3382_s28 = int_to_ptr.vmem [resolvable:$true] %s219_s28 }
  0x49   : > { %s3101_s14 = scalar_lea.hbm %s3380_s10, 4096  ;;  %p3103_p0 = pneg %p3384_p11 }
  0x4a   : > { %p3102_p12 = scmp.ne.s32.totalorder %s3380_s10, %s3101_s14  ;;  %s3106_s23 = scalar_lea.hbm %s4557_s0, 8192 }
  0x4b   : > { %p3107_p13 = scmp.lt.u32.totalorder %s3380_s10, %s4557_s0  ;;  %p3108_p6 = scmp.lt.u32.totalorder %s3106_s23, %s3101_s14 }
  0x4c   : > { %p3104_p2 = pnand %p3103_p0, %p3102_p12  ;;  %p3110_p3 = scmp.lt.u32.totalorder %s3101_s14, %s3380_s10 }
  0x4d   : > { %p3109_p10 = por %p3108_p6, %p3107_p13 }
  0x4e   : > { %p3105_p1 = pneg %p3104_p2 }
  0x4f   : > { %p3111_p5 = por %p3110_p3, %p3109_p10 }
  0x51   : > { %p3112_p9 = pnand %p3111_p5, %p3105_p1 }
  0x53   : > { %3115 = shalt.err (!%p3112_p9)
}
  0x54   : > { %s3116_s29 = scalar_lea.vmem %s3382_s28, 4096  ;;  %s3209_s8 = smov [#allocation2]  }
  0x55   : > { %p3117_p12 = scmp.ne.s32.totalorder %s3382_s28, %s3116_s29  ;;  %s3121_s9 = sshll.u32 %s3209_s8, 4  ;;  %s3122_s9 = int_to_ptr.vmem [resolvable:$false] %s3121_s9 }
  0x56   : > { %s3123_s11 = scalar_lea.vmem %s3122_s9, 8192  ;;  %p3124_p4 = scmp.lt.s32.totalorder %s3382_s28, %s3122_s9 }
  0x57   : > { %p3119_p2 = pnand %p3117_p12, %p3103_p0  ;;  %p3125_p13 = scmp.lt.s32.totalorder %s3123_s11, %s3116_s29 }
  0x59   : > { %p3120_p7 = pneg %p3119_p2  ;;  %p3126_p6 = por %p3125_p13, %p3124_p4 }
  0x5b   : > { %p3127_p10 = pnand %p3126_p6, %p3120_p7 }
  0x5d   : > { %3130 = shalt.err (!%p3127_p10)
}
  0x5e   : > { %s3210_s14 = smov 128   ;;  %s3211_s15 = smov 8  }
  0x5f   : > { %2750 = dma.hbm_to_vmem [thread:$0]  (!%p3384_p11), %s3380_s10, 4096, %s3382_s28, %s3388_s13, %s3210_s14, %s3210_s14, %s3211_s15  }
  0x60   : > { %231 = sbr.rel (%p3287_p8) target bundleno = 801 (0x321), region = 40 }
  0x67   : > { %s3419_s17 = sand.u32 1, %s3193_s19   ;;  %p4602_p4 = scmp.ne.s32.totalorder %s4595_s24, 0 }
  0x68   : > { %s2427_s23 = sshll.u32 %s3419_s17, 8  ;;  %s234_s7 = scalar_lea.sflag [#allocation3], %s3419_s17 }
  0x69   : > { %s3425_s6 = scalar_lea.vmem [#allocation2], %s2427_s23 }
  0x6a   : > { %3176 = dma.done.wait (%p4602_p4), %s234_s7, 4096  }
  0x6b   : > { %3178 = vsyncadd (%p4602_p4), %s234_s7, 4294963200  ;;  %p4603_p7 = scmp.eq.s32.totalorder %s3268_s22, 0 }
  0x6d   : > { %3180 = dma.done.wait (%p4603_p7), [#allocation6], 8192   ;;  %p4604_p8 = pmov %p4603_p7 }
  0x6e   : > { %v3212_v0 = vmov 0   ;;  %v2805_v1 = vld [vmem:[#allocation5 + $0x4] ss:$16 sps:$4 sm:$0xff]   ;;  %v2807_v2 = vld [vmem:[#allocation5 + $0xc] ss:$16 sps:$4 sm:$0xff]   ;;  %s4411_s12 = scalar_lea.vmem [#allocation8], %s2427_s23 }
  0x6f   : > { %3182 = vsyncadd (%p4604_p8), [#allocation6], 4294959104  ;;  %551 = vmatprep.mubr.bf16.mxu0 %v3212_v0  ;;  %744 = vmatprep.mubr.bf16.mxu1 %v3212_v0  ;;  %v2809_v3 = vld [vmem:[#allocation5] ss:$16 sps:$4 sm:$0xff]   ;;  %v2810_v4 = vld [vmem:[#allocation5 + $0x8] ss:$16 sps:$4 sm:$0xff]  }
  0x70   : > { %519 = vmatprep.subr.bf16.mxu0 %v2805_v1  ;;  %712 = vmatprep.subr.bf16.mxu1 %v2807_v2  ;;  %v2811_v5 = vld [vmem:[#allocation5 + $0x24] ss:$16 sps:$4 sm:$0xff]   ;;  %v2813_v6 = vld [vmem:[#allocation5 + $0x2c] ss:$16 sps:$4 sm:$0xff]   ;;  %v2815_v7 = vld [vmem:[#allocation5 + $0x20] ss:$16 sps:$4 sm:$0xff]  }
  0x71   : > { %520 = vmatpush1.bf16.msra.mxu0 %v2809_v3  ;;  %713 = vmatpush1.bf16.msra.mxu1 %v2810_v4  ;;  %v2816_v8 = vld [vmem:[#allocation5 + $0x28] ss:$16 sps:$4 sm:$0xff]   ;;  %v2817_v9 = vld [vmem:[#allocation5 + $0x44] ss:$16 sps:$4 sm:$0xff]   ;;  %v2819_v10 = vld [vmem:[#allocation5 + $0x4c] ss:$16 sps:$4 sm:$0xff]  }
  0x72   : > { %521 = vmatprep.subr.bf16.mxu0 %v2811_v5  ;;  %714 = vmatprep.subr.bf16.mxu1 %v2813_v6  ;;  %v2821_v11 = vld [vmem:[#allocation5 + $0x40] ss:$16 sps:$4 sm:$0xff]   ;;  %v2822_v12 = vld [vmem:[#allocation5 + $0x48] ss:$16 sps:$4 sm:$0xff]   ;;  %v2823_v13 = vld [vmem:[#allocation5 + $0x64] ss:$16 sps:$4 sm:$0xff]  }
  0x73   : > { %v2825_v14 = vld [vmem:[#allocation5 + $0x6c] ss:$16 sps:$4 sm:$0xff]   ;;  %v2827_v15 = vld [vmem:[#allocation5 + $0x60] ss:$16 sps:$4 sm:$0xff]   ;;  %v2828_v16 = vld [vmem:[#allocation5 + $0x68] ss:$16 sps:$4 sm:$0xff]  }
  0x74   : > { %v2829_v17 = vld [vmem:[#allocation5 + $0x84] ss:$16 sps:$4 sm:$0xff]   ;;  %v2831_v18 = vld [vmem:[#allocation5 + $0x8c] ss:$16 sps:$4 sm:$0xff]   ;;  %v2833_v19 = vld [vmem:[#allocation5 + $0x80] ss:$16 sps:$4 sm:$0xff]  }
  0x75   : > { %522 = vmatpush1.bf16.msra.mxu0 %v2815_v7  ;;  %715 = vmatpush1.bf16.msra.mxu1 %v2816_v8  ;;  %v2834_v20 = vld [vmem:[#allocation5 + $0x88] ss:$16 sps:$4 sm:$0xff]   ;;  %v2835_v21 = vld [vmem:[#allocation5 + $0xa4] ss:$16 sps:$4 sm:$0xff]   ;;  %v2837_v22 = vld [vmem:[#allocation5 + $0xac] ss:$16 sps:$4 sm:$0xff]  }
  0x76   : > { %523 = vmatprep.subr.bf16.mxu0 %v2817_v9  ;;  %716 = vmatprep.subr.bf16.mxu1 %v2819_v10  ;;  %v2839_v23 = vld [vmem:[#allocation5 + $0xa0] ss:$16 sps:$4 sm:$0xff]   ;;  %v2840_v24 = vld [vmem:[#allocation5 + $0xa8] ss:$16 sps:$4 sm:$0xff]   ;;  %v2841_v25 = vld [vmem:[#allocation5 + $0xc4] ss:$16 sps:$4 sm:$0xff]  }
  0x77   : > { %v2843_v26 = vld [vmem:[#allocation5 + $0xcc] ss:$16 sps:$4 sm:$0xff]   ;;  %v2845_v27 = vld [vmem:[#allocation5 + $0xc0] ss:$16 sps:$4 sm:$0xff]   ;;  %v2846_v28 = vld [vmem:[#allocation5 + $0xc8] ss:$16 sps:$4 sm:$0xff]  }
  0x78   : > { %v2847_v29 = vld [vmem:[#allocation5 + $0xe4] ss:$16 sps:$4 sm:$0xff]   ;;  %v2849_v30 = vld [vmem:[#allocation5 + $0xec] ss:$16 sps:$4 sm:$0xff]   ;;  %v2851_v31 = vld [vmem:[#allocation5 + $0xe0] ss:$16 sps:$4 sm:$0xff]  }
  0x79   : > { %524 = vmatpush1.bf16.msra.mxu0 %v2821_v11  ;;  %717 = vmatpush1.bf16.msra.mxu1 %v2822_v12  ;;  %v2852_v32 = vld [vmem:[#allocation5 + $0xe8] ss:$16 sps:$4 sm:$0xff]   ;;  %v279_v33 = vld [vmem:[%s3425_s6] sm:$0xff]  ;;  %v281_v38 = vld [vmem:[%s3425_s6 + $0x10] sm:$0xff]  ;;  %s2503_s13 = sshll.u32 %s3268_s22, 12  ;;  %s2326_s29 = sshll.u32 %s4411_s12, 4  ;;  %s4510_s29 = int_to_ptr.vmem [resolvable:$true] %s2326_s29 }
  0x7a   : > { %525 = vmatprep.subr.bf16.mxu0 %v2823_v13  ;;  %718 = vmatprep.subr.bf16.mxu1 %v2825_v14  ;;  %v280_v34 = vld [vmem:[%s3425_s6 + $0x8] sm:$0xff]  ;;  %v2853_v36 = vld [vmem:[#allocation7 + $0x40] sm:$0xff]   ;;  %v282_v39 = vld [vmem:[%s3425_s6 + $0x18] sm:$0xff]  ;;  %s4508_s11 = scalar_lea.hbm %s4562_s5, %s2503_s13  ;;  %s2313_s14 = scalar_lea.sflag [#allocation4], %s3419_s17 }
  0x7b   : > { %v311_v35 = vpack.c.bf16 %v280_v34, %v279_v33  ;;  %v2854_v37 = vld [vmem:[#allocation7] sm:$0xff]   ;;  %v2857_v42 = vld [vmem:[#allocation7 + $0x48] sm:$0xff]   ;;  %v312_v45 = vpack.c.bf16 %v282_v39, %v281_v38  ;;  %v2861_v47 = vld [vmem:[#allocation7 + $0x50] sm:$0xff]   ;;  %s3131_s22 = scalar_lea.vmem %s4510_s29, 4096  ;;  %p4675_p0 = scmp.ne.s32.totalorder %s4600_s30, 0 }
  0x7c   : > { %v2855_v40 = vld [vmem:[#allocation7 + $0xc0] sm:$0xff]   ;;  %v2858_v43 = vld [vmem:[#allocation7 + $0x8] sm:$0xff]   ;;  %v2862_v48 = vld [vmem:[#allocation7 + $0x10] sm:$0xff]   ;;  %p3132_p11 = scmp.ne.s32.totalorder %s4510_s29, %s3131_s22  ;;  %s3214_s15 = smov [#allocation8]  }
  0x7d   : > { %526 = vmatpush1.bf16.msra.mxu0 %v2827_v15  ;;  %719 = vmatpush1.bf16.msra.mxu1 %v2828_v16  ;;  %v2856_v41 = vld [vmem:[#allocation7 + $0x80] sm:$0xff]   ;;  %v2859_v44 = vld [vmem:[#allocation7 + $0xc8] sm:$0xff]   ;;  %v2863_v51 = vld [vmem:[#allocation7 + $0xd0] sm:$0xff]   ;;  %s3135_s23 = sshll.u32 %s3214_s15, 4  ;;  %s3136_s23 = int_to_ptr.vmem [resolvable:$false] %s3135_s23 }
  0x7e   : > { %527 = vmatprep.subr.bf16.mxu0 %v2829_v17  ;;  %720 = vmatprep.subr.bf16.mxu1 %v2831_v18  ;;  %v2860_v46 = vld [vmem:[#allocation7 + $0x88] sm:$0xff]   ;;  %v283_v49 = vld [vmem:[%s3425_s6 + $0x20] sm:$0xff]  ;;  %v2864_v52 = vld [vmem:[#allocation7 + $0x90] sm:$0xff]   ;;  %p3133_p1 = pnand %p3132_p11, %p4675_p0  ;;  %s3137_s7 = scalar_lea.vmem %s3136_s23, 8192 }
  0x7f   : > { %v284_v50 = vld [vmem:[%s3425_s6 + $0x28] sm:$0xff]  ;;  %v2865_v53 = vld [vmem:[#allocation7 + $0x58] sm:$0xff]   ;;  %v2869_v58 = vld [vmem:[#allocation7 + $0x60] sm:$0xff]   ;;  %p3138_p5 = scmp.lt.s32.totalorder %s4510_s29, %s3136_s23  ;;  %p3139_p9 = scmp.lt.s32.totalorder %s3137_s7, %s3131_s22 }
  0x80   : > { %v2866_v54 = vld [vmem:[#allocation7 + $0x18] sm:$0xff]   ;;  %v313_v56 = vpack.c.bf16 %v284_v50, %v283_v49  ;;  %v2870_v59 = vld [vmem:[#allocation7 + $0x20] sm:$0xff]   ;;  %v285_v60 = vld [vmem:[%s3425_s6 + $0x30] sm:$0xff]  ;;  %v3213_v50 = vmov 1966171168   ;;  %p3134_p3 = pneg %p3133_p1 }
  0x81   : > { %528 = vmatpush1.bf16.msra.mxu0 %v2833_v19  ;;  %721 = vmatpush1.bf16.msra.mxu1 %v2834_v20  ;;  %v2867_v55 = vld [vmem:[#allocation7 + $0xd8] sm:$0xff]   ;;  %v2871_v62 = vld [vmem:[#allocation7 + $0xe0] sm:$0xff]   ;;  %v2873_v1 = vld [vmem:[#allocation7 + $0x68] sm:$0xff]   ;;  %p3140_p12 = por %p3139_p9, %p3138_p5 }
  0x82   : > { %529 = vmatprep.subr.bf16.mxu0 %v2835_v21  ;;  %722 = vmatprep.subr.bf16.mxu1 %v2837_v22  ;;  %v2868_v57 = vld [vmem:[#allocation7 + $0x98] sm:$0xff]   ;;  %v2872_v63 = vld [vmem:[#allocation7 + $0xa0] sm:$0xff]   ;;  %v2874_v2 = vld [vmem:[#allocation7 + $0x28] sm:$0xff]  }
  0x83   : > { %v286_v61 = vld [vmem:[%s3425_s6 + $0x38] sm:$0xff]  ;;  %v2875_v3 = vld [vmem:[#allocation7 + $0xe8] sm:$0xff]   ;;  %v287_v6 = vld [vmem:[%s3425_s6 + $0x40] sm:$0xff]  ;;  %p3141_p2 = pnand %p3140_p12, %p3134_p3 }
  0x84   : > { %v314_v4 = vpack.c.bf16 %v286_v61, %v285_v60  ;;  %v2876_v5 = vld [vmem:[#allocation7 + $0xa8] sm:$0xff]   ;;  %v289_v9 = vld [vmem:[%s3425_s6 + $0x50] sm:$0xff]  ;;  %v290_v10 = vld [vmem:[%s3425_s6 + $0x58] sm:$0xff] }
  0x85   : > { %530 = vmatpush1.bf16.msra.mxu0 %v2839_v23  ;;  %723 = vmatpush1.bf16.msra.mxu1 %v2840_v24  ;;  %v288_v7 = vld [vmem:[%s3425_s6 + $0x48] sm:$0xff]  ;;  %v316_v11 = vpack.c.bf16 %v290_v10, %v289_v9  ;;  %v291_v12 = vld [vmem:[%s3425_s6 + $0x60] sm:$0xff]  ;;  %v293_v15 = vld [vmem:[%s3425_s6 + $0x70] sm:$0xff] }
  0x86   : > { %531 = vmatprep.subr.bf16.mxu0 %v2841_v25  ;;  %724 = vmatprep.subr.bf16.mxu1 %v2843_v26  ;;  %v315_v8 = vpack.c.bf16 %v288_v7, %v287_v6  ;;  %v292_v13 = vld [vmem:[%s3425_s6 + $0x68] sm:$0xff]  ;;  %v294_v16 = vld [vmem:[%s3425_s6 + $0x78] sm:$0xff]  ;;  %v295_v18 = vld [vmem:[%s3425_s6 + $0x80] sm:$0xff] }
  0x87   : > { %v317_v14 = vpack.c.bf16 %v292_v13, %v291_v12  ;;  %v318_v17 = vpack.c.bf16 %v294_v16, %v293_v15  ;;  %v296_v19 = vld [vmem:[%s3425_s6 + $0x88] sm:$0xff]  ;;  %v297_v21 = vld [vmem:[%s3425_s6 + $0x90] sm:$0xff]  ;;  %v298_v22 = vld [vmem:[%s3425_s6 + $0x98] sm:$0xff] }
  0x88   : > { %v319_v20 = vpack.c.bf16 %v296_v19, %v295_v18  ;;  %v320_v23 = vpack.c.bf16 %v298_v22, %v297_v21  ;;  %v299_v24 = vld [vmem:[%s3425_s6 + $0xa0] sm:$0xff]  ;;  %v300_v25 = vld [vmem:[%s3425_s6 + $0xa8] sm:$0xff]  ;;  %v305_v33 = vld [vmem:[%s3425_s6 + $0xd0] sm:$0xff] }
  0x89   : > { %532 = vmatpush1.bf16.msra.mxu0 %v2845_v27  ;;  %725 = vmatpush1.bf16.msra.mxu1 %v2846_v28  ;;  %v321_v26 = vpack.c.bf16 %v300_v25, %v299_v24  ;;  %v301_v27 = vld [vmem:[%s3425_s6 + $0xb0] sm:$0xff]  ;;  %v302_v28 = vld [vmem:[%s3425_s6 + $0xb8] sm:$0xff] }
  0x8a   : > { %533 = vmatprep.subr.bf16.mxu0 %v2847_v29  ;;  %726 = vmatprep.subr.bf16.mxu1 %v2849_v30  ;;  %v322_v29 = vpack.c.bf16 %v302_v28, %v301_v27  ;;  %v303_v30 = vld [vmem:[%s3425_s6 + $0xc0] sm:$0xff]  ;;  %v306_v34 = vld [vmem:[%s3425_s6 + $0xd8] sm:$0xff]  ;;  %v2877_v39 = vld [vmem:[#allocation7 + $0x70] sm:$0xff]  }
  0x8b   : > { %v2884_v49 = vld [vmem:[#allocation7 + $0xb8] sm:$0xff]  }
  0x8d   : > { %534 = vmatpush1.bf16.msra.mxu0 %v2851_v31  ;;  %727 = vmatpush1.bf16.msra.mxu1 %v2852_v32  ;;  %v304_v31 = vld [vmem:[%s3425_s6 + $0xc8] sm:$0xff] }
  0x8e   : > { %2504 = vmatprep.subr.bf16.mxu0 %v2853_v36  ;;  %2616 = vmatprep.subr.bf16.mxu1 %v2855_v40  ;;  %v323_v32 = vpack.c.bf16 %v304_v31, %v303_v30  ;;  %v307_v36 = vld [vmem:[%s3425_s6 + $0xe0] sm:$0xff]  ;;  %v2879_v40 = vld [vmem:[#allocation7 + $0xf0] sm:$0xff]  }
  0x90   : > { %552 = vmatmul.mubr.bf16.vlgmr.msra.gmra.mrb[0].mxu0 %v311_v35  ;;  %745 = vmatmul.mubr.bf16.vlgmr.msra.gmra.mrb[0].mxu1 %v311_v35  ;;  %v324_v35 = vpack.c.bf16 %v306_v34, %v305_v33 }
  0x91   : > { %561 = vmatprep.mubr.bf16.mxu0 %v3212_v0  ;;  %754 = vmatprep.mubr.bf16.mxu1 %v3212_v0 }
  0x92   : > { %2505 = vmatpush3.bf16.msra.mxu0 %v2854_v37  ;;  %2617 = vmatpush3.bf16.msra.mxu1 %v2856_v41  ;;  %v308_v37 = vld [vmem:[%s3425_s6 + $0xe8] sm:$0xff]  ;;  %v2878_v41 = vld [vmem:[#allocation7 + $0x30] sm:$0xff]  }
  0x93   : > { %2506 = vmatprep.subr.bf16.mxu0 %v2857_v42  ;;  %2618 = vmatprep.subr.bf16.mxu1 %v2859_v44  ;;  %v325_v38 = vpack.c.bf16 %v308_v37, %v307_v36  ;;  %v2880_v42 = vld [vmem:[#allocation7 + $0xb0] sm:$0xff]   ;;  %v310_v44 = vld [vmem:[%s3425_s6 + $0xf8] sm:$0xff] }
  0x96   : > { %2507 = vmatpush3.bf16.msra.mxu0 %v2858_v43  ;;  %2619 = vmatpush3.bf16.msra.mxu1 %v2860_v46  ;;  %v309_v43 = vld [vmem:[%s3425_s6 + $0xf0] sm:$0xff]  ;;  %v2883_v46 = vld [vmem:[#allocation7 + $0xf8] sm:$0xff]  }
  0x97   : > { %2508 = vmatprep.subr.bf16.mxu0 %v2861_v47  ;;  %2620 = vmatprep.subr.bf16.mxu1 %v2863_v51  ;;  %v326_v47 = vpack.c.bf16 %v310_v44, %v309_v43  ;;  %v980_v51 = vunpack.c.l.s4 %v3213_v50 }
  0x98   : > { %562 = vmatmul.mubr.bf16.gmra.mrb[4].mxu0 %v312_v45  ;;  %755 = vmatmul.mubr.bf16.gmra.mrb[4].mxu1 %v312_v45  ;;  %v2881_v45 = vld [vmem:[#allocation7 + $0x78] sm:$0xff]  }
  0x99   : > { %571 = vmatprep.mubr.bf16.mxu0 %v3212_v0  ;;  %764 = vmatprep.mubr.bf16.mxu1 %v3212_v0 }
  0x9a   : > { %2509 = vmatpush3.bf16.msra.mxu0 %v2862_v48  ;;  %2621 = vmatpush3.bf16.msra.mxu1 %v2864_v52  ;;  %v2882_v48 = vld [vmem:[#allocation7 + $0x38] sm:$0xff]   ;;  %v981_v52 = vunpack.c.0.s8 %v980_v51 }
  0x9b   : > { %2510 = vmatprep.subr.bf16.mxu0 %v2865_v53  ;;  %2622 = vmatprep.subr.bf16.mxu1 %v2867_v55 }
  0x9e   : > { %2511 = vmatpush3.bf16.msra.mxu0 %v2866_v54  ;;  %2623 = vmatpush3.bf16.msra.mxu1 %v2868_v57  ;;  %v2463_v54 = vld.sshfl [vmem:[%s4559_s2] sm:$0x33 pattern:$0x75316420] }
  0x9f   : > { %2512 = vmatprep.subr.bf16.mxu0 %v2869_v58  ;;  %2624 = vmatprep.subr.bf16.mxu1 %v2871_v62 }
  0xa0   : > { %572 = vmatmul.mubr.bf16.gmra.mrb[8].mxu0 %v313_v56  ;;  %765 = vmatmul.mubr.bf16.gmra.mrb[8].mxu1 %v313_v56  ;;  %v978_v56 = vcombine.high %v2463_v54, %v2463_v54 }
  0xa1   : > { %581 = vmatprep.mubr.bf16.mxu0 %v3212_v0  ;;  %774 = vmatprep.mubr.bf16.mxu1 %v3212_v0 }
  0xa2   : > { %2513 = vmatpush3.bf16.msra.mxu0 %v2870_v59  ;;  %2625 = vmatpush3.bf16.msra.mxu1 %v2872_v63 }
  0xa3   : > { %2514 = vmatprep.subr.bf16.mxu0 %v2873_v1  ;;  %2626 = vmatprep.subr.bf16.mxu1 %v2875_v3 }
  0xa6   : > { %2515 = vmatpush3.bf16.msra.mxu0 %v2874_v2  ;;  %2627 = vmatpush3.bf16.msra.mxu1 %v2876_v5 }
  0xa7   : > { %2516 = vmatprep.subr.bf16.mxu0 %v2877_v39  ;;  %2628 = vmatprep.subr.bf16.mxu1 %v2879_v40 }
  0xa8   : > { %582 = vmatmul.mubr.bf16.gmra.mrb[12].mxu0 %v314_v4  ;;  %775 = vmatmul.mubr.bf16.gmra.mrb[12].mxu1 %v314_v4 }
  0xa9   : > { %591 = vmatprep.mubr.bf16.mxu0 %v3212_v0  ;;  %784 = vmatprep.mubr.bf16.mxu1 %v3212_v0 }
  0xaa   : > { %2517 = vmatpush3.bf16.msra.mxu0 %v2878_v41  ;;  %2629 = vmatpush3.bf16.msra.mxu1 %v2880_v42 }
  0xab   : > { %2518 = vmatprep.subr.bf16.mxu0 %v2881_v45  ;;  %2630 = vmatprep.subr.bf16.mxu1 %v2883_v46 }
  0xae   : > { %2519 = vmatpush3.bf16.msra.mxu0 %v2882_v48  ;;  %2631 = vmatpush3.bf16.msra.mxu1 %v2884_v49 }
  0xb0   : > { %592 = vmatmul.mubr.bf16.gmra.mrb[16].mxu0 %v315_v8  ;;  %785 = vmatmul.mubr.bf16.gmra.mrb[16].mxu1 %v315_v8 }
  0xb1   : > { %601 = vmatprep.mubr.bf16.mxu0 %v3212_v0  ;;  %794 = vmatprep.mubr.bf16.mxu1 %v3212_v0 }
  0xb8   : > { %602 = vmatmul.mubr.bf16.gmra.mrb[20].mxu0 %v316_v11  ;;  %795 = vmatmul.mubr.bf16.gmra.mrb[20].mxu1 %v316_v11 }
  0xb9   : > { %611 = vmatprep.mubr.bf16.mxu0 %v3212_v0  ;;  %804 = vmatprep.mubr.bf16.mxu1 %v3212_v0 }
  0xc0   : > { %612 = vmatmul.mubr.bf16.gmra.mrb[24].mxu0 %v317_v14  ;;  %805 = vmatmul.mubr.bf16.gmra.mrb[24].mxu1 %v317_v14 }
  0xc1   : > { %621 = vmatprep.mubr.bf16.mxu0 %v3212_v0  ;;  %814 = vmatprep.mubr.bf16.mxu1 %v3212_v0 }
  0xc8   : > { %622 = vmatmul.mubr.bf16.gmra.mrb[28].mxu0 %v318_v17  ;;  %815 = vmatmul.mubr.bf16.gmra.mrb[28].mxu1 %v318_v17 }
  0xc9   : > { %631 = vmatprep.mubr.bf16.mxu0 %v3212_v0  ;;  %824 = vmatprep.mubr.bf16.mxu1 %v3212_v0 }
  0xd0   : > { %632 = vmatmul.mubr.bf16.gmra.mrb[32].mxu0 %v319_v20  ;;  %825 = vmatmul.mubr.bf16.gmra.mrb[32].mxu1 %v319_v20 }
  0xd1   : > { %641 = vmatprep.mubr.bf16.mxu0 %v3212_v0  ;;  %834 = vmatprep.mubr.bf16.mxu1 %v3212_v0 }
  0xd8   : > { %642 = vmatmul.mubr.bf16.gmra.mrb[36].mxu0 %v320_v23  ;;  %835 = vmatmul.mubr.bf16.gmra.mrb[36].mxu1 %v320_v23 }
  0xd9   : > { %651 = vmatprep.mubr.bf16.mxu0 %v3212_v0  ;;  %844 = vmatprep.mubr.bf16.mxu1 %v3212_v0 }
  0xe0   : > { %652 = vmatmul.mubr.bf16.gmra.mrb[40].mxu0 %v321_v26  ;;  %845 = vmatmul.mubr.bf16.gmra.mrb[40].mxu1 %v321_v26 }
  0xe1   : > { %661 = vmatprep.mubr.bf16.mxu0 %v3212_v0  ;;  %854 = vmatprep.mubr.bf16.mxu1 %v3212_v0 }
  0xe8   : > { %662 = vmatmul.mubr.bf16.gmra.mrb[44].mxu0 %v322_v29  ;;  %855 = vmatmul.mubr.bf16.gmra.mrb[44].mxu1 %v322_v29 }
  0xe9   : > { %671 = vmatprep.mubr.bf16.mxu0 %v3212_v0  ;;  %864 = vmatprep.mubr.bf16.mxu1 %v3212_v0 }
  0xf0   : > { %672 = vmatmul.mubr.bf16.gmra.mrb[48].mxu0 %v323_v32  ;;  %865 = vmatmul.mubr.bf16.gmra.mrb[48].mxu1 %v323_v32 }
  0xf1   : > { %681 = vmatprep.mubr.bf16.mxu0 %v3212_v0  ;;  %874 = vmatprep.mubr.bf16.mxu1 %v3212_v0 }
  0xf8   : > { %682 = vmatmul.mubr.bf16.gmra.mrb[52].mxu0 %v324_v35  ;;  %875 = vmatmul.mubr.bf16.gmra.mrb[52].mxu1 %v324_v35 }
  0xf9   : > { %691 = vmatprep.mubr.bf16.mxu0 %v3212_v0  ;;  %884 = vmatprep.mubr.bf16.mxu1 %v3212_v0 }
 0x100   : > { %692 = vmatmul.mubr.bf16.gmra.mrb[56].mxu0 %v325_v38  ;;  %885 = vmatmul.mubr.bf16.gmra.mrb[56].mxu1 %v325_v38 }
 0x101   : > { %701 = vmatprep.mubr.bf16.mxu0 %v3212_v0  ;;  %894 = vmatprep.mubr.bf16.mxu1 %v3212_v0  ;;  %v982_v0 = vlaneseq }
 0x103   : > { %v983_v53 = vshrl.u32 %v982_v0, 7 }
 0x105   : > { %v984_v55 = vsub.s32 %v981_v52, %v983_v53  ;;  %v1000_v62 = vsub.s32 0, %v983_v53 }
 0x107   : > { %v985_v57 = vrot.slane %v2463_v54, %v984_v55  ;;  %v992_v58 = vrot.slane %v978_v56, %v984_v55 }
 0x108   : > { %702 = vmatmul.mubr.bf16.gmra.mrb[60].mxu0 %v326_v47  ;;  %895 = vmatmul.mubr.bf16.gmra.mrb[60].mxu1 %v326_v47 }
 0x109   : > { %v993_v59 = vcombine.high %v985_v57, %v985_v57  ;;  %v994_v60 = vcombine.high %v992_v58, %v992_v58  ;;  %v996_v61 = vpack.i.b16 %v985_v57, %v985_v57  ;;  %v1003_v1 = vpack.i.b16 %v992_v58, %v992_v58 }
 0x10b   : > { %v1010_v63 = vpack.i.b16 %v993_v59, %v993_v59  ;;  %v1017_v2 = vpack.i.b16 %v994_v60, %v994_v60  ;;  %v3502_v7 = vrot.slane %v996_v61, %v1000_v62  ;;  %v3506_v11 = vrot.slane %v1003_v1, %v1000_v62 }
 0x10d   : > { %v3504_v8 = vrot.slane %v1010_v63, %v1000_v62  ;;  %v3508_v12 = vrot.slane %v1017_v2, %v1000_v62 }
 0x163   : > { %v553_v3 = vpop.f32.mrb[0].mxu0  ;;  %v746_v4 = vpop.f32.mrb[0].mxu1 }
 0x164   : > { %v555_v5 = vpop.f32.mrb[1].mxu0  ;;  %v748_v6 = vpop.f32.mrb[1].mxu1 }
 0x165   : > { %v557_v9 = vpop.f32.mrb[2].mxu0  ;;  %v750_v10 = vpop.f32.mrb[2].mxu1 }
 0x166   : > { %v905_v13 = vpack.c.bf16 %v557_v9, %v553_v3  ;;  %v907_v14 = vpack.c.bf16 %v750_v10, %v746_v4  ;;  %v559_v15 = vpop.f32.mrb[3].mxu0  ;;  %v752_v16 = vpop.f32.mrb[3].mxu1 }
 0x167   : > { %v906_v17 = vpack.c.bf16 %v559_v15, %v555_v5  ;;  %v908_v18 = vpack.c.bf16 %v752_v16, %v748_v6 }
 0x168   : > { %v3511_v19 = vadd.bf16 %v3502_v7, %v905_v13  ;;  %v3514_v20 = vadd.bf16 %v3504_v8, %v907_v14 }
 0x169   : > { %v3517_v21 = vadd.bf16 %v3506_v11, %v906_v17  ;;  %v3520_v22 = vadd.bf16 %v3508_v12, %v908_v18 }
 0x16a   : > { %v1087_v23 = vmul.bf16 %v3511_v19, %v3511_v19  ;;  %v1089_v24 = vmul.bf16 %v3514_v20, %v3514_v20 }
 0x16b   : > { %v1088_v25 = vmul.bf16 %v3517_v21, %v3517_v21  ;;  %v1090_v26 = vmul.bf16 %v3520_v22, %v3520_v22  ;;  %v563_v27 = vpop.f32.mrb[4].mxu0  ;;  %v756_v28 = vpop.f32.mrb[4].mxu1 }
 0x16c   : > { %v1151_v29 = vmul.bf16 %v1087_v23, %v3511_v19  ;;  %v1153_v30 = vmul.bf16 %v1089_v24, %v3514_v20  ;;  %v565_v31 = vpop.f32.mrb[5].mxu0  ;;  %v758_v32 = vpop.f32.mrb[5].mxu1 }
 0x16d   : > { %v1152_v33 = vmul.bf16 %v1088_v25, %v3517_v21  ;;  %v1154_v34 = vmul.bf16 %v1090_v26, %v3520_v22  ;;  %v567_v35 = vpop.f32.mrb[6].mxu0  ;;  %v760_v36 = vpop.f32.mrb[6].mxu1 }
 0x16e   : > { %v1215_v37 = vmul.bf16 1027030327, %v1151_v29  ;;  %v1217_v38 = vmul.bf16 1027030327, %v1153_v30  ;;  %v909_v39 = vpack.c.bf16 %v567_v35, %v563_v27  ;;  %v911_v40 = vpack.c.bf16 %v760_v36, %v756_v28  ;;  %v569_v41 = vpop.f32.mrb[7].mxu0  ;;  %v762_v42 = vpop.f32.mrb[7].mxu1 }
 0x16f   : > { %v1216_v43 = vmul.bf16 1027030327, %v1152_v33  ;;  %v1218_v44 = vmul.bf16 1027030327, %v1154_v34  ;;  %v910_v45 = vpack.c.bf16 %v569_v41, %v565_v31  ;;  %v912_v46 = vpack.c.bf16 %v762_v42, %v758_v32 }
 0x170   : > { %v1279_v47 = vadd.bf16 %v1215_v37, %v3511_v19  ;;  %v1281_v48 = vadd.bf16 %v1217_v38, %v3514_v20  ;;  %v3537_v49 = vadd.bf16 %v3502_v7, %v909_v39  ;;  %v3540_v50 = vadd.bf16 %v3504_v8, %v911_v40 }
 0x171   : > { %v3543_v51 = vadd.bf16 %v3506_v11, %v910_v45  ;;  %v3546_v0 = vadd.bf16 %v3508_v12, %v912_v46  ;;  %v1280_v52 = vadd.bf16 %v1216_v43, %v3517_v21  ;;  %v1282_v53 = vadd.bf16 %v1218_v44, %v3520_v22 }
 0x172   : > { %v1343_v54 = vmul.bf16 1061961548, %v1279_v47  ;;  %v1345_v55 = vmul.bf16 1061961548, %v1281_v48  ;;  %v1091_v56 = vmul.bf16 %v3537_v49, %v3537_v49  ;;  %v1093_v57 = vmul.bf16 %v3540_v50, %v3540_v50 }
 0x173   : > { %v1092_v58 = vmul.bf16 %v3543_v51, %v3543_v51  ;;  %v1094_v59 = vmul.bf16 %v3546_v0, %v3546_v0  ;;  %v573_v60 = vpop.f32.mrb[8].mxu0  ;;  %v766_v61 = vpop.f32.mrb[8].mxu1  ;;  %v1344_v3 = vmul.bf16 1061961548, %v1280_v52  ;;  %v1346_v10 = vmul.bf16 1061961548, %v1282_v53 }
 0x174   : > { %2885 = vtanh.bf16 %v1343_v54  ;;  %v1155_v62 = vmul.bf16 %v1091_v56, %v3537_v49  ;;  %v1157_v63 = vmul.bf16 %v1093_v57, %v3540_v50  ;;  %v575_v1 = vpop.f32.mrb[9].mxu0  ;;  %v768_v2 = vpop.f32.mrb[9].mxu1 }
 0x175   : > { %2887 = vtanh.bf16 %v1345_v55  ;;  %v1156_v4 = vmul.bf16 %v1092_v58, %v3543_v51  ;;  %v1158_v5 = vmul.bf16 %v1094_v59, %v3546_v0  ;;  %v577_v6 = vpop.f32.mrb[10].mxu0  ;;  %v770_v9 = vpop.f32.mrb[10].mxu1 }
 0x176   : > { %v1219_v13 = vmul.bf16 1027030327, %v1155_v62  ;;  %v1221_v14 = vmul.bf16 1027030327, %v1157_v63  ;;  %v913_v15 = vpack.c.bf16 %v577_v6, %v573_v60  ;;  %v915_v16 = vpack.c.bf16 %v770_v9, %v766_v61  ;;  %v579_v17 = vpop.f32.mrb[11].mxu0  ;;  %v772_v18 = vpop.f32.mrb[11].mxu1 }
 0x177   : > { %v1220_v23 = vmul.bf16 1027030327, %v1156_v4  ;;  %v1222_v24 = vmul.bf16 1027030327, %v1158_v5  ;;  %v914_v25 = vpack.c.bf16 %v579_v17, %v575_v1  ;;  %v916_v26 = vpack.c.bf16 %v772_v18, %v768_v2 }
 0x178   : > { %v3563_v27 = vadd.bf16 %v3502_v7, %v913_v15  ;;  %v3566_v28 = vadd.bf16 %v3504_v8, %v915_v16  ;;  %2889 = vtanh.bf16 %v1344_v3  ;;  %v1283_v29 = vadd.bf16 %v1219_v13, %v3537_v49 }
 0x179   : > { %v3570_v30 = vadd.bf16 %v3506_v11, %v914_v25  ;;  %v3573_v31 = vadd.bf16 %v3508_v12, %v916_v26  ;;  %2891 = vtanh.bf16 %v1346_v10  ;;  %v1284_v32 = vadd.bf16 %v1220_v23, %v3543_v51 }
 0x17a   : > { %v1095_v33 = vmul.bf16 %v3563_v27, %v3563_v27  ;;  %v1097_v34 = vmul.bf16 %v3566_v28, %v3566_v28  ;;  %v1286_v35 = vadd.bf16 %v1222_v24, %v3546_v0  ;;  %v1347_v36 = vmul.bf16 1061961548, %v1283_v29 }
 0x17b   : > { %v1096_v37 = vmul.bf16 %v3570_v30, %v3570_v30  ;;  %v1098_v38 = vmul.bf16 %v3573_v31, %v3573_v31  ;;  %v583_v39 = vpop.f32.mrb[12].mxu0  ;;  %v776_v40 = vpop.f32.mrb[12].mxu1  ;;  %v1348_v41 = vmul.bf16 1061961548, %v1284_v32  ;;  %v1285_v42 = vadd.bf16 %v1221_v14, %v3540_v50 }
 0x17c   : > { %v3587_v43 = vmul.bf16 %v1095_v33, %v3563_v27  ;;  %v585_v44 = vpop.f32.mrb[13].mxu0  ;;  %v778_v45 = vpop.f32.mrb[13].mxu1  ;;  %v1350_v46 = vmul.bf16 1061961548, %v1286_v35  ;;  %2893 = vtanh.bf16 %v1347_v36  ;;  %v3593_v56 = vmul.bf16 %v1097_v34, %v3566_v28 }
 0x17d   : > { %v1160_v47 = vmul.bf16 %v1096_v37, %v3570_v30  ;;  %v1162_v48 = vmul.bf16 %v1098_v38, %v3573_v31  ;;  %v587_v52 = vpop.f32.mrb[14].mxu0  ;;  %v780_v53 = vpop.f32.mrb[14].mxu1  ;;  %2895 = vtanh.bf16 %v1348_v41  ;;  %v1349_v54 = vmul.bf16 1061961548, %v1285_v42 }
 0x17e   : > { %v1223_v55 = vmul.bf16 1027030327, %v3587_v43  ;;  %v917_v57 = vpack.c.bf16 %v587_v52, %v583_v39  ;;  %v919_v58 = vpack.c.bf16 %v780_v53, %v776_v40  ;;  %v589_v59 = vpop.f32.mrb[15].mxu0  ;;  %v782_v60 = vpop.f32.mrb[15].mxu1  ;;  %2897 = vtanh.bf16 %v1350_v46 }
 0x17f   : > { %v2886_v61 = vpop.eup %2885  ;;  %v1224_v62 = vmul.bf16 1027030327, %v1160_v47  ;;  %v1226_v63 = vmul.bf16 1027030327, %v1162_v48  ;;  %v918_v1 = vpack.c.bf16 %v589_v59, %v585_v44  ;;  %v920_v2 = vpack.c.bf16 %v782_v60, %v778_v45 }
 0x180   : > { %v2888_v3 = vpop.eup %2887  ;;  %v1471_v4 = vadd.bf16 1065369472, %v2886_v61  ;;  %v3596_v5 = vadd.bf16 %v3502_v7, %v917_v57  ;;  %v3599_v6 = vadd.bf16 %v3504_v8, %v919_v58  ;;  %2899 = vtanh.bf16 %v1349_v54 }
 0x181   : > { %v1473_v9 = vadd.bf16 1065369472, %v2888_v3  ;;  %v3602_v10 = vadd.bf16 %v3506_v11, %v918_v1  ;;  %v3605_v13 = vadd.bf16 %v3508_v12, %v920_v2  ;;  %v1225_v15 = vmul.bf16 1027030327, %v3593_v56 }
 0x182   : > { %v3607_v14 = vmul.bf16 1056980736, %v1471_v4  ;;  %v1099_v16 = vmul.bf16 %v3596_v5, %v3596_v5  ;;  %v1101_v17 = vmul.bf16 %v3599_v6, %v3599_v6  ;;  %v3619_v32 = vadd.bf16 %v1224_v62, %v3570_v30 }
 0x183   : > { %v2890_v18 = vpop.eup %2889  ;;  %v1537_v23 = vmul.bf16 1056980736, %v1473_v9  ;;  %v1100_v24 = vmul.bf16 %v3602_v10, %v3602_v10  ;;  %v1102_v25 = vmul.bf16 %v3605_v13, %v3605_v13  ;;  %v593_v26 = vpop.f32.mrb[16].mxu0  ;;  %v3628_v39 = vadd.bf16 %v1226_v63, %v3573_v31 }
 0x184   : > { %v786_v29 = vpop.f32.mrb[16].mxu1  ;;  %v2892_v33 = vpop.eup %2891  ;;  %v3622_v34 = vmul.bf16 %v1099_v16, %v3596_v5  ;;  %v3625_v35 = vmul.bf16 %v1101_v17, %v3599_v6  ;;  %v1472_v38 = vadd.bf16 1065369472, %v2890_v18  ;;  %v1599_v40 = vmul.bf16 %v3607_v14, %v3511_v19 }
 0x185   : > { %v595_v36 = vpop.f32.mrb[17].mxu0  ;;  %v788_v37 = vpop.f32.mrb[17].mxu1  ;;  %v1601_v41 = vmul.bf16 %v1537_v23, %v3514_v20  ;;  %v3634_v42 = vmul.bf16 %v1100_v24, %v3602_v10  ;;  %v1474_v46 = vadd.bf16 1065369472, %v2892_v33  ;;  %v3638_v48 = vmul.bf16 %v1102_v25, %v3605_v13 }
 0x186   : > { %v597_v44 = vpop.f32.mrb[18].mxu0  ;;  %v790_v45 = vpop.f32.mrb[18].mxu1  ;;  %v1227_v47 = vmul.bf16 1027030327, %v3622_v34  ;;  %v1229_v19 = vmul.bf16 1027030327, %v3625_v35 }
 0x187   : > { %v921_v52 = vpack.c.bf16 %v597_v44, %v593_v26  ;;  %v923_v53 = vpack.c.bf16 %v790_v45, %v786_v29  ;;  %v599_v54 = vpop.f32.mrb[19].mxu0  ;;  %v792_v57 = vpop.f32.mrb[19].mxu1  ;;  %v1228_v20 = vmul.bf16 1027030327, %v3634_v42  ;;  %v1536_v1 = vmul.bf16 1056980736, %v1472_v38 }
 0x188   : > { %v2894_v58 = vpop.eup %2893  ;;  %v922_v59 = vpack.c.bf16 %v599_v54, %v595_v36  ;;  %v924_v60 = vpack.c.bf16 %v792_v57, %v788_v37  ;;  %v1538_v2 = vmul.bf16 1056980736, %v1474_v46  ;;  %v1230_v25 = vmul.bf16 1027030327, %v3638_v48 }
 0x189   : > { %v2896_v61 = vpop.eup %2895  ;;  %v3643_v62 = vadd.bf16 %v3502_v7, %v921_v52  ;;  %v3646_v63 = vadd.bf16 %v3504_v8, %v923_v53  ;;  %v1475_v14 = vadd.bf16 1065369472, %v2894_v58  ;;  %v1600_v18 = vmul.bf16 %v1536_v1, %v3517_v21 }
 0x18a   : > { %v3649_v3 = vadd.bf16 %v3506_v11, %v922_v59  ;;  %v3652_v4 = vadd.bf16 %v3508_v12, %v924_v60  ;;  %v1476_v9 = vadd.bf16 1065369472, %v2896_v61  ;;  %v1602_v23 = vmul.bf16 %v1538_v2, %v3520_v22  ;;  %v2898_v24 = vpop.eup %2897 }
 0x18b   : > { %v1103_v16 = vmul.bf16 %v3643_v62, %v3643_v62  ;;  %v1105_v17 = vmul.bf16 %v3646_v63, %v3646_v63  ;;  %v603_v33 = vpop.f32.mrb[20].mxu0  ;;  %v796_v36 = vpop.f32.mrb[20].mxu1  ;;  %1958 = vmatprep.mubr.bf16.mxu0 %v1600_v18  ;;  %v1478_v46 = vadd.bf16 1065369472, %v2898_v24  ;;  %v1539_v52 = vmul.bf16 1056980736, %v1475_v14 }
 0x18c   : > { %v1104_v26 = vmul.bf16 %v3649_v3, %v3649_v3  ;;  %v1106_v29 = vmul.bf16 %v3652_v4, %v3652_v4  ;;  %v1540_v37 = vmul.bf16 1056980736, %v1476_v9  ;;  %v2900_v38 = vpop.eup %2899  ;;  %2119 = vmatprep.mubr.bf16.mxu1 %v1602_v23  ;;  %v605_v22 = vpop.f32.mrb[21].mxu0  ;;  %1959 = vmatmul.mubr.bf16.vlgmr.msra.gmra.mrb[64].mxu0 %v1599_v40  ;;  %v1352_v60 = vmul.bf16 1061961548, %v3619_v32 }
 0x18d   : > { %v3666_v44 = vmul.bf16 %v1103_v16, %v3643_v62  ;;  %v3669_v21 = vmul.bf16 %v1105_v17, %v3646_v63  ;;  %v798_v45 = vpop.f32.mrb[21].mxu1  ;;  %2120 = vmatmul.mubr.bf16.vlgmr.msra.gmra.mrb[64].mxu1 %v1601_v41  ;;  %v607_v54 = vpop.f32.mrb[22].mxu0  ;;  %v1477_v59 = vadd.bf16 1065369472, %v2900_v38  ;;  %v1542_v23 = vmul.bf16 1056980736, %v1478_v46 }
 0x18e   : > { %v3672_v53 = vmul.bf16 %v1104_v26, %v3649_v3  ;;  %v800_v57 = vpop.f32.mrb[22].mxu1  ;;  %v1604_v58 = vmul.bf16 %v1540_v37, %v3543_v51  ;;  %v3678_v1 = vmul.bf16 %v1106_v29, %v3652_v4  ;;  %v925_v2 = vpack.c.bf16 %v607_v54, %v603_v33  ;;  %v609_v14 = vpop.f32.mrb[23].mxu0 }
 0x18f   : > { %v927_v9 = vpack.c.bf16 %v800_v57, %v796_v36  ;;  %v802_v16 = vpop.f32.mrb[23].mxu1  ;;  %v926_v41 = vpack.c.bf16 %v609_v14, %v605_v22  ;;  %v1603_v24 = vmul.bf16 %v1539_v52, %v3537_v49  ;;  %v1541_v33 = vmul.bf16 1056980736, %v1477_v59 }
 0x190   : > { %v1232_v40 = vmul.bf16 1027030327, %v3672_v53  ;;  %v928_v18 = vpack.c.bf16 %v802_v16, %v798_v45  ;;  %1966 = vmatprep.mubr.bf16.mxu0 %v1604_v58  ;;  %v3683_v51 = vadd.bf16 %v3502_v7, %v925_v2  ;;  %2901 = vtanh.bf16 %v1352_v60 }
 0x191   : > { %v3686_v32 = vadd.bf16 %v3504_v8, %v927_v9  ;;  %v3690_v26 = vadd.bf16 %v3506_v11, %v926_v41  ;;  %v1606_v38 = vmul.bf16 %v1542_v23, %v3546_v0  ;;  %v1354_v22 = vmul.bf16 1061961548, %v3628_v39 }
 0x192   : > { %v3693_v29 = vadd.bf16 %v3508_v12, %v928_v18  ;;  %v1107_v36 = vmul.bf16 %v3683_v51, %v3683_v51  ;;  %v1605_v46 = vmul.bf16 %v1541_v33, %v3540_v50  ;;  %v1287_v57 = vadd.bf16 %v1223_v55, %v3563_v27 }
 0x193   : > { %v1109_v37 = vmul.bf16 %v3686_v32, %v3686_v32  ;;  %v1108_v49 = vmul.bf16 %v3690_v26, %v3690_v26  ;;  %v613_v52 = vpop.f32.mrb[24].mxu0  ;;  %v806_v54 = vpop.f32.mrb[24].mxu1  ;;  %2127 = vmatprep.mubr.bf16.mxu1 %v1606_v38  ;;  %2903 = vtanh.bf16 %v1354_v22  ;;  %v1289_v50 = vadd.bf16 %v1225_v15, %v3566_v28 }
 0x194   : > { %v1110_v45 = vmul.bf16 %v3693_v29, %v3693_v29  ;;  %v3710_v58 = vmul.bf16 %v1107_v36, %v3683_v51  ;;  %v615_v39 = vpop.f32.mrb[25].mxu0  ;;  %v808_v59 = vpop.f32.mrb[25].mxu1  ;;  %v1234_v60 = vmul.bf16 1027030327, %v3678_v1  ;;  %1967 = vmatmul.mubr.bf16.gmra.mrb[68].mxu0 %v1603_v24  ;;  %v1351_v9 = vmul.bf16 1061961548, %v1287_v57 }
 0x195   : > { %v3713_v0 = vmul.bf16 %v1109_v37, %v3686_v32  ;;  %v3720_v2 = vmul.bf16 %v1108_v49, %v3690_v26  ;;  %2128 = vmatmul.mubr.bf16.gmra.mrb[68].mxu1 %v1605_v46  ;;  %v617_v43 = vpop.f32.mrb[26].mxu0  ;;  %v810_v55 = vpop.f32.mrb[26].mxu1  ;;  %v1292_v14 = vadd.bf16 %v1228_v20, %v3602_v10  ;;  %v1353_v20 = vmul.bf16 1061961548, %v1289_v50 }
 0x196   : > { %v3727_v41 = vmul.bf16 %v1110_v45, %v3693_v29  ;;  %v929_v56 = vpack.c.bf16 %v617_v43, %v613_v52  ;;  %v931_v15 = vpack.c.bf16 %v810_v55, %v806_v54  ;;  %v619_v18 = vpop.f32.mrb[27].mxu0  ;;  %v812_v23 = vpop.f32.mrb[27].mxu1  ;;  %2905 = vtanh.bf16 %v1351_v9 }
 0x197   : > { %v930_v36 = vpack.c.bf16 %v619_v18, %v615_v39  ;;  %v932_v37 = vpack.c.bf16 %v812_v23, %v808_v59  ;;  %v1356_v45 = vmul.bf16 1061961548, %v1292_v14  ;;  %v1294_v46 = vadd.bf16 %v1230_v25, %v3605_v13 }
 0x198   : > { %v3732_v38 = vadd.bf16 %v3502_v7, %v929_v56  ;;  %v3735_v42 = vadd.bf16 %v3504_v8, %v931_v15  ;;  %2907 = vtanh.bf16 %v1353_v20  ;;  %v1291_v57 = vadd.bf16 %v1227_v47, %v3596_v5 }
 0x199   : > { %v3738_v22 = vadd.bf16 %v3506_v11, %v930_v36  ;;  %v3741_v49 = vadd.bf16 %v3508_v12, %v932_v37  ;;  %2909 = vtanh.bf16 %v1356_v45  ;;  %v1358_v25 = vmul.bf16 1061961548, %v1294_v46 }
 0x19a   : > { %v1111_v52 = vmul.bf16 %v3732_v38, %v3732_v38  ;;  %v1113_v54 = vmul.bf16 %v3735_v42, %v3735_v42  ;;  %v1355_v56 = vmul.bf16 1061961548, %v1291_v57  ;;  %v1293_v37 = vadd.bf16 %v1229_v19, %v3599_v6 }
 0x19b   : > { %v1112_v39 = vmul.bf16 %v3738_v22, %v3738_v22  ;;  %v1114_v59 = vmul.bf16 %v3741_v49, %v3741_v49  ;;  %v623_v50 = vpop.f32.mrb[28].mxu0  ;;  %v816_v48 = vpop.f32.mrb[28].mxu1  ;;  %2911 = vtanh.bf16 %v1358_v25 }
 0x19c   : > { %v2902_v43 = vpop.eup %2901  ;;  %v3759_v9 = vmul.bf16 %v1111_v52, %v3732_v38  ;;  %v3762_v14 = vmul.bf16 %v1113_v54, %v3735_v42  ;;  %v625_v34 = vpop.f32.mrb[29].mxu0  ;;  %2913 = vtanh.bf16 %v1355_v56  ;;  %v1298_v56 = vadd.bf16 %v1234_v60, %v3652_v4 }
 0x19d   : > { %v818_v47 = vpop.f32.mrb[29].mxu1  ;;  %v3765_v15 = vmul.bf16 %v1112_v39, %v3738_v22  ;;  %v1480_v18 = vadd.bf16 1065369472, %v2902_v43  ;;  %v627_v23 = vpop.f32.mrb[30].mxu0  ;;  %v3772_v45 = vmul.bf16 %v1114_v59, %v3741_v49 }
 0x19e   : > { %v820_v36 = vpop.f32.mrb[30].mxu1  ;;  %v933_v46 = vpack.c.bf16 %v627_v23, %v623_v50  ;;  %v629_v54 = vpop.f32.mrb[31].mxu0  ;;  %v1357_v23 = vmul.bf16 1061961548, %v1293_v37 }
 0x19f   : > { %v935_v52 = vpack.c.bf16 %v820_v36, %v816_v48  ;;  %v822_v57 = vpop.f32.mrb[31].mxu1  ;;  %v2904_v33 = vpop.eup %2903  ;;  %v1544_v16 = vmul.bf16 1056980736, %v1480_v18  ;;  %v934_v25 = vpack.c.bf16 %v629_v54, %v625_v34 }
 0x1a0   : > { %v1482_v55 = vadd.bf16 1065369472, %v2904_v33  ;;  %v3777_v35 = vadd.bf16 %v3502_v7, %v933_v46  ;;  %v936_v59 = vpack.c.bf16 %v822_v57, %v818_v47  ;;  %2915 = vtanh.bf16 %v1357_v23 }
 0x1a1   : > { %v3780_v19 = vadd.bf16 %v3504_v8, %v935_v52  ;;  %v1608_v50 = vmul.bf16 %v1544_v16, %v3570_v30  ;;  %v3784_v48 = vadd.bf16 %v3506_v11, %v934_v25  ;;  %v2906_v46 = vpop.eup %2905 }
 0x1a2   : > { %v1546_v36 = vmul.bf16 1056980736, %v1482_v55  ;;  %v1115_v18 = vmul.bf16 %v3777_v35, %v3777_v35  ;;  %v3791_v34 = vadd.bf16 %v3508_v12, %v936_v59  ;;  %v1296_v55 = vadd.bf16 %v1232_v40, %v3649_v3 }
 0x1a3   : > { %4605 = vst [vmem:[#allocation12_spill] sm:$0xff] %v3780_v19  ;;  %v1117_v33 = vmul.bf16 %v3780_v19, %v3780_v19  ;;  %1974 = vmatprep.mubr.bf16.mxu0 %v1608_v50  ;;  %v1116_v30 = vmul.bf16 %v3784_v48, %v3784_v48  ;;  %v633_v16 = vpop.f32.mrb[32].mxu0  ;;  %v826_v47 = vpop.f32.mrb[32].mxu1  ;;  %v1479_v52 = vadd.bf16 1065369472, %v2906_v46 }
 0x1a4   : > { %v1610_v37 = vmul.bf16 %v1546_v36, %v3573_v31  ;;  %v3803_v54 = vmul.bf16 %v1115_v18, %v3777_v35  ;;  %v635_v25 = vpop.f32.mrb[33].mxu0  ;;  %v828_v59 = vpop.f32.mrb[33].mxu1  ;;  %v1118_v53 = vmul.bf16 %v3791_v34, %v3791_v34  ;;  %v1360_v60 = vmul.bf16 1061961548, %v1296_v55 }
 0x1a5   : > { %v3806_v57 = vmul.bf16 %v1117_v33, %v3780_v19  ;;  %v2908_v50 = vpop.eup %2907  ;;  %v637_v40 = vpop.f32.mrb[34].mxu0  ;;  %v1543_v31 = vmul.bf16 1056980736, %v1479_v52  ;;  %v1362_v46 = vmul.bf16 1061961548, %v1298_v56  ;;  %v3814_v43 = vmul.bf16 %v1116_v30, %v3784_v48 }
 0x1a6   : > { %v830_v1 = vpop.f32.mrb[34].mxu1  ;;  %v2910_v39 = vpop.eup %2909  ;;  %2135 = vmatprep.mubr.bf16.mxu1 %v1610_v37  ;;  %v1481_v36 = vadd.bf16 1065369472, %v2908_v50  ;;  %v937_v18 = vpack.c.bf16 %v637_v40, %v633_v16  ;;  %v3821_v16 = vmul.bf16 %v1118_v53, %v3791_v34  ;;  %2917 = vtanh.bf16 %v1360_v60 }
 0x1a7   : > { %4606 = vst [vmem:[#allocation13_spill] sm:$0xff] %v3806_v57  ;;  %v1484_v23 = vadd.bf16 1065369472, %v2910_v39  ;;  %v2912_v24 = vpop.eup %2911  ;;  %v1607_v17 = vmul.bf16 %v1543_v31, %v3563_v27  ;;  %v939_v37 = vpack.c.bf16 %v830_v1, %v826_v47  ;;  %v639_v52 = vpop.f32.mrb[35].mxu0  ;;  %2919 = vtanh.bf16 %v1362_v46 }
 0x1a8   : > { %v1545_v61 = vmul.bf16 1056980736, %v1481_v36  ;;  %v3818_v55 = vadd.bf16 %v3502_v7, %v937_v18  ;;  %v832_v50 = vpop.f32.mrb[35].mxu1  ;;  %v1486_v40 = vadd.bf16 1065369472, %v2912_v24  ;;  %v938_v20 = vpack.c.bf16 %v639_v52, %v635_v25  ;;  %v2914_v25 = vpop.eup %2913 }
 0x1a9   : > { %v1548_v56 = vmul.bf16 1056980736, %v1484_v23  ;;  %1975 = vmatmul.mubr.bf16.gmra.mrb[72].mxu0 %v1607_v17  ;;  %v3827_v27 = vadd.bf16 %v3504_v8, %v939_v37  ;;  %v940_v31 = vpack.c.bf16 %v832_v50, %v828_v59  ;;  %v1483_v53 = vadd.bf16 1065369472, %v2914_v25 }
 0x1aa   : > { %4607 = vst [vmem:[#allocation14_spill] sm:$0xff] %v3818_v55  ;;  %v1609_v30 = vmul.bf16 %v1545_v61, %v3566_v28  ;;  %v1119_v39 = vmul.bf16 %v3818_v55, %v3818_v55  ;;  %v1550_v1 = vmul.bf16 1056980736, %v1486_v40  ;;  %v3831_v36 = vadd.bf16 %v3506_v11, %v938_v20 }
 0x1ab   : > { %v1612_v47 = vmul.bf16 %v1548_v56, %v3602_v10  ;;  %v643_v23 = vpop.f32.mrb[36].mxu0  ;;  %v836_v24 = vpop.f32.mrb[36].mxu1  ;;  %v1121_v61 = vmul.bf16 %v3827_v27, %v3827_v27  ;;  %v3839_v17 = vadd.bf16 %v3508_v12, %v940_v31  ;;  %v4608_v18 = vmul.bf16 1027030327, %v3666_v44 }
 0x1ac   : > { %2136 = vmatmul.mubr.bf16.gmra.mrb[72].mxu1 %v1609_v30  ;;  %v3834_v28 = vmul.bf16 %v1119_v39, %v3818_v55  ;;  %v645_v10 = vpop.f32.mrb[37].mxu0  ;;  %v838_v59 = vpop.f32.mrb[37].mxu1  ;;  %v1614_v20 = vmul.bf16 %v1550_v1, %v3605_v13  ;;  %v1120_v60 = vmul.bf16 %v3831_v36, %v3831_v36  ;;  %v4609_v13 = vmul.bf16 1027030327, %v3669_v21 }
 0x1ad   : > { %1982 = vmatprep.mubr.bf16.mxu0 %v1612_v47  ;;  %v1295_v37 = vadd.bf16 %v4608_v18, %v3643_v62  ;;  %v647_v52 = vpop.f32.mrb[38].mxu0  ;;  %v840_v50 = vpop.f32.mrb[38].mxu1  ;;  %v1122_v30 = vmul.bf16 %v3839_v17, %v3839_v17  ;;  %v1547_v1 = vmul.bf16 1056980736, %v1483_v53  ;;  %v3856_v33 = vmul.bf16 %v1121_v61, %v3827_v27 }
 0x1ae   : > { %v2916_v56 = vpop.eup %2915  ;;  %v1297_v39 = vadd.bf16 %v4609_v13, %v3646_v63  ;;  %v649_v31 = vpop.f32.mrb[39].mxu0  ;;  %2143 = vmatprep.mubr.bf16.mxu1 %v1614_v20  ;;  %v941_v46 = vpack.c.bf16 %v647_v52, %v643_v23  ;;  %v3860_v19 = vmul.bf16 %v1120_v60, %v3831_v36  ;;  %v943_v53 = vpack.c.bf16 %v840_v50, %v836_v24 }
 0x1af   : > { %v842_v47 = vpop.f32.mrb[39].mxu1  ;;  %v1485_v44 = vadd.bf16 1065369472, %v2916_v56  ;;  %v1359_v25 = vmul.bf16 1061961548, %v1295_v37  ;;  %v1611_v55 = vmul.bf16 %v1547_v1, %v3596_v5  ;;  %v3863_v21 = vmul.bf16 %v1122_v30, %v3839_v17 }
 0x1b0   : > { %v1361_v40 = vmul.bf16 1061961548, %v1297_v39  ;;  %v3866_v20 = vadd.bf16 %v3502_v7, %v941_v46  ;;  %v942_v37 = vpack.c.bf16 %v649_v31, %v645_v10  ;;  %v944_v23 = vpack.c.bf16 %v842_v47, %v838_v59 }
 0x1b1   : > { %v1549_v57 = vmul.bf16 1056980736, %v1485_v44  ;;  %2921 = vtanh.bf16 %v1359_v25  ;;  %1983 = vmatmul.mubr.bf16.gmra.mrb[76].mxu0 %v1611_v55  ;;  %v4611_v5 = vmul.bf16 1027030327, %v3720_v2  ;;  %v4612_v24 = vmul.bf16 1027030327, %v3727_v41  ;;  %v2918_v47 = vpop.eup %2917 }
 0x1b2   : > { %2923 = vtanh.bf16 %v1361_v40  ;;  %4610 = vst [vmem:[#allocation15_spill] sm:$0xff] %v3866_v20  ;;  %v1123_v30 = vmul.bf16 %v3866_v20, %v3866_v20  ;;  %v3875_v40 = vadd.bf16 %v3504_v8, %v943_v53  ;;  %v3886_v2 = vadd.bf16 %v3506_v11, %v942_v37  ;;  %v2920_v37 = vpop.eup %2919 }
 0x1b3   : > { %v1613_v61 = vmul.bf16 %v1549_v57, %v3599_v6  ;;  %v1300_v52 = vadd.bf16 %v4611_v5, %v3690_v26  ;;  %v653_v60 = vpop.f32.mrb[40].mxu0  ;;  %v846_v56 = vpop.f32.mrb[40].mxu1  ;;  %v1302_v55 = vadd.bf16 %v4612_v24, %v3693_v29  ;;  %v4613_v6 = vmul.bf16 1027030327, %v3710_v58 }
 0x1b4   : > { %v655_v10 = vpop.f32.mrb[41].mxu0  ;;  %v3883_v59 = vpop.f32.mrb[41].mxu1  ;;  %v3889_v50 = vadd.bf16 %v3508_v12, %v944_v23  ;;  %v4614_v13 = vmul.bf16 1027030327, %v3713_v0  ;;  %v3895_v58 = vmul.bf16 %v1123_v30, %v3866_v20  ;;  %v1125_v1 = vmul.bf16 %v3875_v40, %v3875_v40 }
 0x1b5   : > { %v1299_v57 = vadd.bf16 %v4613_v6, %v3683_v51  ;;  %2144 = vmatmul.mubr.bf16.gmra.mrb[76].mxu1 %v1613_v61  ;;  %v1364_v46 = vmul.bf16 1061961548, %v1300_v52  ;;  %v657_v39 = vpop.f32.mrb[42].mxu0  ;;  %v850_v31 = vpop.f32.mrb[42].mxu1  ;;  %v1366_v44 = vmul.bf16 1061961548, %v1302_v55  ;;  %v1124_v5 = vmul.bf16 %v3886_v2, %v3886_v2 }
 0x1b6   : > { %v1301_v41 = vadd.bf16 %v4614_v13, %v3686_v32  ;;  %v659_v53 = vpop.f32.mrb[43].mxu0  ;;  %v852_v61 = vpop.f32.mrb[43].mxu1  ;;  %v1488_v23 = vadd.bf16 1065369472, %v2918_v47  ;;  %v1126_v0 = vmul.bf16 %v3889_v50, %v3889_v50  ;;  %v1490_v24 = vadd.bf16 1065369472, %v2920_v37 }
 0x1b7   : > { %v1363_v25 = vmul.bf16 1061961548, %v1299_v57  ;;  %2925 = vtanh.bf16 %v1364_v46  ;;  %v3908_v47 = vmul.bf16 %v1125_v1, %v3875_v40  ;;  %v945_v20 = vpack.c.bf16 %v657_v39, %v653_v60 }
 0x1b8   : > { %2927 = vtanh.bf16 %v1366_v44  ;;  %v1552_v6 = vmul.bf16 1056980736, %v1488_v23  ;;  %v1554_v13 = vmul.bf16 1056980736, %v1490_v24  ;;  %v1365_v18 = vmul.bf16 1061961548, %v1301_v41 }
 0x1b9   : > { %2929 = vtanh.bf16 %v1363_v25  ;;  %v3912_v52 = vmul.bf16 %v1124_v5, %v3886_v2  ;;  %v3915_v37 = vmul.bf16 %v1126_v0, %v3889_v50  ;;  %v947_v44 = vpack.c.bf16 %v850_v31, %v846_v56 }
 0x1ba   : > { %v1616_v46 = vmul.bf16 %v1552_v6, %v3649_v3  ;;  %v1618_v24 = vmul.bf16 %v1554_v13, %v3652_v4  ;;  %2931 = vtanh.bf16 %v1365_v18  ;;  %v3923_v41 = vadd.bf16 %v3502_v7, %v945_v20 }
 0x1bb   : > { %v3917_v55 = vpop.f32.mrb[44].mxu0  ;;  %v3919_v23 = vpop.f32.mrb[44].mxu1  ;;  %v946_v60 = vpack.c.bf16 %v659_v53, %v655_v10  ;;  %v3930_v56 = vadd.bf16 %v3504_v8, %v947_v44  ;;  %v948_v31 = vpack.c.bf16 %v852_v61, %v3883_v59  ;;  %v4617_v4 = vmul.bf16 1027030327, %v3765_v15 }
 0x1bc   : > { %v2922_v25 = vpop.eup %2921  ;;  %4615 = vst [vmem:[#allocation16_spill] sm:$0xff] %v3923_v41  ;;  %v3925_v3 = vpop.f32.mrb[45].mxu0  ;;  %1990 = vmatprep.mubr.bf16.mxu0 %v1616_v46  ;;  %2151 = vmatprep.mubr.bf16.mxu1 %v1618_v24  ;;  %v1127_v53 = vmul.bf16 %v3923_v41, %v3923_v41  ;;  %v4619_v13 = vmul.bf16 1027030327, %v3772_v45 }
 0x1bd   : > { %v3927_v39 = vpop.f32.mrb[45].mxu1  ;;  %v2924_v1 = vpop.eup %2923  ;;  %v1487_v5 = vadd.bf16 1065369472, %v2922_v25  ;;  %4616 = vst [vmem:[#allocation17_spill] sm:$0xff] %v3930_v56  ;;  %v1304_v18 = vadd.bf16 %v4617_v4, %v3738_v22  ;;  %v3939_v6 = vadd.bf16 %v3506_v11, %v946_v60  ;;  %v1129_v15 = vmul.bf16 %v3930_v56, %v3930_v56 }
 0x1be   : > { %v667_v0 = vpop.f32.mrb[46].mxu0  ;;  %v860_v20 = vpop.f32.mrb[46].mxu1  ;;  %v1489_v10 = vadd.bf16 1065369472, %v2924_v1  ;;  %v1306_v46 = vadd.bf16 %v4619_v13, %v3741_v49  ;;  %v3949_v25 = vadd.bf16 %v3508_v12, %v948_v31  ;;  %v3952_v4 = vmul.bf16 %v1127_v53, %v3923_v41 }
 0x1bf   : > { %4618 = vst [vmem:[#allocation18_spill] sm:$0xff] %v3939_v6  ;;  %v669_v44 = vpop.f32.mrb[47].mxu0  ;;  %v3944_v59 = vpop.f32.mrb[47].mxu1  ;;  %v1551_v61 = vmul.bf16 1056980736, %v1487_v5  ;;  %v1128_v60 = vmul.bf16 %v3939_v6, %v3939_v6 }
 0x1c0   : > { %v1368_v24 = vmul.bf16 1061961548, %v1304_v18  ;;  %v1553_v1 = vmul.bf16 1056980736, %v1489_v10  ;;  %4620 = vst [vmem:[#allocation19_spill] sm:$0xff] %v3952_v4  ;;  %v1130_v5 = vmul.bf16 %v3949_v25, %v3949_v25 }
 0x1c1   : > { %v1370_v45 = vmul.bf16 1061961548, %v1306_v46  ;;  %v1615_v13 = vmul.bf16 %v1551_v61, %v3643_v62  ;;  %v3965_v62 = vmul.bf16 %v1129_v15, %v3930_v56  ;;  %v4622_v61 = vmul.bf16 1027030327, %v3759_v9 }
 0x1c2   : > { %2933 = vtanh.bf16 %v1368_v24  ;;  %v2926_v30 = vpop.eup %2925  ;;  %v1617_v31 = vmul.bf16 %v1553_v1, %v3646_v63  ;;  %v949_v15 = vpack.c.bf16 %v667_v0, %v3917_v55  ;;  %v3986_v56 = vmul.bf16 %v1130_v5, %v3949_v25 }
 0x1c3   : > { %2935 = vtanh.bf16 %v1370_v45  ;;  %v2928_v53 = vpop.eup %2927  ;;  %1991 = vmatmul.mubr.bf16.gmra.mrb[80].mxu0 %v1615_v13  ;;  %v1492_v41 = vadd.bf16 1065369472, %v2926_v30  ;;  %4621 = vst [vmem:[#allocation20_spill] sm:$0xff] %v3965_v62  ;;  %v1303_v24 = vadd.bf16 %v4622_v61, %v3732_v38  ;;  %v3970_v57 = vpop.f32.mrb[48].mxu0  ;;  %v3975_v45 = vmul.bf16 %v1128_v60, %v3939_v6 }
 0x1c4   : > { %v3972_v63 = vpop.f32.mrb[48].mxu1  ;;  %v2930_v1 = vpop.eup %2929  ;;  %2152 = vmatmul.mubr.bf16.gmra.mrb[80].mxu1 %v1617_v31  ;;  %v1494_v10 = vadd.bf16 1065369472, %v2928_v53  ;;  %v4623_v30 = vmul.bf16 1027030327, %v3762_v14  ;;  %v951_v31 = vpack.c.bf16 %v860_v20, %v3919_v23  ;;  %v3990_v6 = vadd.bf16 %v3502_v7, %v949_v15 }
 0x1c5   : > { %v3981_v46 = vpop.f32.mrb[49].mxu0  ;;  %v3983_v9 = vpop.f32.mrb[49].mxu1  ;;  %v1556_v61 = vmul.bf16 1056980736, %v1492_v41  ;;  %v1491_v18 = vadd.bf16 1065369472, %v2930_v1  ;;  %v950_v41 = vpack.c.bf16 %v669_v44, %v3925_v3  ;;  %v952_v15 = vpack.c.bf16 %v3944_v59, %v3927_v39 }
 0x1c6   : > { %v1305_v13 = vadd.bf16 %v4623_v30, %v3735_v42  ;;  %v1558_v53 = vmul.bf16 1056980736, %v1494_v10  ;;  %v1367_v60 = vmul.bf16 1061961548, %v1303_v24  ;;  %4624 = vst [vmem:[#allocation21_spill] sm:$0xff] %v3990_v6  ;;  %v2932_v14 = vpop.eup %2931  ;;  %v3994_v30 = vadd.bf16 %v3504_v8, %v951_v31  ;;  %v677_v1 = vpop.f32.mrb[50].mxu0 }
 0x1c7   : > { %v1620_v55 = vmul.bf16 %v1556_v61, %v3690_v26  ;;  %v1555_v0 = vmul.bf16 1056980736, %v1491_v18  ;;  %v3997_v5 = vpop.f32.mrb[50].mxu1  ;;  %v1493_v20 = vadd.bf16 1065369472, %v2932_v14  ;;  %v1131_v10 = vmul.bf16 %v3990_v6, %v3990_v6  ;;  %v679_v24 = vpop.f32.mrb[51].mxu0 }
 0x1c8   : > { %v1369_v4 = vmul.bf16 1061961548, %v1305_v13  ;;  %4625 = vst [vmem:[#allocation22_spill] sm:$0xff] %v3994_v30  ;;  %v1622_v23 = vmul.bf16 %v1558_v53, %v3693_v29  ;;  %2937 = vtanh.bf16 %v1367_v60  ;;  %v4002_v13 = vpop.f32.mrb[51].mxu1  ;;  %v1133_v3 = vmul.bf16 %v3994_v30, %v3994_v30 }
 0x1c9   : > { %1998 = vmatprep.mubr.bf16.mxu0 %v1620_v55  ;;  %v1619_v26 = vmul.bf16 %v1555_v0, %v3683_v51  ;;  %v4008_v44 = vadd.bf16 %v3506_v11, %v950_v41  ;;  %v1557_v29 = vmul.bf16 1056980736, %v1493_v20  ;;  %v4626_v61 = vmul.bf16 1027030327, %v3814_v43 }
 0x1ca   : > { %2939 = vtanh.bf16 %v1369_v4  ;;  %2159 = vmatprep.mubr.bf16.mxu1 %v1622_v23  ;;  %v4018_v4 = vmul.bf16 %v1131_v10, %v3990_v6  ;;  %v4628_v53 = vmul.bf16 1027030327, %v3821_v16  ;;  %v4629_v14 = vmul.bf16 1027030327, %v3803_v54 }
 0x1cb   : > { %v1308_v31 = vadd.bf16 %v4626_v61, %v3784_v48  ;;  %1999 = vmatmul.mubr.bf16.gmra.mrb[84].mxu0 %v1619_v26  ;;  %v4026_v0 = vpop.f32.mrb[52].mxu0  ;;  %v4028_v39 = vpop.f32.mrb[52].mxu1  ;;  %v1621_v59 = vmul.bf16 %v1557_v29, %v3686_v32  ;;  %v1132_v41 = vmul.bf16 %v4008_v44, %v4008_v44  ;;  %v4034_v23 = vadd.bf16 %v3508_v12, %v952_v15  ;;  %v4633_v26 = vld [vmem:[#allocation13_spill] sm:$0xff] }
 0x1cc   : > { %4627 = vst [vmem:[#allocation23_spill] sm:$0xff] %v4018_v4  ;;  %v1310_v60 = vadd.bf16 %v4628_v53, %v3791_v34  ;;  %v1307_v55 = vadd.bf16 %v4629_v14, %v3777_v35  ;;  %v4036_v16 = vpop.f32.mrb[53].mxu0  ;;  %v4038_v10 = vpop.f32.mrb[53].mxu1  ;;  %v4042_v53 = vmul.bf16 %v1133_v3, %v3994_v30  ;;  %v4634_v3 = vmul.bf16 1027030327, %v4633_v26 }
 0x1cd   : > { %v2934_v43 = vpop.eup %2933  ;;  %4630 = vst [vmem:[#allocation24_spill] sm:$0xff] %v4034_v23  ;;  %v1372_v20 = vmul.bf16 1061961548, %v1308_v31  ;;  %2160 = vmatmul.mubr.bf16.gmra.mrb[84].mxu1 %v1621_v59  ;;  %v1134_v29 = vmul.bf16 %v4034_v23, %v4034_v23  ;;  %v4046_v31 = vpop.f32.mrb[54].mxu0  ;;  %v954_v26 = vpack.c.bf16 %v679_v24, %v3981_v46 }
 0x1ce   : > { %v2936_v54 = vpop.eup %2935  ;;  %v1496_v61 = vadd.bf16 1065369472, %v2934_v43  ;;  %4631 = vst [vmem:[#allocation25_spill] sm:$0xff] %v4042_v53  ;;  %v1374_v14 = vmul.bf16 1061961548, %v1310_v60  ;;  %v4048_v18 = vpop.f32.mrb[54].mxu1 }
 0x1cf   : > { %v1498_v32 = vadd.bf16 1065369472, %v2936_v54  ;;  %2941 = vtanh.bf16 %v1372_v20  ;;  %v1371_v15 = vmul.bf16 1061961548, %v1307_v55  ;;  %v4632_v43 = vld [vmem:[#allocation12_spill] sm:$0xff]  ;;  %v4054_v60 = vpop.f32.mrb[55].mxu0  ;;  %v4059_v20 = vmul.bf16 %v1132_v41, %v4008_v44 }
 0x1d0   : > { %v1560_v51 = vmul.bf16 1056980736, %v1496_v61  ;;  %2943 = vtanh.bf16 %v1374_v14  ;;  %v1309_v30 = vadd.bf16 %v4634_v3, %v4632_v43  ;;  %v4056_v59 = vpop.f32.mrb[55].mxu1  ;;  %v953_v55 = vpack.c.bf16 %v677_v1, %v3970_v57 }
 0x1d1   : > { %v1562_v54 = vmul.bf16 1056980736, %v1498_v32  ;;  %2945 = vtanh.bf16 %v1371_v15  ;;  %v955_v14 = vpack.c.bf16 %v3997_v5, %v3972_v63  ;;  %v4068_v6 = vmul.bf16 %v1134_v29, %v4034_v23 }
 0x1d2   : > { %v1624_v61 = vmul.bf16 %v1560_v51, %v3738_v22  ;;  %v1373_v62 = vmul.bf16 1061961548, %v1309_v30  ;;  %v4071_v32 = vadd.bf16 %v3502_v7, %v953_v55  ;;  %v956_v41 = vpack.c.bf16 %v4002_v13, %v3983_v9 }
 0x1d3   : > { %v1626_v3 = vmul.bf16 %v1562_v54, %v3741_v49  ;;  %v2938_v57 = vpop.eup %2937  ;;  %v4076_v22 = vadd.bf16 %v3504_v8, %v955_v14  ;;  %v4079_v63 = vadd.bf16 %v3506_v11, %v954_v26  ;;  %v4637_v49 = vmul.bf16 1027030327, %v3860_v19  ;;  %v4084_v30 = vpop.f32.mrb[56].mxu0 }
 0x1d4   : > { %4635 = vst [vmem:[#allocation12_spill] sm:$0xff] %v4071_v32  ;;  %2006 = vmatprep.mubr.bf16.mxu0 %v1624_v61  ;;  %2947 = vtanh.bf16 %v1373_v62  ;;  %v4086_v1 = vpop.f32.mrb[56].mxu1  ;;  %v1495_v9 = vadd.bf16 1065369472, %v2938_v57  ;;  %v1135_v62 = vmul.bf16 %v4071_v32, %v4071_v32  ;;  %v4091_v24 = vadd.bf16 %v3508_v12, %v956_v41  ;;  %v4096_v29 = vpop.f32.mrb[57].mxu0 }
 0x1d5   : > { %4636 = vst [vmem:[#allocation13_spill] sm:$0xff] %v4076_v22  ;;  %v1312_v46 = vadd.bf16 %v4637_v49, %v3831_v36  ;;  %v2940_v5 = vpop.eup %2939  ;;  %2167 = vmatprep.mubr.bf16.mxu1 %v1626_v3  ;;  %v4638_v13 = vmul.bf16 1027030327, %v3863_v21  ;;  %v4098_v19 = vpop.f32.mrb[57].mxu1  ;;  %v1137_v54 = vmul.bf16 %v4076_v22, %v4076_v22  ;;  %v1136_v55 = vmul.bf16 %v4079_v63, %v4079_v63 }
 0x1d6   : > { %v1497_v15 = vadd.bf16 1065369472, %v2940_v5  ;;  %v4104_v14 = vpop.f32.mrb[58].mxu0  ;;  %v4106_v26 = vpop.f32.mrb[58].mxu1  ;;  %v1559_v3 = vmul.bf16 1056980736, %v1495_v9  ;;  %v4109_v21 = vmul.bf16 %v1135_v62, %v4071_v32  ;;  %v1138_v9 = vmul.bf16 %v4091_v24, %v4091_v24 }
 0x1d7   : > { %v1314_v51 = vadd.bf16 %v4638_v13, %v3839_v17  ;;  %v1376_v61 = vmul.bf16 1061961548, %v1312_v46  ;;  %v4111_v57 = vpop.f32.mrb[59].mxu0  ;;  %v4113_v49 = vpop.f32.mrb[59].mxu1  ;;  %v4123_v32 = vmul.bf16 %v1137_v54, %v4076_v22  ;;  %v4641_v13 = vld [vmem:[#allocation14_spill] sm:$0xff] }
 0x1d8   : > { %4639 = vst [vmem:[#allocation26_spill] sm:$0xff] %v4109_v21  ;;  %v1561_v5 = vmul.bf16 1056980736, %v1497_v15  ;;  %v1623_v46 = vmul.bf16 %v1559_v3, %v3732_v38  ;;  %v4126_v15 = vmul.bf16 %v1136_v55, %v4079_v63 }
 0x1d9   : > { %v1378_v41 = vmul.bf16 1061961548, %v1314_v51  ;;  %2949 = vtanh.bf16 %v1376_v61  ;;  %4640 = vst [vmem:[#allocation27_spill] sm:$0xff] %v4123_v32  ;;  %v4642_v61 = vmul.bf16 1027030327, %v3834_v28  ;;  %v959_v28 = vpack.c.bf16 %v4048_v18, %v4028_v39 }
 0x1da   : > { %v2942_v62 = vpop.eup %2941  ;;  %v1625_v51 = vmul.bf16 %v1561_v5, %v3735_v42  ;;  %2007 = vmatmul.mubr.bf16.gmra.mrb[88].mxu0 %v1623_v46  ;;  %v957_v42 = vpack.c.bf16 %v4046_v31, %v4026_v0  ;;  %v958_v46 = vpack.c.bf16 %v4054_v60, %v4036_v16 }
 0x1db   : > { %2951 = vtanh.bf16 %v1378_v41  ;;  %v1311_v4 = vadd.bf16 %v4642_v61, %v4641_v13  ;;  %v2944_v38 = vpop.eup %2943  ;;  %v1500_v3 = vadd.bf16 1065369472, %v2942_v62  ;;  %v4643_v41 = vmul.bf16 1027030327, %v3856_v33  ;;  %v4141_v62 = vpop.f32.mrb[60].mxu0 }
 0x1dc   : > { %v2946_v54 = vpop.eup %2945  ;;  %2168 = vmatmul.mubr.bf16.gmra.mrb[88].mxu1 %v1625_v51  ;;  %v1502_v55 = vadd.bf16 1065369472, %v2944_v38  ;;  %v4143_v61 = vpop.f32.mrb[60].mxu1  ;;  %v4146_v22 = vadd.bf16 %v3502_v7, %v957_v42  ;;  %v4152_v18 = vadd.bf16 %v3506_v11, %v958_v46  ;;  %v4644_v46 = vmul.bf16 1027030327, %v3912_v52  ;;  %v4646_v52 = vld [vmem:[#allocation15_spill] sm:$0xff] }
 0x1dd   : > { %v1313_v53 = vadd.bf16 %v4643_v41, %v3827_v27  ;;  %v1375_v5 = vmul.bf16 1061961548, %v1311_v4  ;;  %v1564_v23 = vmul.bf16 1056980736, %v1500_v3  ;;  %v1499_v33 = vadd.bf16 1065369472, %v2946_v54 }
 0x1de   : > { %v1566_v0 = vmul.bf16 1056980736, %v1502_v55  ;;  %v4149_v4 = vadd.bf16 %v3504_v8, %v959_v28  ;;  %v4154_v39 = vpop.f32.mrb[61].mxu0  ;;  %v4156_v16 = vpop.f32.mrb[61].mxu1  ;;  %v1139_v55 = vmul.bf16 %v4146_v22, %v4146_v22 }
 0x1df   : > { %v1377_v41 = vmul.bf16 1061961548, %v1313_v53  ;;  %2953 = vtanh.bf16 %v1375_v5  ;;  %v2948_v31 = vpop.eup %2947  ;;  %v1628_v60 = vmul.bf16 %v1564_v23, %v3784_v48  ;;  %v1563_v51 = vmul.bf16 1056980736, %v1499_v33  ;;  %v4162_v38 = vpop.f32.mrb[62].mxu0 }
 0x1e0   : > { %v4160_v53 = vmul.bf16 %v1138_v9, %v4091_v24  ;;  %v4164_v3 = vpop.f32.mrb[62].mxu1  ;;  %v1630_v42 = vmul.bf16 %v1566_v0, %v3791_v34  ;;  %v1501_v54 = vadd.bf16 1065369472, %v2948_v31  ;;  %v1141_v5 = vmul.bf16 %v4149_v4, %v4149_v4  ;;  %v4171_v28 = vpop.f32.mrb[63].mxu0 }
 0x1e1   : > { %2955 = vtanh.bf16 %v1377_v41  ;;  %v4173_v48 = vpop.f32.mrb[63].mxu1  ;;  %2014 = vmatprep.mubr.bf16.mxu0 %v1628_v60  ;;  %v1627_v23 = vmul.bf16 %v1563_v51, %v3777_v35  ;;  %v1140_v9 = vmul.bf16 %v4152_v18, %v4152_v18  ;;  %v960_v34 = vpack.c.bf16 %v4056_v59, %v4038_v10 }
 0x1e2   : > { %v1316_v33 = vadd.bf16 %v4644_v46, %v3886_v2  ;;  %2175 = vmatprep.mubr.bf16.mxu1 %v1630_v42  ;;  %v1565_v41 = vmul.bf16 1056980736, %v1501_v54  ;;  %v4645_v60 = vmul.bf16 1027030327, %v3915_v37  ;;  %v1266_v21 = vmul.bf16 1027030327, %v4160_v53 }
 0x1e3   : > { %2015 = vmatmul.mubr.bf16.gmra.mrb[92].mxu0 %v1627_v23  ;;  %v4190_v10 = vadd.bf16 %v3508_v12, %v960_v34  ;;  %v4647_v42 = vmul.bf16 1027030327, %v3895_v58  ;;  %v4197_v32 = vmul.bf16 %v1139_v55, %v4146_v22  ;;  %v4200_v37 = vmul.bf16 %v1141_v5, %v4149_v4 }
 0x1e4   : > { %v1318_v35 = vadd.bf16 %v4645_v60, %v3889_v50  ;;  %v2950_v51 = vpop.eup %2949  ;;  %v1380_v59 = vmul.bf16 1061961548, %v1316_v33  ;;  %v1629_v0 = vmul.bf16 %v1565_v41, %v4632_v43  ;;  %v4203_v60 = vmul.bf16 %v1140_v9, %v4152_v18 }
 0x1e5   : > { %v1315_v54 = vadd.bf16 %v4647_v42, %v4646_v52  ;;  %v1504_v31 = vadd.bf16 1065369472, %v2950_v51  ;;  %v4648_v42 = vmul.bf16 1027030327, %v3908_v47  ;;  %v961_v55 = vpack.c.bf16 %v4104_v14, %v4084_v30 }
 0x1e6   : > { %v2952_v46 = vpop.eup %2951  ;;  %2957 = vtanh.bf16 %v1380_v59  ;;  %v1382_v34 = vmul.bf16 1061961548, %v1318_v35  ;;  %2176 = vmatmul.mubr.bf16.gmra.mrb[92].mxu1 %v1629_v0  ;;  %v1142_v5 = vmul.bf16 %v4190_v10, %v4190_v10  ;;  %v963_v9 = vpack.c.bf16 %v4106_v26, %v4086_v1 }
 0x1e7   : > { %v1506_v23 = vadd.bf16 1065369472, %v2952_v46  ;;  %v1568_v33 = vmul.bf16 1056980736, %v1504_v31  ;;  %v1379_v58 = vmul.bf16 1061961548, %v1315_v54  ;;  %v1317_v43 = vadd.bf16 %v4648_v42, %v3875_v40 }
 0x1e8   : > { %2959 = vtanh.bf16 %v1382_v34  ;;  %v4216_v31 = vadd.bf16 %v3502_v7, %v961_v55  ;;  %v1267_v30 = vmul.bf16 1027030327, %v4197_v32  ;;  %v4221_v14 = vadd.bf16 %v3504_v8, %v963_v9  ;;  %v4649_v34 = vld [vmem:[#allocation18_spill] sm:$0xff] }
 0x1e9   : > { %v1570_v41 = vmul.bf16 1056980736, %v1506_v23  ;;  %v1632_v35 = vmul.bf16 %v1568_v33, %v3831_v36  ;;  %2961 = vtanh.bf16 %v1379_v58  ;;  %v1381_v0 = vmul.bf16 1061961548, %v1317_v43 }
 0x1ea   : > { %v2954_v47 = vpop.eup %2953  ;;  %v962_v59 = vpack.c.bf16 %v4111_v57, %v4096_v29  ;;  %v1143_v36 = vmul.bf16 %v4216_v31, %v4216_v31  ;;  %v964_v26 = vpack.c.bf16 %v4113_v49, %v4098_v19  ;;  %v1145_v46 = vmul.bf16 %v4221_v14, %v4221_v14 }
 0x1eb   : > { %v1634_v51 = vmul.bf16 %v1570_v41, %v3839_v17  ;;  %2022 = vmatprep.mubr.bf16.mxu0 %v1632_v35  ;;  %v1503_v1 = vadd.bf16 1065369472, %v2954_v47  ;;  %2963 = vtanh.bf16 %v1381_v0  ;;  %v4650_v29 = vmul.bf16 1027030327, %v3975_v45 }
 0x1ec   : > { %v2956_v54 = vpop.eup %2955  ;;  %v4232_v23 = vadd.bf16 %v3506_v11, %v962_v59  ;;  %v4238_v58 = vmul.bf16 %v1142_v5, %v4190_v10  ;;  %v4241_v42 = vadd.bf16 %v3508_v12, %v964_v26  ;;  %v4651_v19 = vmul.bf16 1027030327, %v3986_v56 }
 0x1ed   : > { %2183 = vmatprep.mubr.bf16.mxu1 %v1634_v51  ;;  %v1505_v17 = vadd.bf16 1065369472, %v2956_v54  ;;  %v1320_v57 = vadd.bf16 %v4650_v29, %v4649_v34  ;;  %v1567_v33 = vmul.bf16 1056980736, %v1503_v1  ;;  %v1269_v55 = vmul.bf16 1027030327, %v4200_v37 }
 0x1ee   : > { %v1322_v49 = vadd.bf16 %v4651_v19, %v3949_v25  ;;  %v4248_v41 = vmul.bf16 %v1143_v36, %v4216_v31  ;;  %v1268_v35 = vmul.bf16 1027030327, %v4203_v60  ;;  %v4253_v5 = vmul.bf16 %v1145_v46, %v4221_v14  ;;  %v4653_v1 = vld [vmem:[#allocation19_spill] sm:$0xff]  ;;  %v4656_v46 = vld [vmem:[#allocation20_spill] sm:$0xff] }
 0x1ef   : > { %v1569_v43 = vmul.bf16 1056980736, %v1505_v17  ;;  %v1384_v9 = vmul.bf16 1061961548, %v1320_v57  ;;  %v1631_v45 = vmul.bf16 %v1567_v33, %v4641_v13  ;;  %v1144_v56 = vmul.bf16 %v4232_v23, %v4232_v23  ;;  %v4652_v13 = vld [vmem:[#allocation16_spill] sm:$0xff]  ;;  %v4655_v17 = vld [vmem:[#allocation17_spill] sm:$0xff] }
 0x1f0   : > { %v1386_v0 = vmul.bf16 1061961548, %v1322_v49  ;;  %v1146_v51 = vmul.bf16 %v4241_v42, %v4241_v42  ;;  %v1270_v54 = vmul.bf16 1027030327, %v4238_v58  ;;  %v4654_v36 = vmul.bf16 1027030327, %v4653_v1 }
 0x1f1   : > { %v1633_v47 = vmul.bf16 %v1569_v43, %v3827_v27  ;;  %2965 = vtanh.bf16 %v1384_v9  ;;  %v2958_v59 = vpop.eup %2957  ;;  %2023 = vmatmul.mubr.bf16.gmra.mrb[96].mxu0 %v1631_v45  ;;  %v4657_v29 = vmul.bf16 1027030327, %v4656_v46  ;;  %v1271_v33 = vmul.bf16 1027030327, %v4248_v41 }
 0x1f2   : > { %2967 = vtanh.bf16 %v1386_v0  ;;  %v1319_v26 = vadd.bf16 %v4654_v36, %v4652_v13  ;;  %v1508_v57 = vadd.bf16 1065369472, %v2958_v59  ;;  %v965_v19 = vpack.c.bf16 %v4162_v38, %v4141_v62 }
 0x1f3   : > { %v1321_v27 = vadd.bf16 %v4657_v29, %v4655_v17  ;;  %2184 = vmatmul.mubr.bf16.gmra.mrb[96].mxu1 %v1633_v47  ;;  %v967_v49 = vpack.c.bf16 %v4164_v3, %v4143_v61  ;;  %v2960_v43 = vpop.eup %2959  ;;  %v966_v1 = vpack.c.bf16 %v4171_v28, %v4154_v39  ;;  %v4276_v59 = vmul.bf16 %v1144_v56, %v4232_v23 }
 0x1f4   : > { %v1383_v45 = vmul.bf16 1061961548, %v1319_v26  ;;  %v2962_v36 = vpop.eup %2961  ;;  %v1572_v46 = vmul.bf16 1056980736, %v1508_v57  ;;  %v1510_v47 = vadd.bf16 1065369472, %v2960_v43  ;;  %v4279_v29 = vmul.bf16 %v1146_v51, %v4241_v42 }
 0x1f5   : > { %v1385_v0 = vmul.bf16 1061961548, %v1321_v27  ;;  %v1507_v62 = vadd.bf16 1065369472, %v2962_v36  ;;  %v4282_v61 = vadd.bf16 %v3506_v11, %v966_v1  ;;  %v968_v38 = vpack.c.bf16 %v4173_v48, %v4156_v16 }
 0x1f6   : > { %2969 = vtanh.bf16 %v1383_v45  ;;  %v2964_v3 = vpop.eup %2963  ;;  %v1636_v39 = vmul.bf16 %v1572_v46, %v3886_v2  ;;  %v1574_v28 = vmul.bf16 1056980736, %v1510_v47  ;;  %v4288_v26 = vadd.bf16 %v3502_v7, %v965_v19 }
 0x1f7   : > { %2971 = vtanh.bf16 %v1385_v0  ;;  %v1571_v56 = vmul.bf16 1056980736, %v1507_v62  ;;  %v1509_v27 = vadd.bf16 1065369472, %v2964_v3  ;;  %v4291_v51 = vadd.bf16 %v3504_v8, %v967_v49  ;;  %v4659_v0 = vld [vmem:[#allocation24_spill] sm:$0xff]  ;;  %v4661_v62 = vld [vmem:[#allocation21_spill] sm:$0xff] }
 0x1f8   : > { %v1148_v11 = vmul.bf16 %v4282_v61, %v4282_v61  ;;  %2030 = vmatprep.mubr.bf16.mxu0 %v1636_v39  ;;  %v1638_v57 = vmul.bf16 %v1574_v28, %v3889_v50  ;;  %v1272_v16 = vmul.bf16 1027030327, %v4276_v59  ;;  %v4298_v2 = vadd.bf16 %v3508_v12, %v968_v38  ;;  %v4662_v38 = vld [vmem:[#allocation23_spill] sm:$0xff] }
 0x1f9   : > { %v4658_v7 = vmul.bf16 1027030327, %v4059_v20  ;;  %v1635_v19 = vmul.bf16 %v1571_v56, %v4646_v52  ;;  %v1573_v43 = vmul.bf16 1056980736, %v1509_v27  ;;  %v1274_v8 = vmul.bf16 1027030327, %v4279_v29 }
 0x1fa   : > { %v4306_v49 = vmul.bf16 %v1148_v11, %v4282_v61  ;;  %2191 = vmatprep.mubr.bf16.mxu1 %v1638_v57  ;;  %v1147_v50 = vmul.bf16 %v4288_v26, %v4288_v26  ;;  %v1150_v12 = vmul.bf16 %v4298_v2, %v4298_v2  ;;  %v4660_v20 = vmul.bf16 1027030327, %v4068_v6 }
 0x1fb   : > { %v1324_v48 = vadd.bf16 %v4658_v7, %v4008_v44  ;;  %2031 = vmatmul.mubr.bf16.gmra.mrb[100].mxu0 %v1635_v19  ;;  %v1637_v52 = vmul.bf16 %v1573_v43, %v3875_v40  ;;  %v1149_v46 = vmul.bf16 %v4291_v51, %v4291_v51  ;;  %v4663_v3 = vmul.bf16 1027030327, %v4662_v38  ;;  %v4664_v40 = vld [vmem:[#allocation22_spill] sm:$0xff]  ;;  %v4665_v7 = vld [vmem:[#allocation25_spill] sm:$0xff] }
 0x1fc   : > { %v1326_v1 = vadd.bf16 %v4660_v20, %v4659_v0  ;;  %v2966_v36 = vpop.eup %2965  ;;  %v1276_v47 = vmul.bf16 1027030327, %v4306_v49  ;;  %v4323_v27 = vmul.bf16 %v1150_v12, %v4298_v2  ;;  %v4667_v43 = vmul.bf16 1027030327, %v4126_v15 }
 0x1fd   : > { %v1388_v45 = vmul.bf16 1061961548, %v1324_v48  ;;  %v1323_v39 = vadd.bf16 %v4663_v3, %v4661_v62  ;;  %v2968_v28 = vpop.eup %2967  ;;  %v1512_v56 = vadd.bf16 1065369472, %v2966_v36  ;;  %2192 = vmatmul.mubr.bf16.gmra.mrb[100].mxu1 %v1637_v52  ;;  %v4666_v48 = vmul.bf16 1027030327, %v4665_v7 }
 0x1fe   : > { %v1390_v6 = vmul.bf16 1061961548, %v1326_v1  ;;  %v1514_v11 = vadd.bf16 1065369472, %v2968_v28  ;;  %v1328_v49 = vadd.bf16 %v4667_v43, %v4079_v63  ;;  %v1278_v38 = vmul.bf16 1027030327, %v4323_v27 }
 0x1ff   : > { %2973 = vtanh.bf16 %v1388_v45  ;;  %v1387_v57 = vmul.bf16 1061961548, %v1323_v39  ;;  %v1325_v19 = vadd.bf16 %v4666_v48, %v4664_v40  ;;  %v1576_v20 = vmul.bf16 1056980736, %v1512_v56  ;;  %v4668_v28 = vld [vmem:[#allocation12_spill] sm:$0xff]  ;;  %v4669_v7 = vld [vmem:[#allocation26_spill] sm:$0xff] }
 0x200   : > { %2975 = vtanh.bf16 %v1390_v6  ;;  %v1330_v12 = vadd.bf16 %v1266_v21, %v4091_v24  ;;  %v1578_v45 = vmul.bf16 1056980736, %v1514_v11  ;;  %v1392_v36 = vmul.bf16 1061961548, %v1328_v49  ;;  %v4671_v56 = vld [vmem:[#allocation13_spill] sm:$0xff]  ;;  %v4672_v43 = vld [vmem:[#allocation27_spill] sm:$0xff] }
 0x201   : > { %2977 = vtanh.bf16 %v1387_v57  ;;  %v1389_v1 = vmul.bf16 1061961548, %v1325_v19  ;;  %v2970_v52 = vpop.eup %2969  ;;  %v1640_v3 = vmul.bf16 %v1576_v20, %v4649_v34  ;;  %v4670_v15 = vmul.bf16 1027030327, %v4669_v7 }
 0x202   : > { %v1394_v39 = vmul.bf16 1061961548, %v1330_v12  ;;  %v4673_v27 = vmul.bf16 1027030327, %v4672_v43  ;;  %v2972_v9 = vpop.eup %2971  ;;  %v1642_v53 = vmul.bf16 %v1578_v45, %v3949_v25  ;;  %v1511_v21 = vadd.bf16 1065369472, %v2970_v52 }
 0x203   : > { %v1327_v48 = vadd.bf16 %v4670_v15, %v4668_v28  ;;  %2979 = vtanh.bf16 %v1389_v1  ;;  %v1332_v11 = vadd.bf16 %v1268_v35, %v4152_v18  ;;  %2038 = vmatprep.mubr.bf16.mxu0 %v1640_v3  ;;  %v1513_v34 = vadd.bf16 1065369472, %v2972_v9 }
 0x204   : > { %v1329_v6 = vadd.bf16 %v4673_v27, %v4671_v56  ;;  %2981 = vtanh.bf16 %v1392_v36  ;;  %2199 = vmatprep.mubr.bf16.mxu1 %v1642_v53  ;;  %v1575_v49 = vmul.bf16 1056980736, %v1511_v21  ;;  %v1334_v12 = vadd.bf16 %v1270_v54, %v4190_v10 }
 0x205   : > { %v1391_v57 = vmul.bf16 1061961548, %v1327_v48  ;;  %2983 = vtanh.bf16 %v1394_v39  ;;  %v1396_v20 = vmul.bf16 1061961548, %v1332_v11  ;;  %v1577_v25 = vmul.bf16 1056980736, %v1513_v34 }
 0x206   : > { %v1393_v19 = vmul.bf16 1061961548, %v1329_v6  ;;  %v1331_v60 = vadd.bf16 %v1267_v30, %v4146_v22  ;;  %v1333_v35 = vadd.bf16 %v1269_v55, %v4149_v4  ;;  %v1639_v9 = vmul.bf16 %v1575_v49, %v4652_v13 }
 0x207   : > { %2985 = vtanh.bf16 %v1391_v57  ;;  %v1398_v45 = vmul.bf16 1061961548, %v1334_v12  ;;  %v1336_v1 = vadd.bf16 %v1272_v16, %v4232_v23  ;;  %v1641_v58 = vmul.bf16 %v1577_v25, %v4655_v17 }
 0x208   : > { %2987 = vtanh.bf16 %v1393_v19  ;;  %v1395_v54 = vmul.bf16 1061961548, %v1331_v60  ;;  %v1397_v36 = vmul.bf16 1061961548, %v1333_v35  ;;  %2039 = vmatmul.mubr.bf16.gmra.mrb[104].mxu0 %v1639_v9  ;;  %v1338_v37 = vadd.bf16 %v1274_v8, %v4241_v42 }
 0x209   : > { %2989 = vtanh.bf16 %v1396_v20  ;;  %v1400_v32 = vmul.bf16 1061961548, %v1336_v1  ;;  %v1335_v30 = vadd.bf16 %v1271_v33, %v4216_v31  ;;  %2200 = vmatmul.mubr.bf16.gmra.mrb[104].mxu1 %v1641_v58  ;;  %v1211_v55 = vmul.bf16 %v1147_v50, %v4288_v26 }
 0x20a   : > { %v2974_v52 = vpop.eup %2973  ;;  %2991 = vtanh.bf16 %v1398_v45  ;;  %v1340_v17 = vadd.bf16 %v1276_v47, %v4282_v61  ;;  %v1213_v29 = vmul.bf16 %v1149_v46, %v4291_v51  ;;  %v1402_v16 = vmul.bf16 1061961548, %v1338_v37 }
 0x20b   : > { %v1516_v13 = vadd.bf16 1065369472, %v2974_v52  ;;  %2993 = vtanh.bf16 %v1395_v54  ;;  %v2976_v59 = vpop.eup %2975  ;;  %v4674_v41 = vmul.bf16 1027030327, %v4253_v5  ;;  %v1342_v50 = vadd.bf16 %v1278_v38, %v4298_v2 }
 0x20c   : > { %2995 = vtanh.bf16 %v1397_v36  ;;  %v2978_v8 = vpop.eup %2977  ;;  %v1518_v39 = vadd.bf16 1065369472, %v2976_v59  ;;  %v1399_v47 = vmul.bf16 1061961548, %v1335_v30  ;;  %v1275_v48 = vmul.bf16 1027030327, %v1211_v55 }
 0x20d   : > { %v1337_v33 = vadd.bf16 %v4674_v41, %v4221_v14  ;;  %v1580_v3 = vmul.bf16 1056980736, %v1516_v13  ;;  %2997 = vtanh.bf16 %v1400_v32  ;;  %v1515_v7 = vadd.bf16 1065369472, %v2978_v8 }
 0x20e   : > { %2999 = vtanh.bf16 %v1402_v16  ;;  %v2980_v15 = vpop.eup %2979  ;;  %v1582_v46 = vmul.bf16 1056980736, %v1518_v39  ;;  %v1404_v27 = vmul.bf16 1061961548, %v1340_v17  ;;  %v1277_v34 = vmul.bf16 1027030327, %v1213_v29 }
 0x20f   : > { %v1644_v43 = vmul.bf16 %v1580_v3, %v4008_v44  ;;  %v2982_v6 = vpop.eup %2981  ;;  %v1579_v53 = vmul.bf16 1056980736, %v1515_v7  ;;  %v1517_v21 = vadd.bf16 1065369472, %v2980_v15  ;;  %v1401_v5 = vmul.bf16 1061961548, %v1337_v33 }
 0x210   : > { %v2984_v11 = vpop.eup %2983  ;;  %v1646_v57 = vmul.bf16 %v1582_v46, %v4659_v0  ;;  %v1520_v19 = vadd.bf16 1065369472, %v2982_v6  ;;  %v1406_v38 = vmul.bf16 1061961548, %v1342_v50  ;;  %3001 = vtanh.bf16 %v1399_v47 }
 0x211   : > { %2046 = vmatprep.mubr.bf16.mxu0 %v1644_v43  ;;  %v1643_v20 = vmul.bf16 %v1579_v53, %v4661_v62  ;;  %v1581_v12 = vmul.bf16 1056980736, %v1517_v21  ;;  %v1522_v25 = vadd.bf16 1065369472, %v2984_v11  ;;  %3003 = vtanh.bf16 %v1404_v27 }
 0x212   : > { %v2986_v49 = vpop.eup %2985  ;;  %2207 = vmatprep.mubr.bf16.mxu1 %v1646_v57  ;;  %v1584_v60 = vmul.bf16 1056980736, %v1520_v19  ;;  %v1339_v9 = vadd.bf16 %v1275_v48, %v4288_v26  ;;  %3005 = vtanh.bf16 %v1401_v5  ;;  %v1341_v55 = vadd.bf16 %v1277_v34, %v4291_v51 }
 0x213   : > { %v2988_v44 = vpop.eup %2987  ;;  %v1519_v35 = vadd.bf16 1065369472, %v2986_v49  ;;  %2047 = vmatmul.mubr.bf16.gmra.mrb[108].mxu0 %v1643_v20  ;;  %v1645_v1 = vmul.bf16 %v1581_v12, %v4664_v40  ;;  %v1586_v0 = vmul.bf16 1056980736, %v1522_v25  ;;  %3007 = vtanh.bf16 %v1406_v38 }
 0x214   : > { %v2990_v45 = vpop.eup %2989  ;;  %v1521_v58 = vadd.bf16 1065369472, %v2988_v44  ;;  %v1648_v62 = vmul.bf16 %v1584_v60, %v4079_v63  ;;  %v1403_v16 = vmul.bf16 1061961548, %v1339_v9 }
 0x215   : > { %v2992_v54 = vpop.eup %2991  ;;  %v1524_v36 = vadd.bf16 1065369472, %v2990_v45  ;;  %2208 = vmatmul.mubr.bf16.gmra.mrb[108].mxu1 %v1645_v1  ;;  %v1650_v32 = vmul.bf16 %v1586_v0, %v4091_v24  ;;  %v1583_v37 = vmul.bf16 1056980736, %v1519_v35  ;;  %v1405_v24 = vmul.bf16 1061961548, %v1341_v55 }
 0x216   : > { %v2994_v52 = vpop.eup %2993  ;;  %v1526_v30 = vadd.bf16 1065369472, %v2992_v54  ;;  %2054 = vmatprep.mubr.bf16.mxu0 %v1648_v62  ;;  %v1585_v59 = vmul.bf16 1056980736, %v1521_v58  ;;  %3009 = vtanh.bf16 %v1403_v16 }
 0x217   : > { %v2996_v13 = vpop.eup %2995  ;;  %v1588_v17 = vmul.bf16 1056980736, %v1524_v36  ;;  %2215 = vmatprep.mubr.bf16.mxu1 %v1650_v32  ;;  %v1647_v8 = vmul.bf16 %v1583_v37, %v4668_v28  ;;  %v1523_v3 = vadd.bf16 1065369472, %v2994_v52  ;;  %3011 = vtanh.bf16 %v1405_v24 }
 0x218   : > { %v2998_v40 = vpop.eup %2997  ;;  %v1590_v29 = vmul.bf16 1056980736, %v1526_v30  ;;  %v1649_v7 = vmul.bf16 %v1585_v59, %v4671_v56  ;;  %v1525_v47 = vadd.bf16 1065369472, %v2996_v13  ;;  %v3013_v13 = vld [vmem:[%s3425_s6] sm:$0xff] }
 0x219   : > { %v3000_v41 = vpop.eup %2999  ;;  %v1652_v63 = vmul.bf16 %v1588_v17, %v4152_v18  ;;  %v1528_v33 = vadd.bf16 1065369472, %v2998_v40  ;;  %v1587_v46 = vmul.bf16 1056980736, %v1523_v3 }
 0x21a   : > { %v1654_v39 = vmul.bf16 %v1590_v29, %v4190_v10  ;;  %v1530_v50 = vadd.bf16 1065369472, %v3000_v41  ;;  %v1589_v6 = vmul.bf16 1056980736, %v1525_v47 }
 0x21b   : > { %2055 = vmatmul.mubr.bf16.gmra.mrb[112].mxu0 %v1647_v8  ;;  %v3002_v15 = vpop.eup %3001  ;;  %v1592_v48 = vmul.bf16 1056980736, %v1528_v33  ;;  %v1651_v21 = vmul.bf16 %v1587_v46, %v4146_v22 }
 0x21c   : > { %2062 = vmatprep.mubr.bf16.mxu0 %v1652_v63  ;;  %v3004_v43 = vpop.eup %3003  ;;  %v1594_v28 = vmul.bf16 1056980736, %v1530_v50  ;;  %v1527_v56 = vadd.bf16 1065369472, %v3002_v15  ;;  %v1653_v34 = vmul.bf16 %v1589_v6, %v4149_v4  ;;  %v3014_v63 = vld [vmem:[%s3425_s6 + $0x8] sm:$0xff]  ;;  %v3016_v6 = vld [vmem:[%s3425_s6 + $0x18] sm:$0xff] }
 0x21d   : > { %2216 = vmatmul.mubr.bf16.gmra.mrb[112].mxu1 %v1649_v7  ;;  %v3006_v18 = vpop.eup %3005  ;;  %v1656_v10 = vmul.bf16 %v1592_v48, %v4232_v23  ;;  %v1532_v53 = vadd.bf16 1065369472, %v3004_v43 }
 0x21e   : > { %2223 = vmatprep.mubr.bf16.mxu1 %v1654_v39  ;;  %v3008_v27 = vpop.eup %3007  ;;  %v1658_v5 = vmul.bf16 %v1594_v28, %v4241_v42  ;;  %v1529_v57 = vadd.bf16 1065369472, %v3006_v18  ;;  %v1591_v38 = vmul.bf16 1056980736, %v1527_v56  ;;  %v3015_v18 = vld [vmem:[%s3425_s6 + $0x10] sm:$0xff] }
 0x21f   : > { %v1534_v11 = vadd.bf16 1065369472, %v3008_v27  ;;  %v1596_v19 = vmul.bf16 1056980736, %v1532_v53 }
 0x220   : > { %v1593_v12 = vmul.bf16 1056980736, %v1529_v57  ;;  %v1655_v22 = vmul.bf16 %v1591_v38, %v4216_v31 }
 0x221   : > { %v3010_v49 = vpop.eup %3009  ;;  %v1598_v20 = vmul.bf16 1056980736, %v1534_v11  ;;  %v1660_v25 = vmul.bf16 %v1596_v19, %v4282_v61 }
 0x222   : > { %v3012_v23 = vpop.eup %3011  ;;  %v1531_v44 = vadd.bf16 1065369472, %v3010_v49  ;;  %v1657_v4 = vmul.bf16 %v1593_v12, %v4221_v14 }
 0x223   : > { %2063 = vmatmul.mubr.bf16.gmra.mrb[116].mxu0 %v1651_v21  ;;  %v1662_v42 = vmul.bf16 %v1598_v20, %v4298_v2  ;;  %v1533_v60 = vadd.bf16 1065369472, %v3012_v23  ;;  %v4404_v2 = vld [vmem:[%s4561_s4] ss:$0 sm:$0xff] }
 0x224   : > { %2070 = vmatprep.mubr.bf16.mxu0 %v1656_v10  ;;  %v1595_v35 = vmul.bf16 1056980736, %v1531_v44  ;;  %v3017_v44 = vld [vmem:[%s3425_s6 + $0x20] sm:$0xff] }
 0x225   : > { %2224 = vmatmul.mubr.bf16.gmra.mrb[116].mxu1 %v1653_v34  ;;  %v1597_v9 = vmul.bf16 1056980736, %v1533_v60 }
 0x226   : > { %2231 = vmatprep.mubr.bf16.mxu1 %v1658_v5  ;;  %v1659_v45 = vmul.bf16 %v1595_v35, %v4288_v26  ;;  %v3018_v35 = vld [vmem:[%s3425_s6 + $0x28] sm:$0xff] }
 0x227   : > { %v1661_v1 = vmul.bf16 %v1597_v9, %v4291_v51 }
 0x22b   : > { %2071 = vmatmul.mubr.bf16.gmra.mrb[120].mxu0 %v1655_v22 }
 0x22c   : > { %2078 = vmatprep.mubr.bf16.mxu0 %v1660_v25 }
 0x22d   : > { %2232 = vmatmul.mubr.bf16.gmra.mrb[120].mxu1 %v1657_v4 }
 0x22e   : > { %2239 = vmatprep.mubr.bf16.mxu1 %v1662_v42 }
 0x233   : > { %2079 = vmatmul.mubr.bf16.gmra.mrb[124].mxu0 %v1659_v45 }
 0x235   : > { %2240 = vmatmul.mubr.bf16.gmra.mrb[124].mxu1 %v1661_v1 }
 0x25f   : > { %v2520_v61 = vpop.f32.mrb[64].mxu0 }
 0x260   : > { %v2632_v31 = vpop.f32.mrb[64].mxu1  ;;  %v2521_v14 = vpop.f32.mrb[65].mxu0 }
 0x261   : > { %v2633_v0 = vpop.f32.mrb[65].mxu1  ;;  %v2522_v58 = vadd.f32 %v2521_v14, %v2520_v61  ;;  %v2523_v62 = vpop.f32.mrb[66].mxu0 }
 0x262   : > { %v2634_v54 = vadd.f32 %v2633_v0, %v2632_v31  ;;  %v2635_v36 = vpop.f32.mrb[66].mxu1  ;;  %v2524_v26 = vpop.f32.mrb[67].mxu0 }
 0x263   : > { %v2636_v52 = vpop.f32.mrb[67].mxu1  ;;  %v1961_v51 = vadd.f32 %v2522_v58, %v4404_v2  ;;  %v2525_v32 = vadd.f32 %v2524_v26, %v2523_v62 }
 0x264   : > { %v2637_v37 = vadd.f32 %v2636_v52, %v2635_v36 }
 0x265   : > { %v2122_v30 = vadd.f32 %v2634_v54, %v1961_v51  ;;  %v1964_v55 = vadd.f32 %v2525_v32, %v4404_v2 }
 0x267   : > { %v2248_v17 = vadd.f32 %v3013_v13, %v2122_v30  ;;  %v2125_v40 = vadd.f32 %v2637_v37, %v1964_v55  ;;  %v2526_v59 = vpop.f32.mrb[68].mxu0  ;;  %v3019_v37 = vld [vmem:[%s3425_s6 + $0x30] sm:$0xff]  ;;  %v3020_v13 = vld [vmem:[%s3425_s6 + $0x38] sm:$0xff] }
 0x268   : > { %v2638_v29 = vpop.f32.mrb[68].mxu1  ;;  %v2527_v16 = vpop.f32.mrb[69].mxu0 }
 0x269   : > { %v2639_v41 = vpop.f32.mrb[69].mxu1  ;;  %2280 = vst [vmem:[%s4411_s12] sm:$0xff] %v2248_v17  ;;  %v2249_v33 = vadd.f32 %v3014_v63, %v2125_v40  ;;  %v2528_v8 = vadd.f32 %v2527_v16, %v2526_v59  ;;  %v2529_v24 = vpop.f32.mrb[70].mxu0 }
 0x26a   : > { %v2640_v3 = vadd.f32 %v2639_v41, %v2638_v29  ;;  %v2641_v39 = vpop.f32.mrb[70].mxu1  ;;  %v2530_v50 = vpop.f32.mrb[71].mxu0 }
 0x26b   : > { %v2642_v7 = vpop.f32.mrb[71].mxu1  ;;  %2281 = vst [vmem:[%s4411_s12 + $0x8] sm:$0xff] %v2249_v33  ;;  %v1969_v47 = vadd.f32 %v2528_v8, %v4404_v2  ;;  %v2531_v15 = vadd.f32 %v2530_v50, %v2529_v24 }
 0x26c   : > { %v2643_v48 = vadd.f32 %v2642_v7, %v2641_v39 }
 0x26d   : > { %v2130_v43 = vadd.f32 %v2640_v3, %v1969_v47  ;;  %v1972_v46 = vadd.f32 %v2531_v15, %v4404_v2 }
 0x26f   : > { %v2250_v28 = vadd.f32 %v3015_v18, %v2130_v43  ;;  %v2133_v27 = vadd.f32 %v2643_v48, %v1972_v46  ;;  %v3021_v48 = vld [vmem:[%s3425_s6 + $0x40] sm:$0xff] }
 0x271   : > { %2282 = vst [vmem:[%s4411_s12 + $0x10] sm:$0xff] %v2250_v28  ;;  %v2251_v10 = vadd.f32 %v3016_v6, %v2133_v27  ;;  %v3022_v27 = vld [vmem:[%s3425_s6 + $0x48] sm:$0xff] }
 0x273   : > { %2283 = vst [vmem:[%s4411_s12 + $0x18] sm:$0xff] %v2251_v10 }
 0x27c   : > { %v2532_v53 = vpop.f32.mrb[72].mxu0 }
 0x27d   : > { %v2533_v21 = vpop.f32.mrb[73].mxu0 }
 0x27e   : > { %v2534_v5 = vadd.f32 %v2533_v21, %v2532_v53  ;;  %v2535_v11 = vpop.f32.mrb[74].mxu0 }
 0x27f   : > { %v2644_v56 = vpop.f32.mrb[72].mxu1  ;;  %v2536_v57 = vpop.f32.mrb[75].mxu0 }
 0x280   : > { %v2645_v34 = vpop.f32.mrb[73].mxu1  ;;  %v1977_v19 = vadd.f32 %v2534_v5, %v4404_v2  ;;  %v2537_v20 = vadd.f32 %v2536_v57, %v2535_v11 }
 0x281   : > { %v2646_v38 = vadd.f32 %v2645_v34, %v2644_v56  ;;  %v2647_v49 = vpop.f32.mrb[74].mxu1 }
 0x282   : > { %v2648_v12 = vpop.f32.mrb[75].mxu1  ;;  %v1980_v25 = vadd.f32 %v2537_v20, %v4404_v2 }
 0x283   : > { %v2138_v23 = vadd.f32 %v2646_v38, %v1977_v19  ;;  %v2649_v22 = vadd.f32 %v2648_v12, %v2647_v49 }
 0x284   : > { %v2538_v60 = vpop.f32.mrb[76].mxu0 }
 0x285   : > { %v2252_v42 = vadd.f32 %v3017_v44, %v2138_v23  ;;  %v2141_v4 = vadd.f32 %v2649_v22, %v1980_v25  ;;  %v2539_v45 = vpop.f32.mrb[77].mxu0  ;;  %v3023_v23 = vld [vmem:[%s3425_s6 + $0x50] sm:$0xff]  ;;  %v3024_v44 = vld [vmem:[%s3425_s6 + $0x58] sm:$0xff] }
 0x286   : > { %v2540_v61 = vadd.f32 %v2539_v45, %v2538_v60  ;;  %v2541_v31 = vpop.f32.mrb[78].mxu0 }
 0x287   : > { %2284 = vst [vmem:[%s4411_s12 + $0x20] sm:$0xff] %v2252_v42  ;;  %v2253_v9 = vadd.f32 %v3018_v35, %v2141_v4  ;;  %v2542_v0 = vpop.f32.mrb[79].mxu0 }
 0x288   : > { %v2650_v1 = vpop.f32.mrb[76].mxu1  ;;  %v1985_v58 = vadd.f32 %v2540_v61, %v4404_v2  ;;  %v2543_v36 = vadd.f32 %v2542_v0, %v2541_v31 }
 0x289   : > { %2285 = vst [vmem:[%s4411_s12 + $0x28] sm:$0xff] %v2253_v9  ;;  %v2651_v14 = vpop.f32.mrb[77].mxu1 }
 0x28a   : > { %v2652_v54 = vadd.f32 %v2651_v14, %v2650_v1  ;;  %v2653_v62 = vpop.f32.mrb[78].mxu1  ;;  %v1988_v51 = vadd.f32 %v2543_v36, %v4404_v2 }
 0x28b   : > { %v2654_v26 = vpop.f32.mrb[79].mxu1 }
 0x28c   : > { %v2146_v52 = vadd.f32 %v2652_v54, %v1985_v58  ;;  %v2655_v32 = vadd.f32 %v2654_v26, %v2653_v62 }
 0x28e   : > { %v2254_v30 = vadd.f32 %v3019_v37, %v2146_v52  ;;  %v2149_v55 = vadd.f32 %v2655_v32, %v1988_v51  ;;  %v3025_v52 = vld [vmem:[%s3425_s6 + $0x60] sm:$0xff] }
 0x290   : > { %2286 = vst [vmem:[%s4411_s12 + $0x30] sm:$0xff] %v2254_v30  ;;  %v2255_v17 = vadd.f32 %v3020_v13, %v2149_v55  ;;  %v3026_v55 = vld [vmem:[%s3425_s6 + $0x68] sm:$0xff] }
 0x292   : > { %2287 = vst [vmem:[%s4411_s12 + $0x38] sm:$0xff] %v2255_v17 }
 0x296   : > { %v2544_v40 = vpop.f32.mrb[80].mxu0 }
 0x297   : > { %v2656_v59 = vpop.f32.mrb[80].mxu1  ;;  %v2545_v29 = vpop.f32.mrb[81].mxu0 }
 0x298   : > { %v2546_v16 = vadd.f32 %v2545_v29, %v2544_v40  ;;  %v2657_v41 = vpop.f32.mrb[81].mxu1  ;;  %v2547_v63 = vpop.f32.mrb[82].mxu0 }
 0x299   : > { %v2658_v33 = vadd.f32 %v2657_v41, %v2656_v59  ;;  %v2659_v8 = vpop.f32.mrb[82].mxu1  ;;  %v2548_v3 = vpop.f32.mrb[83].mxu0 }
 0x29a   : > { %v1993_v24 = vadd.f32 %v2546_v16, %v4404_v2  ;;  %v2549_v39 = vadd.f32 %v2548_v3, %v2547_v63  ;;  %v2660_v50 = vpop.f32.mrb[83].mxu1 }
 0x29b   : > { %v2661_v7 = vadd.f32 %v2660_v50, %v2659_v8 }
 0x29c   : > { %v2154_v47 = vadd.f32 %v2658_v33, %v1993_v24  ;;  %v1996_v15 = vadd.f32 %v2549_v39, %v4404_v2 }
 0x29e   : > { %v2256_v43 = vadd.f32 %v3021_v48, %v2154_v47  ;;  %v2157_v46 = vadd.f32 %v2661_v7, %v1996_v15  ;;  %v2550_v18 = vpop.f32.mrb[84].mxu0  ;;  %v3027_v7 = vld [vmem:[%s3425_s6 + $0x70] sm:$0xff]  ;;  %v3028_v48 = vld [vmem:[%s3425_s6 + $0x78] sm:$0xff] }
 0x29f   : > { %v2551_v28 = vpop.f32.mrb[85].mxu0 }
 0x2a0   : > { %2288 = vst [vmem:[%s4411_s12 + $0x40] sm:$0xff] %v2256_v43  ;;  %v2257_v6 = vadd.f32 %v3022_v27, %v2157_v46  ;;  %v2552_v10 = vadd.f32 %v2551_v28, %v2550_v18  ;;  %v2553_v53 = vpop.f32.mrb[86].mxu0  ;;  %v2662_v21 = vpop.f32.mrb[84].mxu1 }
 0x2a1   : > { %v2554_v56 = vpop.f32.mrb[87].mxu0  ;;  %v2663_v11 = vpop.f32.mrb[85].mxu1 }
 0x2a2   : > { %2289 = vst [vmem:[%s4411_s12 + $0x48] sm:$0xff] %v2257_v6  ;;  %v2001_v5 = vadd.f32 %v2552_v10, %v4404_v2  ;;  %v2555_v34 = vadd.f32 %v2554_v56, %v2553_v53  ;;  %v2664_v57 = vadd.f32 %v2663_v11, %v2662_v21  ;;  %v2665_v19 = vpop.f32.mrb[86].mxu1 }
 0x2a3   : > { %v2666_v49 = vpop.f32.mrb[87].mxu1 }
 0x2a4   : > { %v2004_v38 = vadd.f32 %v2555_v34, %v4404_v2  ;;  %v2162_v20 = vadd.f32 %v2664_v57, %v2001_v5  ;;  %v2667_v12 = vadd.f32 %v2666_v49, %v2665_v19  ;;  %v3029_v49 = vld [vmem:[%s3425_s6 + $0x80] sm:$0xff] }
 0x2a6   : > { %v2258_v25 = vadd.f32 %v3023_v23, %v2162_v20  ;;  %v2165_v22 = vadd.f32 %v2667_v12, %v2004_v38  ;;  %v3030_v23 = vld [vmem:[%s3425_s6 + $0x88] sm:$0xff] }
 0x2a8   : > { %2290 = vst [vmem:[%s4411_s12 + $0x50] sm:$0xff] %v2258_v25  ;;  %v2259_v42 = vadd.f32 %v3024_v44, %v2165_v22 }
 0x2aa   : > { %2291 = vst [vmem:[%s4411_s12 + $0x58] sm:$0xff] %v2259_v42 }
 0x2ad   : > { %v2556_v4 = vpop.f32.mrb[88].mxu0 }
 0x2ae   : > { %v2557_v35 = vpop.f32.mrb[89].mxu0 }
 0x2af   : > { %v2668_v60 = vpop.f32.mrb[88].mxu1  ;;  %v2558_v9 = vadd.f32 %v2557_v35, %v2556_v4  ;;  %v2559_v1 = vpop.f32.mrb[90].mxu0 }
 0x2b0   : > { %v2669_v45 = vpop.f32.mrb[89].mxu1  ;;  %v2560_v14 = vpop.f32.mrb[91].mxu0 }
 0x2b1   : > { %v2670_v61 = vadd.f32 %v2669_v45, %v2668_v60  ;;  %v2671_v31 = vpop.f32.mrb[90].mxu1  ;;  %v2009_v0 = vadd.f32 %v2558_v9, %v4404_v2  ;;  %v2561_v58 = vadd.f32 %v2560_v14, %v2559_v1 }
 0x2b2   : > { %v2672_v54 = vpop.f32.mrb[91].mxu1 }
 0x2b3   : > { %v2673_v62 = vadd.f32 %v2672_v54, %v2671_v31  ;;  %v2170_v36 = vadd.f32 %v2670_v61, %v2009_v0  ;;  %v2012_v26 = vadd.f32 %v2561_v58, %v4404_v2 }
 0x2b5   : > { %v2260_v51 = vadd.f32 %v3025_v52, %v2170_v36  ;;  %v2173_v32 = vadd.f32 %v2673_v62, %v2012_v26  ;;  %v3031_v62 = vld [vmem:[%s3425_s6 + $0x90] sm:$0xff]  ;;  %v3032_v52 = vld [vmem:[%s3425_s6 + $0x98] sm:$0xff] }
 0x2b6   : > { %v2562_v37 = vpop.f32.mrb[92].mxu0 }
 0x2b7   : > { %v2563_v30 = vpop.f32.mrb[93].mxu0  ;;  %2292 = vst [vmem:[%s4411_s12 + $0x60] sm:$0xff] %v2260_v51  ;;  %v2261_v13 = vadd.f32 %v3026_v55, %v2173_v32 }
 0x2b8   : > { %v2564_v17 = vadd.f32 %v2563_v30, %v2562_v37  ;;  %v2565_v40 = vpop.f32.mrb[94].mxu0 }
 0x2b9   : > { %v2674_v59 = vpop.f32.mrb[92].mxu1  ;;  %v2566_v29 = vpop.f32.mrb[95].mxu0  ;;  %2293 = vst [vmem:[%s4411_s12 + $0x68] sm:$0xff] %v2261_v13 }
 0x2ba   : > { %v2017_v16 = vadd.f32 %v2564_v17, %v4404_v2  ;;  %v2675_v41 = vpop.f32.mrb[93].mxu1  ;;  %v2567_v63 = vadd.f32 %v2566_v29, %v2565_v40 }
 0x2bb   : > { %v2676_v33 = vadd.f32 %v2675_v41, %v2674_v59  ;;  %v2677_v8 = vpop.f32.mrb[94].mxu1 }
 0x2bc   : > { %v2020_v3 = vadd.f32 %v2567_v63, %v4404_v2  ;;  %v2678_v24 = vpop.f32.mrb[95].mxu1 }
 0x2bd   : > { %v2178_v39 = vadd.f32 %v2676_v33, %v2017_v16  ;;  %v2679_v50 = vadd.f32 %v2678_v24, %v2677_v8  ;;  %v3033_v24 = vld [vmem:[%s3425_s6 + $0xa0] sm:$0xff] }
 0x2bf   : > { %v2262_v47 = vadd.f32 %v3027_v7, %v2178_v39  ;;  %v2181_v15 = vadd.f32 %v2679_v50, %v2020_v3  ;;  %v3034_v7 = vld [vmem:[%s3425_s6 + $0xa8] sm:$0xff] }
 0x2c1   : > { %2294 = vst [vmem:[%s4411_s12 + $0x70] sm:$0xff] %v2262_v47  ;;  %v2263_v43 = vadd.f32 %v3028_v48, %v2181_v15 }
 0x2c3   : > { %2295 = vst [vmem:[%s4411_s12 + $0x78] sm:$0xff] %v2263_v43 }
 0x2c4   : > { %v2568_v46 = vpop.f32.mrb[96].mxu0 }
 0x2c5   : > { %v2569_v28 = vpop.f32.mrb[97].mxu0 }
 0x2c6   : > { %v2680_v18 = vpop.f32.mrb[96].mxu1  ;;  %v2570_v27 = vadd.f32 %v2569_v28, %v2568_v46  ;;  %v2571_v10 = vpop.f32.mrb[98].mxu0 }
 0x2c7   : > { %v2681_v6 = vpop.f32.mrb[97].mxu1  ;;  %v2572_v56 = vpop.f32.mrb[99].mxu0 }
 0x2c8   : > { %v2682_v53 = vadd.f32 %v2681_v6, %v2680_v18  ;;  %v2683_v21 = vpop.f32.mrb[98].mxu1  ;;  %v2025_v5 = vadd.f32 %v2570_v27, %v4404_v2  ;;  %v2573_v11 = vadd.f32 %v2572_v56, %v2571_v10 }
 0x2c9   : > { %v2684_v34 = vpop.f32.mrb[99].mxu1 }
 0x2ca   : > { %v2685_v57 = vadd.f32 %v2684_v34, %v2683_v21  ;;  %v2186_v19 = vadd.f32 %v2682_v53, %v2025_v5  ;;  %v2028_v38 = vadd.f32 %v2573_v11, %v4404_v2 }
 0x2cc   : > { %v2264_v20 = vadd.f32 %v3029_v49, %v2186_v19  ;;  %v2189_v12 = vadd.f32 %v2685_v57, %v2028_v38  ;;  %v3035_v57 = vld [vmem:[%s3425_s6 + $0xb0] sm:$0xff] }
 0x2ce   : > { %2296 = vst [vmem:[%s4411_s12 + $0x80] sm:$0xff] %v2264_v20  ;;  %v2265_v25 = vadd.f32 %v3030_v23, %v2189_v12  ;;  %v2574_v22 = vpop.f32.mrb[100].mxu0  ;;  %v3036_v12 = vld [vmem:[%s3425_s6 + $0xb8] sm:$0xff] }
 0x2cf   : > { %v2575_v44 = vpop.f32.mrb[101].mxu0 }
 0x2d0   : > { %2297 = vst [vmem:[%s4411_s12 + $0x88] sm:$0xff] %v2265_v25  ;;  %v2686_v42 = vpop.f32.mrb[100].mxu1  ;;  %v2576_v4 = vadd.f32 %v2575_v44, %v2574_v22  ;;  %v2577_v60 = vpop.f32.mrb[102].mxu0 }
 0x2d1   : > { %v2687_v35 = vpop.f32.mrb[101].mxu1  ;;  %v2578_v9 = vpop.f32.mrb[103].mxu0 }
 0x2d2   : > { %v2033_v45 = vadd.f32 %v2576_v4, %v4404_v2  ;;  %v2688_v1 = vadd.f32 %v2687_v35, %v2686_v42  ;;  %v2689_v61 = vpop.f32.mrb[102].mxu1  ;;  %v2579_v31 = vadd.f32 %v2578_v9, %v2577_v60 }
 0x2d3   : > { %v2690_v14 = vpop.f32.mrb[103].mxu1 }
 0x2d4   : > { %v2194_v0 = vadd.f32 %v2688_v1, %v2033_v45  ;;  %v2036_v58 = vadd.f32 %v2579_v31, %v4404_v2  ;;  %v2691_v54 = vadd.f32 %v2690_v14, %v2689_v61 }
 0x2d6   : > { %v2266_v36 = vadd.f32 %v3031_v62, %v2194_v0  ;;  %v2197_v26 = vadd.f32 %v2691_v54, %v2036_v58  ;;  %v3037_v0 = vld [vmem:[%s3425_s6 + $0xc0] sm:$0xff] }
 0x2d8   : > { %2298 = vst [vmem:[%s4411_s12 + $0x90] sm:$0xff] %v2266_v36  ;;  %v2267_v51 = vadd.f32 %v3032_v52, %v2197_v26  ;;  %v3038_v26 = vld [vmem:[%s3425_s6 + $0xc8] sm:$0xff] }
 0x2da   : > { %2299 = vst [vmem:[%s4411_s12 + $0x98] sm:$0xff] %v2267_v51 }
 0x2db   : > { %v2580_v32 = vpop.f32.mrb[104].mxu0 }
 0x2dc   : > { %v2692_v37 = vpop.f32.mrb[104].mxu1  ;;  %v2581_v30 = vpop.f32.mrb[105].mxu0 }
 0x2dd   : > { %v2582_v55 = vadd.f32 %v2581_v30, %v2580_v32  ;;  %v2693_v13 = vpop.f32.mrb[105].mxu1  ;;  %v2583_v17 = vpop.f32.mrb[106].mxu0 }
 0x2de   : > { %v2694_v40 = vadd.f32 %v2693_v13, %v2692_v37  ;;  %v2695_v59 = vpop.f32.mrb[106].mxu1  ;;  %v2584_v29 = vpop.f32.mrb[107].mxu0 }
 0x2df   : > { %v2041_v16 = vadd.f32 %v2582_v55, %v4404_v2  ;;  %v2585_v41 = vadd.f32 %v2584_v29, %v2583_v17  ;;  %v2696_v63 = vpop.f32.mrb[107].mxu1 }
 0x2e0   : > { %v2697_v33 = vadd.f32 %v2696_v63, %v2695_v59 }
 0x2e1   : > { %v2202_v8 = vadd.f32 %v2694_v40, %v2041_v16  ;;  %v2044_v3 = vadd.f32 %v2585_v41, %v4404_v2 }
 0x2e3   : > { %v2268_v39 = vadd.f32 %v3033_v24, %v2202_v8  ;;  %v2205_v50 = vadd.f32 %v2697_v33, %v2044_v3  ;;  %v3039_v33 = vld [vmem:[%s3425_s6 + $0xd0] sm:$0xff] }
 0x2e5   : > { %2300 = vst [vmem:[%s4411_s12 + $0xa0] sm:$0xff] %v2268_v39  ;;  %v2269_v47 = vadd.f32 %v3034_v7, %v2205_v50  ;;  %v3040_v50 = vld [vmem:[%s3425_s6 + $0xd8] sm:$0xff] }
 0x2e6   : > { %v2586_v15 = vpop.f32.mrb[108].mxu0 }
 0x2e7   : > { %v2587_v48 = vpop.f32.mrb[109].mxu0  ;;  %2301 = vst [vmem:[%s4411_s12 + $0xa8] sm:$0xff] %v2269_v47 }
 0x2e8   : > { %v2698_v43 = vpop.f32.mrb[108].mxu1  ;;  %v2588_v46 = vadd.f32 %v2587_v48, %v2586_v15  ;;  %v2589_v18 = vpop.f32.mrb[110].mxu0 }
 0x2e9   : > { %v2699_v28 = vpop.f32.mrb[109].mxu1  ;;  %v2590_v27 = vpop.f32.mrb[111].mxu0 }
 0x2ea   : > { %v2049_v6 = vadd.f32 %v2588_v46, %v4404_v2  ;;  %v2700_v10 = vadd.f32 %v2699_v28, %v2698_v43  ;;  %v2701_v53 = vpop.f32.mrb[110].mxu1  ;;  %v2591_v21 = vadd.f32 %v2590_v27, %v2589_v18 }
 0x2eb   : > { %v2702_v56 = vpop.f32.mrb[111].mxu1 }
 0x2ec   : > { %v2210_v5 = vadd.f32 %v2700_v10, %v2049_v6  ;;  %v2052_v11 = vadd.f32 %v2591_v21, %v4404_v2  ;;  %v2703_v34 = vadd.f32 %v2702_v56, %v2701_v53 }
 0x2ee   : > { %v2270_v19 = vadd.f32 %v3035_v57, %v2210_v5  ;;  %v2213_v38 = vadd.f32 %v2703_v34, %v2052_v11  ;;  %v2592_v49 = vpop.f32.mrb[112].mxu0  ;;  %v3041_v5 = vld [vmem:[%s3425_s6 + $0xe0] sm:$0xff] }
 0x2ef   : > { %v2593_v20 = vpop.f32.mrb[113].mxu0 }
 0x2f0   : > { %2302 = vst [vmem:[%s4411_s12 + $0xb0] sm:$0xff] %v2270_v19  ;;  %v2271_v23 = vadd.f32 %v3036_v12, %v2213_v38  ;;  %v2704_v25 = vpop.f32.mrb[112].mxu1  ;;  %v2594_v22 = vadd.f32 %v2593_v20, %v2592_v49  ;;  %v2595_v44 = vpop.f32.mrb[114].mxu0  ;;  %v3042_v38 = vld [vmem:[%s3425_s6 + $0xe8] sm:$0xff] }
 0x2f1   : > { %v2705_v42 = vpop.f32.mrb[113].mxu1  ;;  %v2596_v4 = vpop.f32.mrb[115].mxu0 }
 0x2f2   : > { %2303 = vst [vmem:[%s4411_s12 + $0xb8] sm:$0xff] %v2271_v23  ;;  %v2057_v60 = vadd.f32 %v2594_v22, %v4404_v2  ;;  %v2706_v35 = vadd.f32 %v2705_v42, %v2704_v25  ;;  %v2707_v9 = vpop.f32.mrb[114].mxu1  ;;  %v2597_v45 = vadd.f32 %v2596_v4, %v2595_v44 }
 0x2f3   : > { %v2708_v1 = vpop.f32.mrb[115].mxu1 }
 0x2f4   : > { %v2218_v61 = vadd.f32 %v2706_v35, %v2057_v60  ;;  %v2060_v31 = vadd.f32 %v2597_v45, %v4404_v2  ;;  %v2709_v14 = vadd.f32 %v2708_v1, %v2707_v9 }
 0x2f6   : > { %v2272_v58 = vadd.f32 %v3037_v0, %v2218_v61  ;;  %v2221_v54 = vadd.f32 %v2709_v14, %v2060_v31  ;;  %v2598_v62 = vpop.f32.mrb[116].mxu0  ;;  %v3043_v61 = vld [vmem:[%s3425_s6 + $0xf0] sm:$0xff]  ;;  %v3044_v0 = vld [vmem:[%s3425_s6 + $0xf8] sm:$0xff] }
 0x2f7   : > { %v2599_v36 = vpop.f32.mrb[117].mxu0 }
 0x2f8   : > { %2304 = vst [vmem:[%s4411_s12 + $0xc0] sm:$0xff] %v2272_v58  ;;  %v2273_v52 = vadd.f32 %v3038_v26, %v2221_v54  ;;  %v2710_v51 = vpop.f32.mrb[116].mxu1  ;;  %v2600_v32 = vadd.f32 %v2599_v36, %v2598_v62  ;;  %v2601_v37 = vpop.f32.mrb[118].mxu0 }
 0x2f9   : > { %v2711_v30 = vpop.f32.mrb[117].mxu1  ;;  %v2602_v55 = vpop.f32.mrb[119].mxu0 }
 0x2fa   : > { %2305 = vst [vmem:[%s4411_s12 + $0xc8] sm:$0xff] %v2273_v52  ;;  %v2065_v13 = vadd.f32 %v2600_v32, %v4404_v2  ;;  %v2712_v17 = vadd.f32 %v2711_v30, %v2710_v51  ;;  %v2713_v40 = vpop.f32.mrb[118].mxu1  ;;  %v2603_v59 = vadd.f32 %v2602_v55, %v2601_v37 }
 0x2fb   : > { %v2714_v29 = vpop.f32.mrb[119].mxu1 }
 0x2fc   : > { %v2226_v16 = vadd.f32 %v2712_v17, %v2065_v13  ;;  %v2068_v41 = vadd.f32 %v2603_v59, %v4404_v2  ;;  %v2715_v63 = vadd.f32 %v2714_v29, %v2713_v40 }
 0x2fe   : > { %v2274_v8 = vadd.f32 %v3039_v33, %v2226_v16  ;;  %v2229_v3 = vadd.f32 %v2715_v63, %v2068_v41  ;;  %v2604_v24 = vpop.f32.mrb[120].mxu0 }
 0x2ff   : > { %v2605_v39 = vpop.f32.mrb[121].mxu0 }
 0x300   : > { %2306 = vst [vmem:[%s4411_s12 + $0xd0] sm:$0xff] %v2274_v8  ;;  %v2275_v7 = vadd.f32 %v3040_v50, %v2229_v3  ;;  %v2716_v47 = vpop.f32.mrb[120].mxu1  ;;  %v2606_v15 = vadd.f32 %v2605_v39, %v2604_v24  ;;  %v2607_v48 = vpop.f32.mrb[122].mxu0 }
 0x301   : > { %v2717_v43 = vpop.f32.mrb[121].mxu1  ;;  %v2608_v46 = vpop.f32.mrb[123].mxu0 }
 0x302   : > { %2307 = vst [vmem:[%s4411_s12 + $0xd8] sm:$0xff] %v2275_v7  ;;  %v2073_v18 = vadd.f32 %v2606_v15, %v4404_v2  ;;  %v2718_v28 = vadd.f32 %v2717_v43, %v2716_v47  ;;  %v2719_v27 = vpop.f32.mrb[122].mxu1  ;;  %v2609_v6 = vadd.f32 %v2608_v46, %v2607_v48 }
 0x303   : > { %v2720_v10 = vpop.f32.mrb[123].mxu1 }
 0x304   : > { %v2234_v53 = vadd.f32 %v2718_v28, %v2073_v18  ;;  %v2076_v21 = vadd.f32 %v2609_v6, %v4404_v2  ;;  %v2721_v56 = vadd.f32 %v2720_v10, %v2719_v27 }
 0x306   : > { %v2276_v11 = vadd.f32 %v3041_v5, %v2234_v53  ;;  %v2237_v34 = vadd.f32 %v2721_v56, %v2076_v21  ;;  %v2610_v57 = vpop.f32.mrb[124].mxu0 }
 0x307   : > { %v2611_v19 = vpop.f32.mrb[125].mxu0 }
 0x308   : > { %2308 = vst [vmem:[%s4411_s12 + $0xe0] sm:$0xff] %v2276_v11  ;;  %v2277_v49 = vadd.f32 %v3042_v38, %v2237_v34  ;;  %v2722_v20 = vpop.f32.mrb[124].mxu1  ;;  %v2612_v12 = vadd.f32 %v2611_v19, %v2610_v57  ;;  %v2613_v23 = vpop.f32.mrb[126].mxu0 }
 0x309   : > { %v2723_v25 = vpop.f32.mrb[125].mxu1  ;;  %v2614_v22 = vpop.f32.mrb[127].mxu0 }
 0x30a   : > { %2309 = vst [vmem:[%s4411_s12 + $0xe8] sm:$0xff] %v2277_v49  ;;  %v2081_v44 = vadd.f32 %v2612_v12, %v4404_v2  ;;  %v2724_v42 = vadd.f32 %v2723_v25, %v2722_v20  ;;  %v2725_v4 = vpop.f32.mrb[126].mxu1  ;;  %v2615_v60 = vadd.f32 %v2614_v22, %v2613_v23 }
 0x30b   : > { %v2726_v35 = vpop.f32.mrb[127].mxu1 }
 0x30c   : > { %v2242_v9 = vadd.f32 %v2724_v42, %v2081_v44  ;;  %v2084_v45 = vadd.f32 %v2615_v60, %v4404_v2  ;;  %v2727_v1 = vadd.f32 %v2726_v35, %v2725_v4 }
 0x30e   : > { %v2278_v31 = vadd.f32 %v3043_v61, %v2242_v9  ;;  %v2245_v14 = vadd.f32 %v2727_v1, %v2084_v45 }
 0x310   : > { %2310 = vst [vmem:[%s4411_s12 + $0xf0] sm:$0xff] %v2278_v31  ;;  %v2279_v2 = vadd.f32 %v3044_v0, %v2245_v14 }
 0x312   : > { %2311 = vst [vmem:[%s4411_s12 + $0xf8] sm:$0xff] %v2279_v2 }
 0x313   : > { %3144 = shalt.err (!%p3141_p2)
}
 0x314   : > { %s3145_s6 = scalar_lea.hbm %s4508_s11, 4096  ;;  %s3149_s10 = scalar_lea.hbm %s4562_s5, 8192 }
 0x315   : > { %p3146_p13 = scmp.ne.s32.totalorder %s4508_s11, %s3145_s6  ;;  %p3150_p4 = scmp.lt.u32.totalorder %s4508_s11, %s4562_s5 }
 0x316   : > { %p3151_p7 = scmp.lt.u32.totalorder %s3149_s10, %s3145_s6  ;;  %p3153_p11 = scmp.lt.u32.totalorder %s3145_s6, %s4508_s11 }
 0x317   : > { %p3147_p6 = pnand %p3146_p13, %p4675_p0 }
 0x318   : > { %p3152_p8 = por %p3151_p7, %p3150_p4 }
 0x319   : > { %p3148_p10 = pneg %p3147_p6 }
 0x31a   : > { %p3154_p1 = por %p3153_p11, %p3152_p8 }
 0x31c   : > { %p3155_p3 = pnand %p3154_p1, %p3148_p10 }
 0x31e   : > { %3158 = shalt.err (!%p3155_p3)
}
 0x31f   : > { %s3215_s13 = smov 128   ;;  %s3216_s8 = smov 8  }
 0x320   : > { %2738 = dma.vmem_to_hbm [thread:$0]  (%p4675_p0), %s4510_s29, 4096, %s4508_s11, %s2313_s14, %s3215_s13, %s3215_s13, %s3216_s8  }
 0x321 PF: > { %s2341_s9 = sand.u32 1, %s3189_s18   ;;  %p4676_p5 = scmp.ne.s32.totalorder %s4596_s25, 0 }
 0x322   : > { %p4677_p9 = scmp.ge.s32.totalorder %s3201_s21, 2  ;;  %s2342_s22 = scalar_lea.sflag [#allocation4], %s2341_s9 }
 0x324   : > { %p2752_p12 = pnand %p4677_p9, %p4676_p5 }
 0x326   : > { %3184 = dma.done.wait (!%p2752_p12), %s2342_s22, 4096  }
 0x327   : > { %3186 = vsyncadd (!%p2752_p12), %s2342_s22, 4294963200  ;;  %p19_p2 = scmp.ge.s32.totalorder %s3357_s16, 4   ;;  %s4678_s18 = smov %s3193_s19 }
 0x328   : > { %s4679_s19 = smov %s3197_s20  ;;  %s4680_s20 = smov %s3366_s27 }
 0x329   : > { %s4681_s21 = smov %s3357_s16  ;;  %21 = sbr.rel (!%p19_p2) target bundleno = 6 (0x6), region = 93 }
 0x330   :  { %2347 = vsyncpa [#allocation3], 1 }
 0x331   :  { %2349 = vsyncpa [#allocation3 + $0x1], 1 }
 0x332   :  { %2350 = vsyncpa [#allocation6], 1 }
 0x333   :  { %2351 = vsyncpa [#allocation4], 1 }
 0x334   :  { %2353 = vsyncpa [#allocation4 + $0x1], 1 }

// kernel: tpu_custom_call.1
= control target key start
LH: loop header
LB: loop body
LE: loop exit
PB: predicated region body
PF: predicated region fallthrough
CT: control target
= control target key end

     0   :  { %10 = vsyncpa [#allocation3], 0  ;;  %s4557_s0 = inlined_call_operand.hbm [shape: f32[512,128], index: 0, kind: input, shape index: {}]   ;;  %s4558_s1 = inlined_call_operand.hbm [shape: bf16[128,512], index: 1, kind: input, shape index: {}]   ;;  %s4559_s2 = inlined_call_operand.vmem [shape: bf16[1,512], index: 2, kind: input, shape index: {}]   ;;  %s4560_s3 = inlined_call_operand.hbm [shape: bf16[512,128], index: 3, kind: input, shape index: {}]   ;;  %s4561_s4 = inlined_call_operand.vmem [shape: f32[1,128], index: 4, kind: input, shape index: {}]   ;;  %s4562_s5 = inlined_call_operand.hbm [shape: f32[512,128], index: 5, kind: output, shape index: {}]  }
   0x1   :  { %12 = vsyncpa [#allocation3 + $0x1], 0 }
   0x2   :  { %13 = vsyncpa [#allocation6], 0 }
   0x3   :  { %14 = vsyncpa [#allocation4], 0 }
   0x4   :  { %16 = vsyncpa [#allocation4 + $0x1], 0  ;;  %s3247_s18 = smov 0   ;;  %s3249_s19 = smov 0  }
   0x5   :  { %s3251_s20 = smov 0   ;;  %s3253_s21 = smov 0  }
   0x6 LB: > { %s3268_s22 = sadd.s32 4294967295, %s3201_s21   ;;  %s2418_s23 = sadd.s32 4294967294, %s3201_s21   ;;  %s3201_s21 = sphi %s3253_s21, %s4681_s21   ;;  %s3197_s20 = sphi %s3251_s20, %s4680_s20   ;;  %s3193_s19 = sphi %s3249_s19, %s4679_s19   ;;  %s3189_s18 = sphi %s3247_s18, %s4678_s18  }
   0x7   : > { %p42_p0 = scmp.ne.s32.totalorder %s3193_s19, %s3189_s18  ;;  %p4563_p1 = scmp.eq.s32.totalorder %s3268_s22, 0 }
   0x8   : > { %p156_p3 = scmp.eq.s32.totalorder %s2418_s23, 1  ;;  %p2419_p5 = scmp.ge.s32.totalorder %s3201_s21, 1 }
   0x9   : > { %p3277_p4 = por %p4563_p1, %p42_p0  ;;  %p163_p7 = scmp.lt.s32.totalorder %s3201_s21, 3 }
   0xa   : > { %p3282_p6 = por %p156_p3, %p42_p0  ;;  %s3203_s27 = smov [#allocation5]  }
   0xb   : > { %s4595_s24 = scalar_select %p3277_p4, 1, 0 }
   0xc   : > { %s4596_s25 = scalar_select %p3282_p6, 1, 0 }
   0xd   : > { %p3287_p8 = pnand %p2419_p5, %p163_p7  ;;  %s175_s28 = sshll.u32 %s3203_s27, 4  ;;  %s3291_s28 = int_to_ptr.vmem [resolvable:$true] %s175_s28 }
   0xe   : > { %s3204_s30 = smov [#allocation7]   ;;  %s3045_s9 = scalar_lea.hbm %s4558_s1, 4096 }
   0xf   : > { %p2740_p9 = pneg %p3287_p8  ;;  %s191_s6 = sshll.u32 %s3204_s30, 4  ;;  %s3302_s6 = int_to_ptr.vmem [resolvable:$true] %s191_s6 }
  0x10   : > { %p3046_p12 = scmp.ne.s32.totalorder %s4558_s1, %s3045_s9  ;;  %p3052_p5 = scmp.lt.u32.totalorder %s3045_s9, %s4558_s1 }
  0x11   : > { %p3298_p11 = pnand %p2740_p9, %p4563_p1 }
  0x13   : > { %p3047_p13 = pneg %p3298_p11 }
  0x15   : > { %p3048_p0 = pnand %p3047_p13, %p3046_p12 }
  0x17   : > { %p3049_p3 = pneg %p3048_p0 }
  0x19   : > { %p3054_p7 = pnand %p3052_p5, %p3049_p3 }
  0x1b   : > { %3057 = shalt.err (!%p3054_p7)
}
  0x1c   : > { %s3058_s14 = scalar_lea.vmem %s3291_s28, 4096  ;;  %p3066_p2 = scmp.lt.s32.totalorder %s3291_s28, %s3291_s28 }
  0x1d   : > { %p3059_p9 = scmp.ne.s32.totalorder %s3291_s28, %s3058_s14  ;;  %p3067_p12 = scmp.lt.s32.totalorder %s3058_s14, %s3058_s14 }
  0x1f   : > { %p3061_p10 = pnand %p3059_p9, %p3047_p13  ;;  %p3068_p0 = por %p3067_p12, %p3066_p2 }
  0x21   : > { %p3062_p1 = pneg %p3061_p10 }
  0x23   : > { %p3069_p6 = pnand %p3068_p0, %p3062_p1 }
  0x25   : > { %3072 = shalt.err (!%p3069_p6)
}
  0x26   : > { %s3205_s15 = smov 256   ;;  %s3206_s16 = smov 16  }
  0x27   : > { %2743 = dma.hbm_to_vmem [thread:$0]  (!%p3298_p11), %s4558_s1, 4096, %s3291_s28, [#allocation6], %s3205_s15, %s3205_s15, %s3206_s16  }
  0x28   : > { %s3073_s7 = scalar_lea.hbm %s4560_s3, 4096 }
  0x29   : > { %p3074_p2 = scmp.ne.s32.totalorder %s4560_s3, %s3073_s7  ;;  %p3080_p10 = scmp.lt.u32.totalorder %s3073_s7, %s4560_s3 }
  0x2b   : > { %p3076_p1 = pnand %p3074_p2, %p3047_p13 }
  0x2d   : > { %p3077_p6 = pneg %p3076_p1 }
  0x2f   : > { %p3082_p3 = pnand %p3080_p10, %p3077_p6 }
  0x31   : > { %3085 = shalt.err (!%p3082_p3)
}
  0x32   : > { %s3086_s28 = scalar_lea.vmem %s3302_s6, 4096  ;;  %p3094_p12 = scmp.lt.s32.totalorder %s3302_s6, %s3302_s6 }
  0x33   : > { %p3087_p5 = scmp.ne.s32.totalorder %s3302_s6, %s3086_s28  ;;  %p3095_p0 = scmp.lt.s32.totalorder %s3086_s28, %s3086_s28 }
  0x35   : > { %p3089_p7 = pnand %p3087_p5, %p3047_p13  ;;  %p3096_p2 = por %p3095_p0, %p3094_p12 }
  0x37   : > { %p3090_p9 = pneg %p3089_p7 }
  0x39   : > { %p3097_p1 = pnand %p3096_p2, %p3090_p9 }
  0x3b   : > { %3100 = shalt.err (!%p3097_p1)
}
  0x3c   : > { %s3207_s12 = smov 64   ;;  %s3208_s13 = smov 4  }
  0x3d   : > { %2746 = dma.hbm_to_vmem [thread:$0]  (!%p3298_p11), %s4560_s3, 4096, %s3302_s6, [#allocation6], %s3207_s12, %s3207_s12, %s3208_s13  }
  0x3e   : > { %s3357_s16 = sadd.s32 1, %s3201_s21   ;;  %s29_s23 = sadd.s32 1, %s3197_s20 }
  0x3f   : > { %s26_s17 = ssub.s32 %s3201_s21, %s3357_s16  ;;  %p36_p6 = scmp.ne.s32.totalorder %s3197_s20, %s3193_s19 }
  0x40   : > { %p27_p13 = scmp.eq.s32.totalorder %s26_s17, 0  ;;  %p37_p10 = scmp.eq.s32.totalorder %s3201_s21, 0 }
  0x41   : > { %p4599_p5 = scmp.eq.s32.totalorder %s3268_s22, 1  ;;  %p2757_p9 = scmp.lt.s32.totalorder %s3201_s21, 2 }
  0x42   : > { %s3366_s27 = scalar_select %p27_p13, %s3197_s20, %s29_s23  }
  0x43   : > { %p38_p3 = por %p37_p10, %p36_p6  ;;  %p3370_p7 = por %p4599_p5, %p36_p6 }
  0x44   : > { %s208_s29 = sand.u32 1, %s3197_s20   ;;  %s2502_s6 = sshll.u32 %s3201_s21, 12 }
  0x45   : > { %s4600_s30 = scalar_select %p3370_p7, 1, 0 }
  0x46   : > { %s2423_s7 = sshll.u32 %s208_s29, 8  ;;  %s3380_s10 = scalar_lea.hbm %s4557_s0, %s2502_s6 }
  0x47   : > { %s212_s11 = scalar_lea.vmem [#allocation2], %s2423_s7  ;;  %p3384_p11 = pnand %p2757_p9, %p38_p3 }
  0x48   : > { %s219_s28 = sshll.u32 %s212_s11, 4  ;;  %s3388_s13 = scalar_lea.sflag [#allocation3], %s208_s29  ;;  %s3382_s28 = int_to_ptr.vmem [resolvable:$true] %s219_s28 }
  0x49   : > { %s3101_s14 = scalar_lea.hbm %s3380_s10, 4096  ;;  %p3103_p0 = pneg %p3384_p11 }
  0x4a   : > { %p3102_p12 = scmp.ne.s32.totalorder %s3380_s10, %s3101_s14  ;;  %s3106_s23 = scalar_lea.hbm %s4557_s0, 8192 }
  0x4b   : > { %p3107_p13 = scmp.lt.u32.totalorder %s3380_s10, %s4557_s0  ;;  %p3108_p6 = scmp.lt.u32.totalorder %s3106_s23, %s3101_s14 }
  0x4c   : > { %p3104_p2 = pnand %p3103_p0, %p3102_p12  ;;  %p3110_p3 = scmp.lt.u32.totalorder %s3101_s14, %s3380_s10 }
  0x4d   : > { %p3109_p10 = por %p3108_p6, %p3107_p13 }
  0x4e   : > { %p3105_p1 = pneg %p3104_p2 }
  0x4f   : > { %p3111_p5 = por %p3110_p3, %p3109_p10 }
  0x51   : > { %p3112_p9 = pnand %p3111_p5, %p3105_p1 }
  0x53   : > { %3115 = shalt.err (!%p3112_p9)
}
  0x54   : > { %s3116_s29 = scalar_lea.vmem %s3382_s28, 4096  ;;  %s3209_s8 = smov [#allocation2]  }
  0x55   : > { %p3117_p12 = scmp.ne.s32.totalorder %s3382_s28, %s3116_s29  ;;  %s3121_s9 = sshll.u32 %s3209_s8, 4  ;;  %s3122_s9 = int_to_ptr.vmem [resolvable:$false] %s3121_s9 }
  0x56   : > { %s3123_s11 = scalar_lea.vmem %s3122_s9, 8192  ;;  %p3124_p4 = scmp.lt.s32.totalorder %s3382_s28, %s3122_s9 }
  0x57   : > { %p3119_p2 = pnand %p3117_p12, %p3103_p0  ;;  %p3125_p13 = scmp.lt.s32.totalorder %s3123_s11, %s3116_s29 }
  0x59   : > { %p3120_p7 = pneg %p3119_p2  ;;  %p3126_p6 = por %p3125_p13, %p3124_p4 }
  0x5b   : > { %p3127_p10 = pnand %p3126_p6, %p3120_p7 }
  0x5d   : > { %3130 = shalt.err (!%p3127_p10)
}
  0x5e   : > { %s3210_s14 = smov 128   ;;  %s3211_s15 = smov 8  }
  0x5f   : > { %2750 = dma.hbm_to_vmem [thread:$0]  (!%p3384_p11), %s3380_s10, 4096, %s3382_s28, %s3388_s13, %s3210_s14, %s3210_s14, %s3211_s15  }
  0x60   : > { %231 = sbr.rel (%p3287_p8) target bundleno = 801 (0x321), region = 40 }
  0x67   : > { %s3419_s17 = sand.u32 1, %s3193_s19   ;;  %p4602_p4 = scmp.ne.s32.totalorder %s4595_s24, 0 }
  0x68   : > { %s2427_s23 = sshll.u32 %s3419_s17, 8  ;;  %s234_s7 = scalar_lea.sflag [#allocation3], %s3419_s17 }
  0x69   : > { %s3425_s6 = scalar_lea.vmem [#allocation2], %s2427_s23 }
  0x6a   : > { %3176 = dma.done.wait (%p4602_p4), %s234_s7, 4096  }
  0x6b   : > { %3178 = vsyncadd (%p4602_p4), %s234_s7, 4294963200  ;;  %p4603_p7 = scmp.eq.s32.totalorder %s3268_s22, 0 }
  0x6d   : > { %3180 = dma.done.wait (%p4603_p7), [#allocation6], 8192   ;;  %p4604_p8 = pmov %p4603_p7 }
  0x6e   : > { %v3212_v0 = vmov 0   ;;  %v2805_v1 = vld [vmem:[#allocation5 + $0x4] ss:$16 sps:$4 sm:$0xff]   ;;  %v2807_v2 = vld [vmem:[#allocation5 + $0xc] ss:$16 sps:$4 sm:$0xff]   ;;  %s4411_s12 = scalar_lea.vmem [#allocation8], %s2427_s23 }
  0x6f   : > { %3182 = vsyncadd (%p4604_p8), [#allocation6], 4294959104  ;;  %551 = vmatprep.mubr.bf16.mxu0 %v3212_v0  ;;  %744 = vmatprep.mubr.bf16.mxu1 %v3212_v0  ;;  %v2809_v3 = vld [vmem:[#allocation5] ss:$16 sps:$4 sm:$0xff]   ;;  %v2810_v4 = vld [vmem:[#allocation5 + $0x8] ss:$16 sps:$4 sm:$0xff]  }
  0x70   : > { %519 = vmatprep.subr.bf16.mxu0 %v2805_v1  ;;  %712 = vmatprep.subr.bf16.mxu1 %v2807_v2  ;;  %v2811_v5 = vld [vmem:[#allocation5 + $0x24] ss:$16 sps:$4 sm:$0xff]   ;;  %v2813_v6 = vld [vmem:[#allocation5 + $0x2c] ss:$16 sps:$4 sm:$0xff]   ;;  %v2815_v7 = vld [vmem:[#allocation5 + $0x20] ss:$16 sps:$4 sm:$0xff]  }
  0x71   : > { %520 = vmatpush1.bf16.msra.mxu0 %v2809_v3  ;;  %713 = vmatpush1.bf16.msra.mxu1 %v2810_v4  ;;  %v2816_v8 = vld [vmem:[#allocation5 + $0x28] ss:$16 sps:$4 sm:$0xff]   ;;  %v2817_v9 = vld [vmem:[#allocation5 + $0x44] ss:$16 sps:$4 sm:$0xff]   ;;  %v2819_v10 = vld [vmem:[#allocation5 + $0x4c] ss:$16 sps:$4 sm:$0xff]  }
  0x72   : > { %521 = vmatprep.subr.bf16.mxu0 %v2811_v5  ;;  %714 = vmatprep.subr.bf16.mxu1 %v2813_v6  ;;  %v2821_v11 = vld [vmem:[#allocation5 + $0x40] ss:$16 sps:$4 sm:$0xff]   ;;  %v2822_v12 = vld [vmem:[#allocation5 + $0x48] ss:$16 sps:$4 sm:$0xff]   ;;  %v2823_v13 = vld [vmem:[#allocation5 + $0x64] ss:$16 sps:$4 sm:$0xff]  }
  0x73   : > { %v2825_v14 = vld [vmem:[#allocation5 + $0x6c] ss:$16 sps:$4 sm:$0xff]   ;;  %v2827_v15 = vld [vmem:[#allocation5 + $0x60] ss:$16 sps:$4 sm:$0xff]   ;;  %v2828_v16 = vld [vmem:[#allocation5 + $0x68] ss:$16 sps:$4 sm:$0xff]  }
  0x74   : > { %v2829_v17 = vld [vmem:[#allocation5 + $0x84] ss:$16 sps:$4 sm:$0xff]   ;;  %v2831_v18 = vld [vmem:[#allocation5 + $0x8c] ss:$16 sps:$4 sm:$0xff]   ;;  %v2833_v19 = vld [vmem:[#allocation5 + $0x80] ss:$16 sps:$4 sm:$0xff]  }
  0x75   : > { %522 = vmatpush1.bf16.msra.mxu0 %v2815_v7  ;;  %715 = vmatpush1.bf16.msra.mxu1 %v2816_v8  ;;  %v2834_v20 = vld [vmem:[#allocation5 + $0x88] ss:$16 sps:$4 sm:$0xff]   ;;  %v2835_v21 = vld [vmem:[#allocation5 + $0xa4] ss:$16 sps:$4 sm:$0xff]   ;;  %v2837_v22 = vld [vmem:[#allocation5 + $0xac] ss:$16 sps:$4 sm:$0xff]  }
  0x76   : > { %523 = vmatprep.subr.bf16.mxu0 %v2817_v9  ;;  %716 = vmatprep.subr.bf16.mxu1 %v2819_v10  ;;  %v2839_v23 = vld [vmem:[#allocation5 + $0xa0] ss:$16 sps:$4 sm:$0xff]   ;;  %v2840_v24 = vld [vmem:[#allocation5 + $0xa8] ss:$16 sps:$4 sm:$0xff]   ;;  %v2841_v25 = vld [vmem:[#allocation5 + $0xc4] ss:$16 sps:$4 sm:$0xff]  }
  0x77   : > { %v2843_v26 = vld [vmem:[#allocation5 + $0xcc] ss:$16 sps:$4 sm:$0xff]   ;;  %v2845_v27 = vld [vmem:[#allocation5 + $0xc0] ss:$16 sps:$4 sm:$0xff]   ;;  %v2846_v28 = vld [vmem:[#allocation5 + $0xc8] ss:$16 sps:$4 sm:$0xff]  }
  0x78   : > { %v2847_v29 = vld [vmem:[#allocation5 + $0xe4] ss:$16 sps:$4 sm:$0xff]   ;;  %v2849_v30 = vld [vmem:[#allocation5 + $0xec] ss:$16 sps:$4 sm:$0xff]   ;;  %v2851_v31 = vld [vmem:[#allocation5 + $0xe0] ss:$16 sps:$4 sm:$0xff]  }
  0x79   : > { %524 = vmatpush1.bf16.msra.mxu0 %v2821_v11  ;;  %717 = vmatpush1.bf16.msra.mxu1 %v2822_v12  ;;  %v2852_v32 = vld [vmem:[#allocation5 + $0xe8] ss:$16 sps:$4 sm:$0xff]   ;;  %v279_v33 = vld [vmem:[%s3425_s6] sm:$0xff]  ;;  %v281_v38 = vld [vmem:[%s3425_s6 + $0x10] sm:$0xff]  ;;  %s2503_s13 = sshll.u32 %s3268_s22, 12  ;;  %s2326_s29 = sshll.u32 %s4411_s12, 4  ;;  %s4510_s29 = int_to_ptr.vmem [resolvable:$true] %s2326_s29 }
  0x7a   : > { %525 = vmatprep.subr.bf16.mxu0 %v2823_v13  ;;  %718 = vmatprep.subr.bf16.mxu1 %v2825_v14  ;;  %v280_v34 = vld [vmem:[%s3425_s6 + $0x8] sm:$0xff]  ;;  %v2853_v36 = vld [vmem:[#allocation7 + $0x40] sm:$0xff]   ;;  %v282_v39 = vld [vmem:[%s3425_s6 + $0x18] sm:$0xff]  ;;  %s4508_s11 = scalar_lea.hbm %s4562_s5, %s2503_s13  ;;  %s2313_s14 = scalar_lea.sflag [#allocation4], %s3419_s17 }
  0x7b   : > { %v311_v35 = vpack.c.bf16 %v280_v34, %v279_v33  ;;  %v2854_v37 = vld [vmem:[#allocation7] sm:$0xff]   ;;  %v2857_v42 = vld [vmem:[#allocation7 + $0x48] sm:$0xff]   ;;  %v312_v45 = vpack.c.bf16 %v282_v39, %v281_v38  ;;  %v2861_v47 = vld [vmem:[#allocation7 + $0x50] sm:$0xff]   ;;  %s3131_s22 = scalar_lea.vmem %s4510_s29, 4096  ;;  %p4675_p0 = scmp.ne.s32.totalorder %s4600_s30, 0 }
  0x7c   : > { %v2855_v40 = vld [vmem:[#allocation7 + $0xc0] sm:$0xff]   ;;  %v2858_v43 = vld [vmem:[#allocation7 + $0x8] sm:$0xff]   ;;  %v2862_v48 = vld [vmem:[#allocation7 + $0x10] sm:$0xff]   ;;  %p3132_p11 = scmp.ne.s32.totalorder %s4510_s29, %s3131_s22  ;;  %s3214_s15 = smov [#allocation8]  }
  0x7d   : > { %526 = vmatpush1.bf16.msra.mxu0 %v2827_v15  ;;  %719 = vmatpush1.bf16.msra.mxu1 %v2828_v16  ;;  %v2856_v41 = vld [vmem:[#allocation7 + $0x80] sm:$0xff]   ;;  %v2859_v44 = vld [vmem:[#allocation7 + $0xc8] sm:$0xff]   ;;  %v2863_v51 = vld [vmem:[#allocation7 + $0xd0] sm:$0xff]   ;;  %s3135_s23 = sshll.u32 %s3214_s15, 4  ;;  %s3136_s23 = int_to_ptr.vmem [resolvable:$false] %s3135_s23 }
  0x7e   : > { %527 = vmatprep.subr.bf16.mxu0 %v2829_v17  ;;  %720 = vmatprep.subr.bf16.mxu1 %v2831_v18  ;;  %v2860_v46 = vld [vmem:[#allocation7 + $0x88] sm:$0xff]   ;;  %v283_v49 = vld [vmem:[%s3425_s6 + $0x20] sm:$0xff]  ;;  %v2864_v52 = vld [vmem:[#allocation7 + $0x90] sm:$0xff]   ;;  %p3133_p1 = pnand %p3132_p11, %p4675_p0  ;;  %s3137_s7 = scalar_lea.vmem %s3136_s23, 8192 }
  0x7f   : > { %v284_v50 = vld [vmem:[%s3425_s6 + $0x28] sm:$0xff]  ;;  %v2865_v53 = vld [vmem:[#allocation7 + $0x58] sm:$0xff]   ;;  %v2869_v58 = vld [vmem:[#allocation7 + $0x60] sm:$0xff]   ;;  %p3138_p5 = scmp.lt.s32.totalorder %s4510_s29, %s3136_s23  ;;  %p3139_p9 = scmp.lt.s32.totalorder %s3137_s7, %s3131_s22 }
  0x80   : > { %v2866_v54 = vld [vmem:[#allocation7 + $0x18] sm:$0xff]   ;;  %v313_v56 = vpack.c.bf16 %v284_v50, %v283_v49  ;;  %v2870_v59 = vld [vmem:[#allocation7 + $0x20] sm:$0xff]   ;;  %v285_v60 = vld [vmem:[%s3425_s6 + $0x30] sm:$0xff]  ;;  %v3213_v50 = vmov 1966171168   ;;  %p3134_p3 = pneg %p3133_p1 }
  0x81   : > { %528 = vmatpush1.bf16.msra.mxu0 %v2833_v19  ;;  %721 = vmatpush1.bf16.msra.mxu1 %v2834_v20  ;;  %v2867_v55 = vld [vmem:[#allocation7 + $0xd8] sm:$0xff]   ;;  %v2871_v62 = vld [vmem:[#allocation7 + $0xe0] sm:$0xff]   ;;  %v2873_v1 = vld [vmem:[#allocation7 + $0x68] sm:$0xff]   ;;  %p3140_p12 = por %p3139_p9, %p3138_p5 }
  0x82   : > { %529 = vmatprep.subr.bf16.mxu0 %v2835_v21  ;;  %722 = vmatprep.subr.bf16.mxu1 %v2837_v22  ;;  %v2868_v57 = vld [vmem:[#allocation7 + $0x98] sm:$0xff]   ;;  %v2872_v63 = vld [vmem:[#allocation7 + $0xa0] sm:$0xff]   ;;  %v2874_v2 = vld [vmem:[#allocation7 + $0x28] sm:$0xff]  }
  0x83   : > { %v286_v61 = vld [vmem:[%s3425_s6 + $0x38] sm:$0xff]  ;;  %v2875_v3 = vld [vmem:[#allocation7 + $0xe8] sm:$0xff]   ;;  %v287_v6 = vld [vmem:[%s3425_s6 + $0x40] sm:$0xff]  ;;  %p3141_p2 = pnand %p3140_p12, %p3134_p3 }
  0x84   : > { %v314_v4 = vpack.c.bf16 %v286_v61, %v285_v60  ;;  %v2876_v5 = vld [vmem:[#allocation7 + $0xa8] sm:$0xff]   ;;  %v289_v9 = vld [vmem:[%s3425_s6 + $0x50] sm:$0xff]  ;;  %v290_v10 = vld [vmem:[%s3425_s6 + $0x58] sm:$0xff] }
  0x85   : > { %530 = vmatpush1.bf16.msra.mxu0 %v2839_v23  ;;  %723 = vmatpush1.bf16.msra.mxu1 %v2840_v24  ;;  %v288_v7 = vld [vmem:[%s3425_s6 + $0x48] sm:$0xff]  ;;  %v316_v11 = vpack.c.bf16 %v290_v10, %v289_v9  ;;  %v291_v12 = vld [vmem:[%s3425_s6 + $0x60] sm:$0xff]  ;;  %v293_v15 = vld [vmem:[%s3425_s6 + $0x70] sm:$0xff] }
  0x86   : > { %531 = vmatprep.subr.bf16.mxu0 %v2841_v25  ;;  %724 = vmatprep.subr.bf16.mxu1 %v2843_v26  ;;  %v315_v8 = vpack.c.bf16 %v288_v7, %v287_v6  ;;  %v292_v13 = vld [vmem:[%s3425_s6 + $0x68] sm:$0xff]  ;;  %v294_v16 = vld [vmem:[%s3425_s6 + $0x78] sm:$0xff]  ;;  %v295_v18 = vld [vmem:[%s3425_s6 + $0x80] sm:$0xff] }
  0x87   : > { %v317_v14 = vpack.c.bf16 %v292_v13, %v291_v12  ;;  %v318_v17 = vpack.c.bf16 %v294_v16, %v293_v15  ;;  %v296_v19 = vld [vmem:[%s3425_s6 + $0x88] sm:$0xff]  ;;  %v297_v21 = vld [vmem:[%s3425_s6 + $0x90] sm:$0xff]  ;;  %v298_v22 = vld [vmem:[%s3425_s6 + $0x98] sm:$0xff] }
  0x88   : > { %v319_v20 = vpack.c.bf16 %v296_v19, %v295_v18  ;;  %v320_v23 = vpack.c.bf16 %v298_v22, %v297_v21  ;;  %v299_v24 = vld [vmem:[%s3425_s6 + $0xa0] sm:$0xff]  ;;  %v300_v25 = vld [vmem:[%s3425_s6 + $0xa8] sm:$0xff]  ;;  %v305_v33 = vld [vmem:[%s3425_s6 + $0xd0] sm:$0xff] }
  0x89   : > { %532 = vmatpush1.bf16.msra.mxu0 %v2845_v27  ;;  %725 = vmatpush1.bf16.msra.mxu1 %v2846_v28  ;;  %v321_v26 = vpack.c.bf16 %v300_v25, %v299_v24  ;;  %v301_v27 = vld [vmem:[%s3425_s6 + $0xb0] sm:$0xff]  ;;  %v302_v28 = vld [vmem:[%s3425_s6 + $0xb8] sm:$0xff] }
  0x8a   : > { %533 = vmatprep.subr.bf16.mxu0 %v2847_v29  ;;  %726 = vmatprep.subr.bf16.mxu1 %v2849_v30  ;;  %v322_v29 = vpack.c.bf16 %v302_v28, %v301_v27  ;;  %v303_v30 = vld [vmem:[%s3425_s6 + $0xc0] sm:$0xff]  ;;  %v306_v34 = vld [vmem:[%s3425_s6 + $0xd8] sm:$0xff]  ;;  %v2877_v39 = vld [vmem:[#allocation7 + $0x70] sm:$0xff]  }
  0x8b   : > { %v2884_v49 = vld [vmem:[#allocation7 + $0xb8] sm:$0xff]  }
  0x8d   : > { %534 = vmatpush1.bf16.msra.mxu0 %v2851_v31  ;;  %727 = vmatpush1.bf16.msra.mxu1 %v2852_v32  ;;  %v304_v31 = vld [vmem:[%s3425_s6 + $0xc8] sm:$0xff] }
  0x8e   : > { %2504 = vmatprep.subr.bf16.mxu0 %v2853_v36  ;;  %2616 = vmatprep.subr.bf16.mxu1 %v2855_v40  ;;  %v323_v32 = vpack.c.bf16 %v304_v31, %v303_v30  ;;  %v307_v36 = vld [vmem:[%s3425_s6 + $0xe0] sm:$0xff]  ;;  %v2879_v40 = vld [vmem:[#allocation7 + $0xf0] sm:$0xff]  }
  0x90   : > { %552 = vmatmul.mubr.bf16.vlgmr.msra.gmra.mrb[0].mxu0 %v311_v35  ;;  %745 = vmatmul.mubr.bf16.vlgmr.msra.gmra.mrb[0].mxu1 %v311_v35  ;;  %v324_v35 = vpack.c.bf16 %v306_v34, %v305_v33 }
  0x91   : > { %561 = vmatprep.mubr.bf16.mxu0 %v3212_v0  ;;  %754 = vmatprep.mubr.bf16.mxu1 %v3212_v0 }
  0x92   : > { %2505 = vmatpush3.bf16.msra.mxu0 %v2854_v37  ;;  %2617 = vmatpush3.bf16.msra.mxu1 %v2856_v41  ;;  %v308_v37 = vld [vmem:[%s3425_s6 + $0xe8] sm:$0xff]  ;;  %v2878_v41 = vld [vmem:[#allocation7 + $0x30] sm:$0xff]  }
  0x93   : > { %2506 = vmatprep.subr.bf16.mxu0 %v2857_v42  ;;  %2618 = vmatprep.subr.bf16.mxu1 %v2859_v44  ;;  %v325_v38 = vpack.c.bf16 %v308_v37, %v307_v36  ;;  %v2880_v42 = vld [vmem:[#allocation7 + $0xb0] sm:$0xff]   ;;  %v310_v44 = vld [vmem:[%s3425_s6 + $0xf8] sm:$0xff] }
  0x96   : > { %2507 = vmatpush3.bf16.msra.mxu0 %v2858_v43  ;;  %2619 = vmatpush3.bf16.msra.mxu1 %v2860_v46  ;;  %v309_v43 = vld [vmem:[%s3425_s6 + $0xf0] sm:$0xff]  ;;  %v2883_v46 = vld [vmem:[#allocation7 + $0xf8] sm:$0xff]  }
  0x97   : > { %2508 = vmatprep.subr.bf16.mxu0 %v2861_v47  ;;  %2620 = vmatprep.subr.bf16.mxu1 %v2863_v51  ;;  %v326_v47 = vpack.c.bf16 %v310_v44, %v309_v43  ;;  %v980_v51 = vunpack.c.l.s4 %v3213_v50 }
  0x98   : > { %562 = vmatmul.mubr.bf16.gmra.mrb[4].mxu0 %v312_v45  ;;  %755 = vmatmul.mubr.bf16.gmra.mrb[4].mxu1 %v312_v45  ;;  %v2881_v45 = vld [vmem:[#allocation7 + $0x78] sm:$0xff]  }
  0x99   : > { %571 = vmatprep.mubr.bf16.mxu0 %v3212_v0  ;;  %764 = vmatprep.mubr.bf16.mxu1 %v3212_v0 }
  0x9a   : > { %2509 = vmatpush3.bf16.msra.mxu0 %v2862_v48  ;;  %2621 = vmatpush3.bf16.msra.mxu1 %v2864_v52  ;;  %v2882_v48 = vld [vmem:[#allocation7 + $0x38] sm:$0xff]   ;;  %v981_v52 = vunpack.c.0.s8 %v980_v51 }
  0x9b   : > { %2510 = vmatprep.subr.bf16.mxu0 %v2865_v53  ;;  %2622 = vmatprep.subr.bf16.mxu1 %v2867_v55 }
  0x9e   : > { %2511 = vmatpush3.bf16.msra.mxu0 %v2866_v54  ;;  %2623 = vmatpush3.bf16.msra.mxu1 %v2868_v57  ;;  %v2463_v54 = vld.sshfl [vmem:[%s4559_s2] sm:$0x33 pattern:$0x75316420] }
  0x9f   : > { %2512 = vmatprep.subr.bf16.mxu0 %v2869_v58  ;;  %2624 = vmatprep.subr.bf16.mxu1 %v2871_v62 }
  0xa0   : > { %572 = vmatmul.mubr.bf16.gmra.mrb[8].mxu0 %v313_v56  ;;  %765 = vmatmul.mubr.bf16.gmra.mrb[8].mxu1 %v313_v56  ;;  %v978_v56 = vcombine.high %v2463_v54, %v2463_v54 }
  0xa1   : > { %581 = vmatprep.mubr.bf16.mxu0 %v3212_v0  ;;  %774 = vmatprep.mubr.bf16.mxu1 %v3212_v0 }
  0xa2   : > { %2513 = vmatpush3.bf16.msra.mxu0 %v2870_v59  ;;  %2625 = vmatpush3.bf16.msra.mxu1 %v2872_v63 }
  0xa3   : > { %2514 = vmatprep.subr.bf16.mxu0 %v2873_v1  ;;  %2626 = vmatprep.subr.bf16.mxu1 %v2875_v3 }
  0xa6   : > { %2515 = vmatpush3.bf16.msra.mxu0 %v2874_v2  ;;  %2627 = vmatpush3.bf16.msra.mxu1 %v2876_v5 }
  0xa7   : > { %2516 = vmatprep.subr.bf16.mxu0 %v2877_v39  ;;  %2628 = vmatprep.subr.bf16.mxu1 %v2879_v40 }
  0xa8   : > { %582 = vmatmul.mubr.bf16.gmra.mrb[12].mxu0 %v314_v4  ;;  %775 = vmatmul.mubr.bf16.gmra.mrb[12].mxu1 %v314_v4 }
  0xa9   : > { %591 = vmatprep.mubr.bf16.mxu0 %v3212_v0  ;;  %784 = vmatprep.mubr.bf16.mxu1 %v3212_v0 }
  0xaa   : > { %2517 = vmatpush3.bf16.msra.mxu0 %v2878_v41  ;;  %2629 = vmatpush3.bf16.msra.mxu1 %v2880_v42 }
  0xab   : > { %2518 = vmatprep.subr.bf16.mxu0 %v2881_v45  ;;  %2630 = vmatprep.subr.bf16.mxu1 %v2883_v46 }
  0xae   : > { %2519 = vmatpush3.bf16.msra.mxu0 %v2882_v48  ;;  %2631 = vmatpush3.bf16.msra.mxu1 %v2884_v49 }
  0xb0   : > { %592 = vmatmul.mubr.bf16.gmra.mrb[16].mxu0 %v315_v8  ;;  %785 = vmatmul.mubr.bf16.gmra.mrb[16].mxu1 %v315_v8 }
  0xb1   : > { %601 = vmatprep.mubr.bf16.mxu0 %v3212_v0  ;;  %794 = vmatprep.mubr.bf16.mxu1 %v3212_v0 }
  0xb8   : > { %602 = vmatmul.mubr.bf16.gmra.mrb[20].mxu0 %v316_v11  ;;  %795 = vmatmul.mubr.bf16.gmra.mrb[20].mxu1 %v316_v11 }
  0xb9   : > { %611 = vmatprep.mubr.bf16.mxu0 %v3212_v0  ;;  %804 = vmatprep.mubr.bf16.mxu1 %v3212_v0 }
  0xc0   : > { %612 = vmatmul.mubr.bf16.gmra.mrb[24].mxu0 %v317_v14  ;;  %805 = vmatmul.mubr.bf16.gmra.mrb[24].mxu1 %v317_v14 }
  0xc1   : > { %621 = vmatprep.mubr.bf16.mxu0 %v3212_v0  ;;  %814 = vmatprep.mubr.bf16.mxu1 %v3212_v0 }
  0xc8   : > { %622 = vmatmul.mubr.bf16.gmra.mrb[28].mxu0 %v318_v17  ;;  %815 = vmatmul.mubr.bf16.gmra.mrb[28].mxu1 %v318_v17 }
  0xc9   : > { %631 = vmatprep.mubr.bf16.mxu0 %v3212_v0  ;;  %824 = vmatprep.mubr.bf16.mxu1 %v3212_v0 }
  0xd0   : > { %632 = vmatmul.mubr.bf16.gmra.mrb[32].mxu0 %v319_v20  ;;  %825 = vmatmul.mubr.bf16.gmra.mrb[32].mxu1 %v319_v20 }
  0xd1   : > { %641 = vmatprep.mubr.bf16.mxu0 %v3212_v0  ;;  %834 = vmatprep.mubr.bf16.mxu1 %v3212_v0 }
  0xd8   : > { %642 = vmatmul.mubr.bf16.gmra.mrb[36].mxu0 %v320_v23  ;;  %835 = vmatmul.mubr.bf16.gmra.mrb[36].mxu1 %v320_v23 }
  0xd9   : > { %651 = vmatprep.mubr.bf16.mxu0 %v3212_v0  ;;  %844 = vmatprep.mubr.bf16.mxu1 %v3212_v0 }
  0xe0   : > { %652 = vmatmul.mubr.bf16.gmra.mrb[40].mxu0 %v321_v26  ;;  %845 = vmatmul.mubr.bf16.gmra.mrb[40].mxu1 %v321_v26 }
  0xe1   : > { %661 = vmatprep.mubr.bf16.mxu0 %v3212_v0  ;;  %854 = vmatprep.mubr.bf16.mxu1 %v3212_v0 }
  0xe8   : > { %662 = vmatmul.mubr.bf16.gmra.mrb[44].mxu0 %v322_v29  ;;  %855 = vmatmul.mubr.bf16.gmra.mrb[44].mxu1 %v322_v29 }
  0xe9   : > { %671 = vmatprep.mubr.bf16.mxu0 %v3212_v0  ;;  %864 = vmatprep.mubr.bf16.mxu1 %v3212_v0 }
  0xf0   : > { %672 = vmatmul.mubr.bf16.gmra.mrb[48].mxu0 %v323_v32  ;;  %865 = vmatmul.mubr.bf16.gmra.mrb[48].mxu1 %v323_v32 }
  0xf1   : > { %681 = vmatprep.mubr.bf16.mxu0 %v3212_v0  ;;  %874 = vmatprep.mubr.bf16.mxu1 %v3212_v0 }
  0xf8   : > { %682 = vmatmul.mubr.bf16.gmra.mrb[52].mxu0 %v324_v35  ;;  %875 = vmatmul.mubr.bf16.gmra.mrb[52].mxu1 %v324_v35 }
  0xf9   : > { %691 = vmatprep.mubr.bf16.mxu0 %v3212_v0  ;;  %884 = vmatprep.mubr.bf16.mxu1 %v3212_v0 }
 0x100   : > { %692 = vmatmul.mubr.bf16.gmra.mrb[56].mxu0 %v325_v38  ;;  %885 = vmatmul.mubr.bf16.gmra.mrb[56].mxu1 %v325_v38 }
 0x101   : > { %701 = vmatprep.mubr.bf16.mxu0 %v3212_v0  ;;  %894 = vmatprep.mubr.bf16.mxu1 %v3212_v0  ;;  %v982_v0 = vlaneseq }
 0x103   : > { %v983_v53 = vshrl.u32 %v982_v0, 7 }
 0x105   : > { %v984_v55 = vsub.s32 %v981_v52, %v983_v53  ;;  %v1000_v62 = vsub.s32 0, %v983_v53 }
 0x107   : > { %v985_v57 = vrot.slane %v2463_v54, %v984_v55  ;;  %v992_v58 = vrot.slane %v978_v56, %v984_v55 }
 0x108   : > { %702 = vmatmul.mubr.bf16.gmra.mrb[60].mxu0 %v326_v47  ;;  %895 = vmatmul.mubr.bf16.gmra.mrb[60].mxu1 %v326_v47 }
 0x109   : > { %v993_v59 = vcombine.high %v985_v57, %v985_v57  ;;  %v994_v60 = vcombine.high %v992_v58, %v992_v58  ;;  %v996_v61 = vpack.i.b16 %v985_v57, %v985_v57  ;;  %v1003_v1 = vpack.i.b16 %v992_v58, %v992_v58 }
 0x10b   : > { %v1010_v63 = vpack.i.b16 %v993_v59, %v993_v59  ;;  %v1017_v2 = vpack.i.b16 %v994_v60, %v994_v60  ;;  %v3502_v7 = vrot.slane %v996_v61, %v1000_v62  ;;  %v3506_v11 = vrot.slane %v1003_v1, %v1000_v62 }
 0x10d   : > { %v3504_v8 = vrot.slane %v1010_v63, %v1000_v62  ;;  %v3508_v12 = vrot.slane %v1017_v2, %v1000_v62 }
 0x163   : > { %v553_v3 = vpop.f32.mrb[0].mxu0  ;;  %v746_v4 = vpop.f32.mrb[0].mxu1 }
 0x164   : > { %v555_v5 = vpop.f32.mrb[1].mxu0  ;;  %v748_v6 = vpop.f32.mrb[1].mxu1 }
 0x165   : > { %v557_v9 = vpop.f32.mrb[2].mxu0  ;;  %v750_v10 = vpop.f32.mrb[2].mxu1 }
 0x166   : > { %v905_v13 = vpack.c.bf16 %v557_v9, %v553_v3  ;;  %v907_v14 = vpack.c.bf16 %v750_v10, %v746_v4  ;;  %v559_v15 = vpop.f32.mrb[3].mxu0  ;;  %v752_v16 = vpop.f32.mrb[3].mxu1 }
 0x167   : > { %v906_v17 = vpack.c.bf16 %v559_v15, %v555_v5  ;;  %v908_v18 = vpack.c.bf16 %v752_v16, %v748_v6 }
 0x168   : > { %v3511_v19 = vadd.bf16 %v3502_v7, %v905_v13  ;;  %v3514_v20 = vadd.bf16 %v3504_v8, %v907_v14 }
 0x169   : > { %v3517_v21 = vadd.bf16 %v3506_v11, %v906_v17  ;;  %v3520_v22 = vadd.bf16 %v3508_v12, %v908_v18 }
 0x16a   : > { %v1087_v23 = vmul.bf16 %v3511_v19, %v3511_v19  ;;  %v1089_v24 = vmul.bf16 %v3514_v20, %v3514_v20 }
 0x16b   : > { %v1088_v25 = vmul.bf16 %v3517_v21, %v3517_v21  ;;  %v1090_v26 = vmul.bf16 %v3520_v22, %v3520_v22  ;;  %v563_v27 = vpop.f32.mrb[4].mxu0  ;;  %v756_v28 = vpop.f32.mrb[4].mxu1 }
 0x16c   : > { %v1151_v29 = vmul.bf16 %v1087_v23, %v3511_v19  ;;  %v1153_v30 = vmul.bf16 %v1089_v24, %v3514_v20  ;;  %v565_v31 = vpop.f32.mrb[5].mxu0  ;;  %v758_v32 = vpop.f32.mrb[5].mxu1 }
 0x16d   : > { %v1152_v33 = vmul.bf16 %v1088_v25, %v3517_v21  ;;  %v1154_v34 = vmul.bf16 %v1090_v26, %v3520_v22  ;;  %v567_v35 = vpop.f32.mrb[6].mxu0  ;;  %v760_v36 = vpop.f32.mrb[6].mxu1 }
 0x16e   : > { %v1215_v37 = vmul.bf16 1027030327, %v1151_v29  ;;  %v1217_v38 = vmul.bf16 1027030327, %v1153_v30  ;;  %v909_v39 = vpack.c.bf16 %v567_v35, %v563_v27  ;;  %v911_v40 = vpack.c.bf16 %v760_v36, %v756_v28  ;;  %v569_v41 = vpop.f32.mrb[7].mxu0  ;;  %v762_v42 = vpop.f32.mrb[7].mxu1 }
 0x16f   : > { %v1216_v43 = vmul.bf16 1027030327, %v1152_v33  ;;  %v1218_v44 = vmul.bf16 1027030327, %v1154_v34  ;;  %v910_v45 = vpack.c.bf16 %v569_v41, %v565_v31  ;;  %v912_v46 = vpack.c.bf16 %v762_v42, %v758_v32 }
 0x170   : > { %v1279_v47 = vadd.bf16 %v1215_v37, %v3511_v19  ;;  %v1281_v48 = vadd.bf16 %v1217_v38, %v3514_v20  ;;  %v3537_v49 = vadd.bf16 %v3502_v7, %v909_v39  ;;  %v3540_v50 = vadd.bf16 %v3504_v8, %v911_v40 }
 0x171   : > { %v3543_v51 = vadd.bf16 %v3506_v11, %v910_v45  ;;  %v3546_v0 = vadd.bf16 %v3508_v12, %v912_v46  ;;  %v1280_v52 = vadd.bf16 %v1216_v43, %v3517_v21  ;;  %v1282_v53 = vadd.bf16 %v1218_v44, %v3520_v22 }
 0x172   : > { %v1343_v54 = vmul.bf16 1061961548, %v1279_v47  ;;  %v1345_v55 = vmul.bf16 1061961548, %v1281_v48  ;;  %v1091_v56 = vmul.bf16 %v3537_v49, %v3537_v49  ;;  %v1093_v57 = vmul.bf16 %v3540_v50, %v3540_v50 }
 0x173   : > { %v1092_v58 = vmul.bf16 %v3543_v51, %v3543_v51  ;;  %v1094_v59 = vmul.bf16 %v3546_v0, %v3546_v0  ;;  %v573_v60 = vpop.f32.mrb[8].mxu0  ;;  %v766_v61 = vpop.f32.mrb[8].mxu1  ;;  %v1344_v3 = vmul.bf16 1061961548, %v1280_v52  ;;  %v1346_v10 = vmul.bf16 1061961548, %v1282_v53 }
 0x174   : > { %2885 = vtanh.bf16 %v1343_v54  ;;  %v1155_v62 = vmul.bf16 %v1091_v56, %v3537_v49  ;;  %v1157_v63 = vmul.bf16 %v1093_v57, %v3540_v50  ;;  %v575_v1 = vpop.f32.mrb[9].mxu0  ;;  %v768_v2 = vpop.f32.mrb[9].mxu1 }
 0x175   : > { %2887 = vtanh.bf16 %v1345_v55  ;;  %v1156_v4 = vmul.bf16 %v1092_v58, %v3543_v51  ;;  %v1158_v5 = vmul.bf16 %v1094_v59, %v3546_v0  ;;  %v577_v6 = vpop.f32.mrb[10].mxu0  ;;  %v770_v9 = vpop.f32.mrb[10].mxu1 }
 0x176   : > { %v1219_v13 = vmul.bf16 1027030327, %v1155_v62  ;;  %v1221_v14 = vmul.bf16 1027030327, %v1157_v63  ;;  %v913_v15 = vpack.c.bf16 %v577_v6, %v573_v60  ;;  %v915_v16 = vpack.c.bf16 %v770_v9, %v766_v61  ;;  %v579_v17 = vpop.f32.mrb[11].mxu0  ;;  %v772_v18 = vpop.f32.mrb[11].mxu1 }
 0x177   : > { %v1220_v23 = vmul.bf16 1027030327, %v1156_v4  ;;  %v1222_v24 = vmul.bf16 1027030327, %v1158_v5  ;;  %v914_v25 = vpack.c.bf16 %v579_v17, %v575_v1  ;;  %v916_v26 = vpack.c.bf16 %v772_v18, %v768_v2 }
 0x178   : > { %v3563_v27 = vadd.bf16 %v3502_v7, %v913_v15  ;;  %v3566_v28 = vadd.bf16 %v3504_v8, %v915_v16  ;;  %2889 = vtanh.bf16 %v1344_v3  ;;  %v1283_v29 = vadd.bf16 %v1219_v13, %v3537_v49 }
 0x179   : > { %v3570_v30 = vadd.bf16 %v3506_v11, %v914_v25  ;;  %v3573_v31 = vadd.bf16 %v3508_v12, %v916_v26  ;;  %2891 = vtanh.bf16 %v1346_v10  ;;  %v1284_v32 = vadd.bf16 %v1220_v23, %v3543_v51 }
 0x17a   : > { %v1095_v33 = vmul.bf16 %v3563_v27, %v3563_v27  ;;  %v1097_v34 = vmul.bf16 %v3566_v28, %v3566_v28  ;;  %v1286_v35 = vadd.bf16 %v1222_v24, %v3546_v0  ;;  %v1347_v36 = vmul.bf16 1061961548, %v1283_v29 }
 0x17b   : > { %v1096_v37 = vmul.bf16 %v3570_v30, %v3570_v30  ;;  %v1098_v38 = vmul.bf16 %v3573_v31, %v3573_v31  ;;  %v583_v39 = vpop.f32.mrb[12].mxu0  ;;  %v776_v40 = vpop.f32.mrb[12].mxu1  ;;  %v1348_v41 = vmul.bf16 1061961548, %v1284_v32  ;;  %v1285_v42 = vadd.bf16 %v1221_v14, %v3540_v50 }
 0x17c   : > { %v3587_v43 = vmul.bf16 %v1095_v33, %v3563_v27  ;;  %v585_v44 = vpop.f32.mrb[13].mxu0  ;;  %v778_v45 = vpop.f32.mrb[13].mxu1  ;;  %v1350_v46 = vmul.bf16 1061961548, %v1286_v35  ;;  %2893 = vtanh.bf16 %v1347_v36  ;;  %v3593_v56 = vmul.bf16 %v1097_v34, %v3566_v28 }
 0x17d   : > { %v1160_v47 = vmul.bf16 %v1096_v37, %v3570_v30  ;;  %v1162_v48 = vmul.bf16 %v1098_v38, %v3573_v31  ;;  %v587_v52 = vpop.f32.mrb[14].mxu0  ;;  %v780_v53 = vpop.f32.mrb[14].mxu1  ;;  %2895 = vtanh.bf16 %v1348_v41  ;;  %v1349_v54 = vmul.bf16 1061961548, %v1285_v42 }
 0x17e   : > { %v1223_v55 = vmul.bf16 1027030327, %v3587_v43  ;;  %v917_v57 = vpack.c.bf16 %v587_v52, %v583_v39  ;;  %v919_v58 = vpack.c.bf16 %v780_v53, %v776_v40  ;;  %v589_v59 = vpop.f32.mrb[15].mxu0  ;;  %v782_v60 = vpop.f32.mrb[15].mxu1  ;;  %2897 = vtanh.bf16 %v1350_v46 }
 0x17f   : > { %v2886_v61 = vpop.eup %2885  ;;  %v1224_v62 = vmul.bf16 1027030327, %v1160_v47  ;;  %v1226_v63 = vmul.bf16 1027030327, %v1162_v48  ;;  %v918_v1 = vpack.c.bf16 %v589_v59, %v585_v44  ;;  %v920_v2 = vpack.c.bf16 %v782_v60, %v778_v45 }
 0x180   : > { %v2888_v3 = vpop.eup %2887  ;;  %v1471_v4 = vadd.bf16 1065369472, %v2886_v61  ;;  %v3596_v5 = vadd.bf16 %v3502_v7, %v917_v57  ;;  %v3599_v6 = vadd.bf16 %v3504_v8, %v919_v58  ;;  %2899 = vtanh.bf16 %v1349_v54 }
 0x181   : > { %v1473_v9 = vadd.bf16 1065369472, %v2888_v3  ;;  %v3602_v10 = vadd.bf16 %v3506_v11, %v918_v1  ;;  %v3605_v13 = vadd.bf16 %v3508_v12, %v920_v2  ;;  %v1225_v15 = vmul.bf16 1027030327, %v3593_v56 }
 0x182   : > { %v3607_v14 = vmul.bf16 1056980736, %v1471_v4  ;;  %v1099_v16 = vmul.bf16 %v3596_v5, %v3596_v5  ;;  %v1101_v17 = vmul.bf16 %v3599_v6, %v3599_v6  ;;  %v3619_v32 = vadd.bf16 %v1224_v62, %v3570_v30 }
 0x183   : > { %v2890_v18 = vpop.eup %2889  ;;  %v1537_v23 = vmul.bf16 1056980736, %v1473_v9  ;;  %v1100_v24 = vmul.bf16 %v3602_v10, %v3602_v10  ;;  %v1102_v25 = vmul.bf16 %v3605_v13, %v3605_v13  ;;  %v593_v26 = vpop.f32.mrb[16].mxu0  ;;  %v3628_v39 = vadd.bf16 %v1226_v63, %v3573_v31 }
 0x184   : > { %v786_v29 = vpop.f32.mrb[16].mxu1  ;;  %v2892_v33 = vpop.eup %2891  ;;  %v3622_v34 = vmul.bf16 %v1099_v16, %v3596_v5  ;;  %v3625_v35 = vmul.bf16 %v1101_v17, %v3599_v6  ;;  %v1472_v38 = vadd.bf16 1065369472, %v2890_v18  ;;  %v1599_v40 = vmul.bf16 %v3607_v14, %v3511_v19 }
 0x185   : > { %v595_v36 = vpop.f32.mrb[17].mxu0  ;;  %v788_v37 = vpop.f32.mrb[17].mxu1  ;;  %v1601_v41 = vmul.bf16 %v1537_v23, %v3514_v20  ;;  %v3634_v42 = vmul.bf16 %v1100_v24, %v3602_v10  ;;  %v1474_v46 = vadd.bf16 1065369472, %v2892_v33  ;;  %v3638_v48 = vmul.bf16 %v1102_v25, %v3605_v13 }
 0x186   : > { %v597_v44 = vpop.f32.mrb[18].mxu0  ;;  %v790_v45 = vpop.f32.mrb[18].mxu1  ;;  %v1227_v47 = vmul.bf16 1027030327, %v3622_v34  ;;  %v1229_v19 = vmul.bf16 1027030327, %v3625_v35 }
 0x187   : > { %v921_v52 = vpack.c.bf16 %v597_v44, %v593_v26  ;;  %v923_v53 = vpack.c.bf16 %v790_v45, %v786_v29  ;;  %v599_v54 = vpop.f32.mrb[19].mxu0  ;;  %v792_v57 = vpop.f32.mrb[19].mxu1  ;;  %v1228_v20 = vmul.bf16 1027030327, %v3634_v42  ;;  %v1536_v1 = vmul.bf16 1056980736, %v1472_v38 }
 0x188   : > { %v2894_v58 = vpop.eup %2893  ;;  %v922_v59 = vpack.c.bf16 %v599_v54, %v595_v36  ;;  %v924_v60 = vpack.c.bf16 %v792_v57, %v788_v37  ;;  %v1538_v2 = vmul.bf16 1056980736, %v1474_v46  ;;  %v1230_v25 = vmul.bf16 1027030327, %v3638_v48 }
 0x189   : > { %v2896_v61 = vpop.eup %2895  ;;  %v3643_v62 = vadd.bf16 %v3502_v7, %v921_v52  ;;  %v3646_v63 = vadd.bf16 %v3504_v8, %v923_v53  ;;  %v1475_v14 = vadd.bf16 1065369472, %v2894_v58  ;;  %v1600_v18 = vmul.bf16 %v1536_v1, %v3517_v21 }
 0x18a   : > { %v3649_v3 = vadd.bf16 %v3506_v11, %v922_v59  ;;  %v3652_v4 = vadd.bf16 %v3508_v12, %v924_v60  ;;  %v1476_v9 = vadd.bf16 1065369472, %v2896_v61  ;;  %v1602_v23 = vmul.bf16 %v1538_v2, %v3520_v22  ;;  %v2898_v24 = vpop.eup %2897 }
 0x18b   : > { %v1103_v16 = vmul.bf16 %v3643_v62, %v3643_v62  ;;  %v1105_v17 = vmul.bf16 %v3646_v63, %v3646_v63  ;;  %v603_v33 = vpop.f32.mrb[20].mxu0  ;;  %v796_v36 = vpop.f32.mrb[20].mxu1  ;;  %1958 = vmatprep.mubr.bf16.mxu0 %v1600_v18  ;;  %v1478_v46 = vadd.bf16 1065369472, %v2898_v24  ;;  %v1539_v52 = vmul.bf16 1056980736, %v1475_v14 }
 0x18c   : > { %v1104_v26 = vmul.bf16 %v3649_v3, %v3649_v3  ;;  %v1106_v29 = vmul.bf16 %v3652_v4, %v3652_v4  ;;  %v1540_v37 = vmul.bf16 1056980736, %v1476_v9  ;;  %v2900_v38 = vpop.eup %2899  ;;  %2119 = vmatprep.mubr.bf16.mxu1 %v1602_v23  ;;  %v605_v22 = vpop.f32.mrb[21].mxu0  ;;  %1959 = vmatmul.mubr.bf16.vlgmr.msra.gmra.mrb[64].mxu0 %v1599_v40  ;;  %v1352_v60 = vmul.bf16 1061961548, %v3619_v32 }
 0x18d   : > { %v3666_v44 = vmul.bf16 %v1103_v16, %v3643_v62  ;;  %v3669_v21 = vmul.bf16 %v1105_v17, %v3646_v63  ;;  %v798_v45 = vpop.f32.mrb[21].mxu1  ;;  %2120 = vmatmul.mubr.bf16.vlgmr.msra.gmra.mrb[64].mxu1 %v1601_v41  ;;  %v607_v54 = vpop.f32.mrb[22].mxu0  ;;  %v1477_v59 = vadd.bf16 1065369472, %v2900_v38  ;;  %v1542_v23 = vmul.bf16 1056980736, %v1478_v46 }
 0x18e   : > { %v3672_v53 = vmul.bf16 %v1104_v26, %v3649_v3  ;;  %v800_v57 = vpop.f32.mrb[22].mxu1  ;;  %v1604_v58 = vmul.bf16 %v1540_v37, %v3543_v51  ;;  %v3678_v1 = vmul.bf16 %v1106_v29, %v3652_v4  ;;  %v925_v2 = vpack.c.bf16 %v607_v54, %v603_v33  ;;  %v609_v14 = vpop.f32.mrb[23].mxu0 }
 0x18f   : > { %v927_v9 = vpack.c.bf16 %v800_v57, %v796_v36  ;;  %v802_v16 = vpop.f32.mrb[23].mxu1  ;;  %v926_v41 = vpack.c.bf16 %v609_v14, %v605_v22  ;;  %v1603_v24 = vmul.bf16 %v1539_v52, %v3537_v49  ;;  %v1541_v33 = vmul.bf16 1056980736, %v1477_v59 }
 0x190   : > { %v1232_v40 = vmul.bf16 1027030327, %v3672_v53  ;;  %v928_v18 = vpack.c.bf16 %v802_v16, %v798_v45  ;;  %1966 = vmatprep.mubr.bf16.mxu0 %v1604_v58  ;;  %v3683_v51 = vadd.bf16 %v3502_v7, %v925_v2  ;;  %2901 = vtanh.bf16 %v1352_v60 }
 0x191   : > { %v3686_v32 = vadd.bf16 %v3504_v8, %v927_v9  ;;  %v3690_v26 = vadd.bf16 %v3506_v11, %v926_v41  ;;  %v1606_v38 = vmul.bf16 %v1542_v23, %v3546_v0  ;;  %v1354_v22 = vmul.bf16 1061961548, %v3628_v39 }
 0x192   : > { %v3693_v29 = vadd.bf16 %v3508_v12, %v928_v18  ;;  %v1107_v36 = vmul.bf16 %v3683_v51, %v3683_v51  ;;  %v1605_v46 = vmul.bf16 %v1541_v33, %v3540_v50  ;;  %v1287_v57 = vadd.bf16 %v1223_v55, %v3563_v27 }
 0x193   : > { %v1109_v37 = vmul.bf16 %v3686_v32, %v3686_v32  ;;  %v1108_v49 = vmul.bf16 %v3690_v26, %v3690_v26  ;;  %v613_v52 = vpop.f32.mrb[24].mxu0  ;;  %v806_v54 = vpop.f32.mrb[24].mxu1  ;;  %2127 = vmatprep.mubr.bf16.mxu1 %v1606_v38  ;;  %2903 = vtanh.bf16 %v1354_v22  ;;  %v1289_v50 = vadd.bf16 %v1225_v15, %v3566_v28 }
 0x194   : > { %v1110_v45 = vmul.bf16 %v3693_v29, %v3693_v29  ;;  %v3710_v58 = vmul.bf16 %v1107_v36, %v3683_v51  ;;  %v615_v39 = vpop.f32.mrb[25].mxu0  ;;  %v808_v59 = vpop.f32.mrb[25].mxu1  ;;  %v1234_v60 = vmul.bf16 1027030327, %v3678_v1  ;;  %1967 = vmatmul.mubr.bf16.gmra.mrb[68].mxu0 %v1603_v24  ;;  %v1351_v9 = vmul.bf16 1061961548, %v1287_v57 }
 0x195   : > { %v3713_v0 = vmul.bf16 %v1109_v37, %v3686_v32  ;;  %v3720_v2 = vmul.bf16 %v1108_v49, %v3690_v26  ;;  %2128 = vmatmul.mubr.bf16.gmra.mrb[68].mxu1 %v1605_v46  ;;  %v617_v43 = vpop.f32.mrb[26].mxu0  ;;  %v810_v55 = vpop.f32.mrb[26].mxu1  ;;  %v1292_v14 = vadd.bf16 %v1228_v20, %v3602_v10  ;;  %v1353_v20 = vmul.bf16 1061961548, %v1289_v50 }
 0x196   : > { %v3727_v41 = vmul.bf16 %v1110_v45, %v3693_v29  ;;  %v929_v56 = vpack.c.bf16 %v617_v43, %v613_v52  ;;  %v931_v15 = vpack.c.bf16 %v810_v55, %v806_v54  ;;  %v619_v18 = vpop.f32.mrb[27].mxu0  ;;  %v812_v23 = vpop.f32.mrb[27].mxu1  ;;  %2905 = vtanh.bf16 %v1351_v9 }
 0x197   : > { %v930_v36 = vpack.c.bf16 %v619_v18, %v615_v39  ;;  %v932_v37 = vpack.c.bf16 %v812_v23, %v808_v59  ;;  %v1356_v45 = vmul.bf16 1061961548, %v1292_v14  ;;  %v1294_v46 = vadd.bf16 %v1230_v25, %v3605_v13 }
 0x198   : > { %v3732_v38 = vadd.bf16 %v3502_v7, %v929_v56  ;;  %v3735_v42 = vadd.bf16 %v3504_v8, %v931_v15  ;;  %2907 = vtanh.bf16 %v1353_v20  ;;  %v1291_v57 = vadd.bf16 %v1227_v47, %v3596_v5 }
 0x199   : > { %v3738_v22 = vadd.bf16 %v3506_v11, %v930_v36  ;;  %v3741_v49 = vadd.bf16 %v3508_v12, %v932_v37  ;;  %2909 = vtanh.bf16 %v1356_v45  ;;  %v1358_v25 = vmul.bf16 1061961548, %v1294_v46 }
 0x19a   : > { %v1111_v52 = vmul.bf16 %v3732_v38, %v3732_v38  ;;  %v1113_v54 = vmul.bf16 %v3735_v42, %v3735_v42  ;;  %v1355_v56 = vmul.bf16 1061961548, %v1291_v57  ;;  %v1293_v37 = vadd.bf16 %v1229_v19, %v3599_v6 }
 0x19b   : > { %v1112_v39 = vmul.bf16 %v3738_v22, %v3738_v22  ;;  %v1114_v59 = vmul.bf16 %v3741_v49, %v3741_v49  ;;  %v623_v50 = vpop.f32.mrb[28].mxu0  ;;  %v816_v48 = vpop.f32.mrb[28].mxu1  ;;  %2911 = vtanh.bf16 %v1358_v25 }
 0x19c   : > { %v2902_v43 = vpop.eup %2901  ;;  %v3759_v9 = vmul.bf16 %v1111_v52, %v3732_v38  ;;  %v3762_v14 = vmul.bf16 %v1113_v54, %v3735_v42  ;;  %v625_v34 = vpop.f32.mrb[29].mxu0  ;;  %2913 = vtanh.bf16 %v1355_v56  ;;  %v1298_v56 = vadd.bf16 %v1234_v60, %v3652_v4 }
 0x19d   : > { %v818_v47 = vpop.f32.mrb[29].mxu1  ;;  %v3765_v15 = vmul.bf16 %v1112_v39, %v3738_v22  ;;  %v1480_v18 = vadd.bf16 1065369472, %v2902_v43  ;;  %v627_v23 = vpop.f32.mrb[30].mxu0  ;;  %v3772_v45 = vmul.bf16 %v1114_v59, %v3741_v49 }
 0x19e   : > { %v820_v36 = vpop.f32.mrb[30].mxu1  ;;  %v933_v46 = vpack.c.bf16 %v627_v23, %v623_v50  ;;  %v629_v54 = vpop.f32.mrb[31].mxu0  ;;  %v1357_v23 = vmul.bf16 1061961548, %v1293_v37 }
 0x19f   : > { %v935_v52 = vpack.c.bf16 %v820_v36, %v816_v48  ;;  %v822_v57 = vpop.f32.mrb[31].mxu1  ;;  %v2904_v33 = vpop.eup %2903  ;;  %v1544_v16 = vmul.bf16 1056980736, %v1480_v18  ;;  %v934_v25 = vpack.c.bf16 %v629_v54, %v625_v34 }
 0x1a0   : > { %v1482_v55 = vadd.bf16 1065369472, %v2904_v33  ;;  %v3777_v35 = vadd.bf16 %v3502_v7, %v933_v46  ;;  %v936_v59 = vpack.c.bf16 %v822_v57, %v818_v47  ;;  %2915 = vtanh.bf16 %v1357_v23 }
 0x1a1   : > { %v3780_v19 = vadd.bf16 %v3504_v8, %v935_v52  ;;  %v1608_v50 = vmul.bf16 %v1544_v16, %v3570_v30  ;;  %v3784_v48 = vadd.bf16 %v3506_v11, %v934_v25  ;;  %v2906_v46 = vpop.eup %2905 }
 0x1a2   : > { %v1546_v36 = vmul.bf16 1056980736, %v1482_v55  ;;  %v1115_v18 = vmul.bf16 %v3777_v35, %v3777_v35  ;;  %v3791_v34 = vadd.bf16 %v3508_v12, %v936_v59  ;;  %v1296_v55 = vadd.bf16 %v1232_v40, %v3649_v3 }
 0x1a3   : > { %4605 = vst [vmem:[#allocation12_spill] sm:$0xff] %v3780_v19  ;;  %v1117_v33 = vmul.bf16 %v3780_v19, %v3780_v19  ;;  %1974 = vmatprep.mubr.bf16.mxu0 %v1608_v50  ;;  %v1116_v30 = vmul.bf16 %v3784_v48, %v3784_v48  ;;  %v633_v16 = vpop.f32.mrb[32].mxu0  ;;  %v826_v47 = vpop.f32.mrb[32].mxu1  ;;  %v1479_v52 = vadd.bf16 1065369472, %v2906_v46 }
 0x1a4   : > { %v1610_v37 = vmul.bf16 %v1546_v36, %v3573_v31  ;;  %v3803_v54 = vmul.bf16 %v1115_v18, %v3777_v35  ;;  %v635_v25 = vpop.f32.mrb[33].mxu0  ;;  %v828_v59 = vpop.f32.mrb[33].mxu1  ;;  %v1118_v53 = vmul.bf16 %v3791_v34, %v3791_v34  ;;  %v1360_v60 = vmul.bf16 1061961548, %v1296_v55 }
 0x1a5   : > { %v3806_v57 = vmul.bf16 %v1117_v33, %v3780_v19  ;;  %v2908_v50 = vpop.eup %2907  ;;  %v637_v40 = vpop.f32.mrb[34].mxu0  ;;  %v1543_v31 = vmul.bf16 1056980736, %v1479_v52  ;;  %v1362_v46 = vmul.bf16 1061961548, %v1298_v56  ;;  %v3814_v43 = vmul.bf16 %v1116_v30, %v3784_v48 }
 0x1a6   : > { %v830_v1 = vpop.f32.mrb[34].mxu1  ;;  %v2910_v39 = vpop.eup %2909  ;;  %2135 = vmatprep.mubr.bf16.mxu1 %v1610_v37  ;;  %v1481_v36 = vadd.bf16 1065369472, %v2908_v50  ;;  %v937_v18 = vpack.c.bf16 %v637_v40, %v633_v16  ;;  %v3821_v16 = vmul.bf16 %v1118_v53, %v3791_v34  ;;  %2917 = vtanh.bf16 %v1360_v60 }
 0x1a7   : > { %4606 = vst [vmem:[#allocation13_spill] sm:$0xff] %v3806_v57  ;;  %v1484_v23 = vadd.bf16 1065369472, %v2910_v39  ;;  %v2912_v24 = vpop.eup %2911  ;;  %v1607_v17 = vmul.bf16 %v1543_v31, %v3563_v27  ;;  %v939_v37 = vpack.c.bf16 %v830_v1, %v826_v47  ;;  %v639_v52 = vpop.f32.mrb[35].mxu0  ;;  %2919 = vtanh.bf16 %v1362_v46 }
 0x1a8   : > { %v1545_v61 = vmul.bf16 1056980736, %v1481_v36  ;;  %v3818_v55 = vadd.bf16 %v3502_v7, %v937_v18  ;;  %v832_v50 = vpop.f32.mrb[35].mxu1  ;;  %v1486_v40 = vadd.bf16 1065369472, %v2912_v24  ;;  %v938_v20 = vpack.c.bf16 %v639_v52, %v635_v25  ;;  %v2914_v25 = vpop.eup %2913 }
 0x1a9   : > { %v1548_v56 = vmul.bf16 1056980736, %v1484_v23  ;;  %1975 = vmatmul.mubr.bf16.gmra.mrb[72].mxu0 %v1607_v17  ;;  %v3827_v27 = vadd.bf16 %v3504_v8, %v939_v37  ;;  %v940_v31 = vpack.c.bf16 %v832_v50, %v828_v59  ;;  %v1483_v53 = vadd.bf16 1065369472, %v2914_v25 }
 0x1aa   : > { %4607 = vst [vmem:[#allocation14_spill] sm:$0xff] %v3818_v55  ;;  %v1609_v30 = vmul.bf16 %v1545_v61, %v3566_v28  ;;  %v1119_v39 = vmul.bf16 %v3818_v55, %v3818_v55  ;;  %v1550_v1 = vmul.bf16 1056980736, %v1486_v40  ;;  %v3831_v36 = vadd.bf16 %v3506_v11, %v938_v20 }
 0x1ab   : > { %v1612_v47 = vmul.bf16 %v1548_v56, %v3602_v10  ;;  %v643_v23 = vpop.f32.mrb[36].mxu0  ;;  %v836_v24 = vpop.f32.mrb[36].mxu1  ;;  %v1121_v61 = vmul.bf16 %v3827_v27, %v3827_v27  ;;  %v3839_v17 = vadd.bf16 %v3508_v12, %v940_v31  ;;  %v4608_v18 = vmul.bf16 1027030327, %v3666_v44 }
 0x1ac   : > { %2136 = vmatmul.mubr.bf16.gmra.mrb[72].mxu1 %v1609_v30  ;;  %v3834_v28 = vmul.bf16 %v1119_v39, %v3818_v55  ;;  %v645_v10 = vpop.f32.mrb[37].mxu0  ;;  %v838_v59 = vpop.f32.mrb[37].mxu1  ;;  %v1614_v20 = vmul.bf16 %v1550_v1, %v3605_v13  ;;  %v1120_v60 = vmul.bf16 %v3831_v36, %v3831_v36  ;;  %v4609_v13 = vmul.bf16 1027030327, %v3669_v21 }
 0x1ad   : > { %1982 = vmatprep.mubr.bf16.mxu0 %v1612_v47  ;;  %v1295_v37 = vadd.bf16 %v4608_v18, %v3643_v62  ;;  %v647_v52 = vpop.f32.mrb[38].mxu0  ;;  %v840_v50 = vpop.f32.mrb[38].mxu1  ;;  %v1122_v30 = vmul.bf16 %v3839_v17, %v3839_v17  ;;  %v1547_v1 = vmul.bf16 1056980736, %v1483_v53  ;;  %v3856_v33 = vmul.bf16 %v1121_v61, %v3827_v27 }
 0x1ae   : > { %v2916_v56 = vpop.eup %2915  ;;  %v1297_v39 = vadd.bf16 %v4609_v13, %v3646_v63  ;;  %v649_v31 = vpop.f32.mrb[39].mxu0  ;;  %2143 = vmatprep.mubr.bf16.mxu1 %v1614_v20  ;;  %v941_v46 = vpack.c.bf16 %v647_v52, %v643_v23  ;;  %v3860_v19 = vmul.bf16 %v1120_v60, %v3831_v36  ;;  %v943_v53 = vpack.c.bf16 %v840_v50, %v836_v24 }
 0x1af   : > { %v842_v47 = vpop.f32.mrb[39].mxu1  ;;  %v1485_v44 = vadd.bf16 1065369472, %v2916_v56  ;;  %v1359_v25 = vmul.bf16 1061961548, %v1295_v37  ;;  %v1611_v55 = vmul.bf16 %v1547_v1, %v3596_v5  ;;  %v3863_v21 = vmul.bf16 %v1122_v30, %v3839_v17 }
 0x1b0   : > { %v1361_v40 = vmul.bf16 1061961548, %v1297_v39  ;;  %v3866_v20 = vadd.bf16 %v3502_v7, %v941_v46  ;;  %v942_v37 = vpack.c.bf16 %v649_v31, %v645_v10  ;;  %v944_v23 = vpack.c.bf16 %v842_v47, %v838_v59 }
 0x1b1   : > { %v1549_v57 = vmul.bf16 1056980736, %v1485_v44  ;;  %2921 = vtanh.bf16 %v1359_v25  ;;  %1983 = vmatmul.mubr.bf16.gmra.mrb[76].mxu0 %v1611_v55  ;;  %v4611_v5 = vmul.bf16 1027030327, %v3720_v2  ;;  %v4612_v24 = vmul.bf16 1027030327, %v3727_v41  ;;  %v2918_v47 = vpop.eup %2917 }
 0x1b2   : > { %2923 = vtanh.bf16 %v1361_v40  ;;  %4610 = vst [vmem:[#allocation15_spill] sm:$0xff] %v3866_v20  ;;  %v1123_v30 = vmul.bf16 %v3866_v20, %v3866_v20  ;;  %v3875_v40 = vadd.bf16 %v3504_v8, %v943_v53  ;;  %v3886_v2 = vadd.bf16 %v3506_v11, %v942_v37  ;;  %v2920_v37 = vpop.eup %2919 }
 0x1b3   : > { %v1613_v61 = vmul.bf16 %v1549_v57, %v3599_v6  ;;  %v1300_v52 = vadd.bf16 %v4611_v5, %v3690_v26  ;;  %v653_v60 = vpop.f32.mrb[40].mxu0  ;;  %v846_v56 = vpop.f32.mrb[40].mxu1  ;;  %v1302_v55 = vadd.bf16 %v4612_v24, %v3693_v29  ;;  %v4613_v6 = vmul.bf16 1027030327, %v3710_v58 }
 0x1b4   : > { %v655_v10 = vpop.f32.mrb[41].mxu0  ;;  %v3883_v59 = vpop.f32.mrb[41].mxu1  ;;  %v3889_v50 = vadd.bf16 %v3508_v12, %v944_v23  ;;  %v4614_v13 = vmul.bf16 1027030327, %v3713_v0  ;;  %v3895_v58 = vmul.bf16 %v1123_v30, %v3866_v20  ;;  %v1125_v1 = vmul.bf16 %v3875_v40, %v3875_v40 }
 0x1b5   : > { %v1299_v57 = vadd.bf16 %v4613_v6, %v3683_v51  ;;  %2144 = vmatmul.mubr.bf16.gmra.mrb[76].mxu1 %v1613_v61  ;;  %v1364_v46 = vmul.bf16 1061961548, %v1300_v52  ;;  %v657_v39 = vpop.f32.mrb[42].mxu0  ;;  %v850_v31 = vpop.f32.mrb[42].mxu1  ;;  %v1366_v44 = vmul.bf16 1061961548, %v1302_v55  ;;  %v1124_v5 = vmul.bf16 %v3886_v2, %v3886_v2 }
 0x1b6   : > { %v1301_v41 = vadd.bf16 %v4614_v13, %v3686_v32  ;;  %v659_v53 = vpop.f32.mrb[43].mxu0  ;;  %v852_v61 = vpop.f32.mrb[43].mxu1  ;;  %v1488_v23 = vadd.bf16 1065369472, %v2918_v47  ;;  %v1126_v0 = vmul.bf16 %v3889_v50, %v3889_v50  ;;  %v1490_v24 = vadd.bf16 1065369472, %v2920_v37 }
 0x1b7   : > { %v1363_v25 = vmul.bf16 1061961548, %v1299_v57  ;;  %2925 = vtanh.bf16 %v1364_v46  ;;  %v3908_v47 = vmul.bf16 %v1125_v1, %v3875_v40  ;;  %v945_v20 = vpack.c.bf16 %v657_v39, %v653_v60 }
 0x1b8   : > { %2927 = vtanh.bf16 %v1366_v44  ;;  %v1552_v6 = vmul.bf16 1056980736, %v1488_v23  ;;  %v1554_v13 = vmul.bf16 1056980736, %v1490_v24  ;;  %v1365_v18 = vmul.bf16 1061961548, %v1301_v41 }
 0x1b9   : > { %2929 = vtanh.bf16 %v1363_v25  ;;  %v3912_v52 = vmul.bf16 %v1124_v5, %v3886_v2  ;;  %v3915_v37 = vmul.bf16 %v1126_v0, %v3889_v50  ;;  %v947_v44 = vpack.c.bf16 %v850_v31, %v846_v56 }
 0x1ba   : > { %v1616_v46 = vmul.bf16 %v1552_v6, %v3649_v3  ;;  %v1618_v24 = vmul.bf16 %v1554_v13, %v3652_v4  ;;  %2931 = vtanh.bf16 %v1365_v18  ;;  %v3923_v41 = vadd.bf16 %v3502_v7, %v945_v20 }
 0x1bb   : > { %v3917_v55 = vpop.f32.mrb[44].mxu0  ;;  %v3919_v23 = vpop.f32.mrb[44].mxu1  ;;  %v946_v60 = vpack.c.bf16 %v659_v53, %v655_v10  ;;  %v3930_v56 = vadd.bf16 %v3504_v8, %v947_v44  ;;  %v948_v31 = vpack.c.bf16 %v852_v61, %v3883_v59  ;;  %v4617_v4 = vmul.bf16 1027030327, %v3765_v15 }
 0x1bc   : > { %v2922_v25 = vpop.eup %2921  ;;  %4615 = vst [vmem:[#allocation16_spill] sm:$0xff] %v3923_v41  ;;  %v3925_v3 = vpop.f32.mrb[45].mxu0  ;;  %1990 = vmatprep.mubr.bf16.mxu0 %v1616_v46  ;;  %2151 = vmatprep.mubr.bf16.mxu1 %v1618_v24  ;;  %v1127_v53 = vmul.bf16 %v3923_v41, %v3923_v41  ;;  %v4619_v13 = vmul.bf16 1027030327, %v3772_v45 }
 0x1bd   : > { %v3927_v39 = vpop.f32.mrb[45].mxu1  ;;  %v2924_v1 = vpop.eup %2923  ;;  %v1487_v5 = vadd.bf16 1065369472, %v2922_v25  ;;  %4616 = vst [vmem:[#allocation17_spill] sm:$0xff] %v3930_v56  ;;  %v1304_v18 = vadd.bf16 %v4617_v4, %v3738_v22  ;;  %v3939_v6 = vadd.bf16 %v3506_v11, %v946_v60  ;;  %v1129_v15 = vmul.bf16 %v3930_v56, %v3930_v56 }
 0x1be   : > { %v667_v0 = vpop.f32.mrb[46].mxu0  ;;  %v860_v20 = vpop.f32.mrb[46].mxu1  ;;  %v1489_v10 = vadd.bf16 1065369472, %v2924_v1  ;;  %v1306_v46 = vadd.bf16 %v4619_v13, %v3741_v49  ;;  %v3949_v25 = vadd.bf16 %v3508_v12, %v948_v31  ;;  %v3952_v4 = vmul.bf16 %v1127_v53, %v3923_v41 }
 0x1bf   : > { %4618 = vst [vmem:[#allocation18_spill] sm:$0xff] %v3939_v6  ;;  %v669_v44 = vpop.f32.mrb[47].mxu0  ;;  %v3944_v59 = vpop.f32.mrb[47].mxu1  ;;  %v1551_v61 = vmul.bf16 1056980736, %v1487_v5  ;;  %v1128_v60 = vmul.bf16 %v3939_v6, %v3939_v6 }
 0x1c0   : > { %v1368_v24 = vmul.bf16 1061961548, %v1304_v18  ;;  %v1553_v1 = vmul.bf16 1056980736, %v1489_v10  ;;  %4620 = vst [vmem:[#allocation19_spill] sm:$0xff] %v3952_v4  ;;  %v1130_v5 = vmul.bf16 %v3949_v25, %v3949_v25 }
 0x1c1   : > { %v1370_v45 = vmul.bf16 1061961548, %v1306_v46  ;;  %v1615_v13 = vmul.bf16 %v1551_v61, %v3643_v62  ;;  %v3965_v62 = vmul.bf16 %v1129_v15, %v3930_v56  ;;  %v4622_v61 = vmul.bf16 1027030327, %v3759_v9 }
 0x1c2   : > { %2933 = vtanh.bf16 %v1368_v24  ;;  %v2926_v30 = vpop.eup %2925  ;;  %v1617_v31 = vmul.bf16 %v1553_v1, %v3646_v63  ;;  %v949_v15 = vpack.c.bf16 %v667_v0, %v3917_v55  ;;  %v3986_v56 = vmul.bf16 %v1130_v5, %v3949_v25 }
 0x1c3   : > { %2935 = vtanh.bf16 %v1370_v45  ;;  %v2928_v53 = vpop.eup %2927  ;;  %1991 = vmatmul.mubr.bf16.gmra.mrb[80].mxu0 %v1615_v13  ;;  %v1492_v41 = vadd.bf16 1065369472, %v2926_v30  ;;  %4621 = vst [vmem:[#allocation20_spill] sm:$0xff] %v3965_v62  ;;  %v1303_v24 = vadd.bf16 %v4622_v61, %v3732_v38  ;;  %v3970_v57 = vpop.f32.mrb[48].mxu0  ;;  %v3975_v45 = vmul.bf16 %v1128_v60, %v3939_v6 }
 0x1c4   : > { %v3972_v63 = vpop.f32.mrb[48].mxu1  ;;  %v2930_v1 = vpop.eup %2929  ;;  %2152 = vmatmul.mubr.bf16.gmra.mrb[80].mxu1 %v1617_v31  ;;  %v1494_v10 = vadd.bf16 1065369472, %v2928_v53  ;;  %v4623_v30 = vmul.bf16 1027030327, %v3762_v14  ;;  %v951_v31 = vpack.c.bf16 %v860_v20, %v3919_v23  ;;  %v3990_v6 = vadd.bf16 %v3502_v7, %v949_v15 }
 0x1c5   : > { %v3981_v46 = vpop.f32.mrb[49].mxu0  ;;  %v3983_v9 = vpop.f32.mrb[49].mxu1  ;;  %v1556_v61 = vmul.bf16 1056980736, %v1492_v41  ;;  %v1491_v18 = vadd.bf16 1065369472, %v2930_v1  ;;  %v950_v41 = vpack.c.bf16 %v669_v44, %v3925_v3  ;;  %v952_v15 = vpack.c.bf16 %v3944_v59, %v3927_v39 }
 0x1c6   : > { %v1305_v13 = vadd.bf16 %v4623_v30, %v3735_v42  ;;  %v1558_v53 = vmul.bf16 1056980736, %v1494_v10  ;;  %v1367_v60 = vmul.bf16 1061961548, %v1303_v24  ;;  %4624 = vst [vmem:[#allocation21_spill] sm:$0xff] %v3990_v6  ;;  %v2932_v14 = vpop.eup %2931  ;;  %v3994_v30 = vadd.bf16 %v3504_v8, %v951_v31  ;;  %v677_v1 = vpop.f32.mrb[50].mxu0 }
 0x1c7   : > { %v1620_v55 = vmul.bf16 %v1556_v61, %v3690_v26  ;;  %v1555_v0 = vmul.bf16 1056980736, %v1491_v18  ;;  %v3997_v5 = vpop.f32.mrb[50].mxu1  ;;  %v1493_v20 = vadd.bf16 1065369472, %v2932_v14  ;;  %v1131_v10 = vmul.bf16 %v3990_v6, %v3990_v6  ;;  %v679_v24 = vpop.f32.mrb[51].mxu0 }
 0x1c8   : > { %v1369_v4 = vmul.bf16 1061961548, %v1305_v13  ;;  %4625 = vst [vmem:[#allocation22_spill] sm:$0xff] %v3994_v30  ;;  %v1622_v23 = vmul.bf16 %v1558_v53, %v3693_v29  ;;  %2937 = vtanh.bf16 %v1367_v60  ;;  %v4002_v13 = vpop.f32.mrb[51].mxu1  ;;  %v1133_v3 = vmul.bf16 %v3994_v30, %v3994_v30 }
 0x1c9   : > { %1998 = vmatprep.mubr.bf16.mxu0 %v1620_v55  ;;  %v1619_v26 = vmul.bf16 %v1555_v0, %v3683_v51  ;;  %v4008_v44 = vadd.bf16 %v3506_v11, %v950_v41  ;;  %v1557_v29 = vmul.bf16 1056980736, %v1493_v20  ;;  %v4626_v61 = vmul.bf16 1027030327, %v3814_v43 }
 0x1ca   : > { %2939 = vtanh.bf16 %v1369_v4  ;;  %2159 = vmatprep.mubr.bf16.mxu1 %v1622_v23  ;;  %v4018_v4 = vmul.bf16 %v1131_v10, %v3990_v6  ;;  %v4628_v53 = vmul.bf16 1027030327, %v3821_v16  ;;  %v4629_v14 = vmul.bf16 1027030327, %v3803_v54 }
 0x1cb   : > { %v1308_v31 = vadd.bf16 %v4626_v61, %v3784_v48  ;;  %1999 = vmatmul.mubr.bf16.gmra.mrb[84].mxu0 %v1619_v26  ;;  %v4026_v0 = vpop.f32.mrb[52].mxu0  ;;  %v4028_v39 = vpop.f32.mrb[52].mxu1  ;;  %v1621_v59 = vmul.bf16 %v1557_v29, %v3686_v32  ;;  %v1132_v41 = vmul.bf16 %v4008_v44, %v4008_v44  ;;  %v4034_v23 = vadd.bf16 %v3508_v12, %v952_v15  ;;  %v4633_v26 = vld [vmem:[#allocation13_spill] sm:$0xff] }
 0x1cc   : > { %4627 = vst [vmem:[#allocation23_spill] sm:$0xff] %v4018_v4  ;;  %v1310_v60 = vadd.bf16 %v4628_v53, %v3791_v34  ;;  %v1307_v55 = vadd.bf16 %v4629_v14, %v3777_v35  ;;  %v4036_v16 = vpop.f32.mrb[53].mxu0  ;;  %v4038_v10 = vpop.f32.mrb[53].mxu1  ;;  %v4042_v53 = vmul.bf16 %v1133_v3, %v3994_v30  ;;  %v4634_v3 = vmul.bf16 1027030327, %v4633_v26 }
 0x1cd   : > { %v2934_v43 = vpop.eup %2933  ;;  %4630 = vst [vmem:[#allocation24_spill] sm:$0xff] %v4034_v23  ;;  %v1372_v20 = vmul.bf16 1061961548, %v1308_v31  ;;  %2160 = vmatmul.mubr.bf16.gmra.mrb[84].mxu1 %v1621_v59  ;;  %v1134_v29 = vmul.bf16 %v4034_v23, %v4034_v23  ;;  %v4046_v31 = vpop.f32.mrb[54].mxu0  ;;  %v954_v26 = vpack.c.bf16 %v679_v24, %v3981_v46 }
 0x1ce   : > { %v2936_v54 = vpop.eup %2935  ;;  %v1496_v61 = vadd.bf16 1065369472, %v2934_v43  ;;  %4631 = vst [vmem:[#allocation25_spill] sm:$0xff] %v4042_v53  ;;  %v1374_v14 = vmul.bf16 1061961548, %v1310_v60  ;;  %v4048_v18 = vpop.f32.mrb[54].mxu1 }
 0x1cf   : > { %v1498_v32 = vadd.bf16 1065369472, %v2936_v54  ;;  %2941 = vtanh.bf16 %v1372_v20  ;;  %v1371_v15 = vmul.bf16 1061961548, %v1307_v55  ;;  %v4632_v43 = vld [vmem:[#allocation12_spill] sm:$0xff]  ;;  %v4054_v60 = vpop.f32.mrb[55].mxu0  ;;  %v4059_v20 = vmul.bf16 %v1132_v41, %v4008_v44 }
 0x1d0   : > { %v1560_v51 = vmul.bf16 1056980736, %v1496_v61  ;;  %2943 = vtanh.bf16 %v1374_v14  ;;  %v1309_v30 = vadd.bf16 %v4634_v3, %v4632_v43  ;;  %v4056_v59 = vpop.f32.mrb[55].mxu1  ;;  %v953_v55 = vpack.c.bf16 %v677_v1, %v3970_v57 }
 0x1d1   : > { %v1562_v54 = vmul.bf16 1056980736, %v1498_v32  ;;  %2945 = vtanh.bf16 %v1371_v15  ;;  %v955_v14 = vpack.c.bf16 %v3997_v5, %v3972_v63  ;;  %v4068_v6 = vmul.bf16 %v1134_v29, %v4034_v23 }
 0x1d2   : > { %v1624_v61 = vmul.bf16 %v1560_v51, %v3738_v22  ;;  %v1373_v62 = vmul.bf16 1061961548, %v1309_v30  ;;  %v4071_v32 = vadd.bf16 %v3502_v7, %v953_v55  ;;  %v956_v41 = vpack.c.bf16 %v4002_v13, %v3983_v9 }
 0x1d3   : > { %v1626_v3 = vmul.bf16 %v1562_v54, %v3741_v49  ;;  %v2938_v57 = vpop.eup %2937  ;;  %v4076_v22 = vadd.bf16 %v3504_v8, %v955_v14  ;;  %v4079_v63 = vadd.bf16 %v3506_v11, %v954_v26  ;;  %v4637_v49 = vmul.bf16 1027030327, %v3860_v19  ;;  %v4084_v30 = vpop.f32.mrb[56].mxu0 }
 0x1d4   : > { %4635 = vst [vmem:[#allocation12_spill] sm:$0xff] %v4071_v32  ;;  %2006 = vmatprep.mubr.bf16.mxu0 %v1624_v61  ;;  %2947 = vtanh.bf16 %v1373_v62  ;;  %v4086_v1 = vpop.f32.mrb[56].mxu1  ;;  %v1495_v9 = vadd.bf16 1065369472, %v2938_v57  ;;  %v1135_v62 = vmul.bf16 %v4071_v32, %v4071_v32  ;;  %v4091_v24 = vadd.bf16 %v3508_v12, %v956_v41  ;;  %v4096_v29 = vpop.f32.mrb[57].mxu0 }
 0x1d5   : > { %4636 = vst [vmem:[#allocation13_spill] sm:$0xff] %v4076_v22  ;;  %v1312_v46 = vadd.bf16 %v4637_v49, %v3831_v36  ;;  %v2940_v5 = vpop.eup %2939  ;;  %2167 = vmatprep.mubr.bf16.mxu1 %v1626_v3  ;;  %v4638_v13 = vmul.bf16 1027030327, %v3863_v21  ;;  %v4098_v19 = vpop.f32.mrb[57].mxu1  ;;  %v1137_v54 = vmul.bf16 %v4076_v22, %v4076_v22  ;;  %v1136_v55 = vmul.bf16 %v4079_v63, %v4079_v63 }
 0x1d6   : > { %v1497_v15 = vadd.bf16 1065369472, %v2940_v5  ;;  %v4104_v14 = vpop.f32.mrb[58].mxu0  ;;  %v4106_v26 = vpop.f32.mrb[58].mxu1  ;;  %v1559_v3 = vmul.bf16 1056980736, %v1495_v9  ;;  %v4109_v21 = vmul.bf16 %v1135_v62, %v4071_v32  ;;  %v1138_v9 = vmul.bf16 %v4091_v24, %v4091_v24 }
 0x1d7   : > { %v1314_v51 = vadd.bf16 %v4638_v13, %v3839_v17  ;;  %v1376_v61 = vmul.bf16 1061961548, %v1312_v46  ;;  %v4111_v57 = vpop.f32.mrb[59].mxu0  ;;  %v4113_v49 = vpop.f32.mrb[59].mxu1  ;;  %v4123_v32 = vmul.bf16 %v1137_v54, %v4076_v22  ;;  %v4641_v13 = vld [vmem:[#allocation14_spill] sm:$0xff] }
 0x1d8   : > { %4639 = vst [vmem:[#allocation26_spill] sm:$0xff] %v4109_v21  ;;  %v1561_v5 = vmul.bf16 1056980736, %v1497_v15  ;;  %v1623_v46 = vmul.bf16 %v1559_v3, %v3732_v38  ;;  %v4126_v15 = vmul.bf16 %v1136_v55, %v4079_v63 }
 0x1d9   : > { %v1378_v41 = vmul.bf16 1061961548, %v1314_v51  ;;  %2949 = vtanh.bf16 %v1376_v61  ;;  %4640 = vst [vmem:[#allocation27_spill] sm:$0xff] %v4123_v32  ;;  %v4642_v61 = vmul.bf16 1027030327, %v3834_v28  ;;  %v959_v28 = vpack.c.bf16 %v4048_v18, %v4028_v39 }
 0x1da   : > { %v2942_v62 = vpop.eup %2941  ;;  %v1625_v51 = vmul.bf16 %v1561_v5, %v3735_v42  ;;  %2007 = vmatmul.mubr.bf16.gmra.mrb[88].mxu0 %v1623_v46  ;;  %v957_v42 = vpack.c.bf16 %v4046_v31, %v4026_v0  ;;  %v958_v46 = vpack.c.bf16 %v4054_v60, %v4036_v16 }
 0x1db   : > { %2951 = vtanh.bf16 %v1378_v41  ;;  %v1311_v4 = vadd.bf16 %v4642_v61, %v4641_v13  ;;  %v2944_v38 = vpop.eup %2943  ;;  %v1500_v3 = vadd.bf16 1065369472, %v2942_v62  ;;  %v4643_v41 = vmul.bf16 1027030327, %v3856_v33  ;;  %v4141_v62 = vpop.f32.mrb[60].mxu0 }
 0x1dc   : > { %v2946_v54 = vpop.eup %2945  ;;  %2168 = vmatmul.mubr.bf16.gmra.mrb[88].mxu1 %v1625_v51  ;;  %v1502_v55 = vadd.bf16 1065369472, %v2944_v38  ;;  %v4143_v61 = vpop.f32.mrb[60].mxu1  ;;  %v4146_v22 = vadd.bf16 %v3502_v7, %v957_v42  ;;  %v4152_v18 = vadd.bf16 %v3506_v11, %v958_v46  ;;  %v4644_v46 = vmul.bf16 1027030327, %v3912_v52  ;;  %v4646_v52 = vld [vmem:[#allocation15_spill] sm:$0xff] }
 0x1dd   : > { %v1313_v53 = vadd.bf16 %v4643_v41, %v3827_v27  ;;  %v1375_v5 = vmul.bf16 1061961548, %v1311_v4  ;;  %v1564_v23 = vmul.bf16 1056980736, %v1500_v3  ;;  %v1499_v33 = vadd.bf16 1065369472, %v2946_v54 }
 0x1de   : > { %v1566_v0 = vmul.bf16 1056980736, %v1502_v55  ;;  %v4149_v4 = vadd.bf16 %v3504_v8, %v959_v28  ;;  %v4154_v39 = vpop.f32.mrb[61].mxu0  ;;  %v4156_v16 = vpop.f32.mrb[61].mxu1  ;;  %v1139_v55 = vmul.bf16 %v4146_v22, %v4146_v22 }
 0x1df   : > { %v1377_v41 = vmul.bf16 1061961548, %v1313_v53  ;;  %2953 = vtanh.bf16 %v1375_v5  ;;  %v2948_v31 = vpop.eup %2947  ;;  %v1628_v60 = vmul.bf16 %v1564_v23, %v3784_v48  ;;  %v1563_v51 = vmul.bf16 1056980736, %v1499_v33  ;;  %v4162_v38 = vpop.f32.mrb[62].mxu0 }
 0x1e0   : > { %v4160_v53 = vmul.bf16 %v1138_v9, %v4091_v24  ;;  %v4164_v3 = vpop.f32.mrb[62].mxu1  ;;  %v1630_v42 = vmul.bf16 %v1566_v0, %v3791_v34  ;;  %v1501_v54 = vadd.bf16 1065369472, %v2948_v31  ;;  %v1141_v5 = vmul.bf16 %v4149_v4, %v4149_v4  ;;  %v4171_v28 = vpop.f32.mrb[63].mxu0 }
 0x1e1   : > { %2955 = vtanh.bf16 %v1377_v41  ;;  %v4173_v48 = vpop.f32.mrb[63].mxu1  ;;  %2014 = vmatprep.mubr.bf16.mxu0 %v1628_v60  ;;  %v1627_v23 = vmul.bf16 %v1563_v51, %v3777_v35  ;;  %v1140_v9 = vmul.bf16 %v4152_v18, %v4152_v18  ;;  %v960_v34 = vpack.c.bf16 %v4056_v59, %v4038_v10 }
 0x1e2   : > { %v1316_v33 = vadd.bf16 %v4644_v46, %v3886_v2  ;;  %2175 = vmatprep.mubr.bf16.mxu1 %v1630_v42  ;;  %v1565_v41 = vmul.bf16 1056980736, %v1501_v54  ;;  %v4645_v60 = vmul.bf16 1027030327, %v3915_v37  ;;  %v1266_v21 = vmul.bf16 1027030327, %v4160_v53 }
 0x1e3   : > { %2015 = vmatmul.mubr.bf16.gmra.mrb[92].mxu0 %v1627_v23  ;;  %v4190_v10 = vadd.bf16 %v3508_v12, %v960_v34  ;;  %v4647_v42 = vmul.bf16 1027030327, %v3895_v58  ;;  %v4197_v32 = vmul.bf16 %v1139_v55, %v4146_v22  ;;  %v4200_v37 = vmul.bf16 %v1141_v5, %v4149_v4 }
 0x1e4   : > { %v1318_v35 = vadd.bf16 %v4645_v60, %v3889_v50  ;;  %v2950_v51 = vpop.eup %2949  ;;  %v1380_v59 = vmul.bf16 1061961548, %v1316_v33  ;;  %v1629_v0 = vmul.bf16 %v1565_v41, %v4632_v43  ;;  %v4203_v60 = vmul.bf16 %v1140_v9, %v4152_v18 }
 0x1e5   : > { %v1315_v54 = vadd.bf16 %v4647_v42, %v4646_v52  ;;  %v1504_v31 = vadd.bf16 1065369472, %v2950_v51  ;;  %v4648_v42 = vmul.bf16 1027030327, %v3908_v47  ;;  %v961_v55 = vpack.c.bf16 %v4104_v14, %v4084_v30 }
 0x1e6   : > { %v2952_v46 = vpop.eup %2951  ;;  %2957 = vtanh.bf16 %v1380_v59  ;;  %v1382_v34 = vmul.bf16 1061961548, %v1318_v35  ;;  %2176 = vmatmul.mubr.bf16.gmra.mrb[92].mxu1 %v1629_v0  ;;  %v1142_v5 = vmul.bf16 %v4190_v10, %v4190_v10  ;;  %v963_v9 = vpack.c.bf16 %v4106_v26, %v4086_v1 }
 0x1e7   : > { %v1506_v23 = vadd.bf16 1065369472, %v2952_v46  ;;  %v1568_v33 = vmul.bf16 1056980736, %v1504_v31  ;;  %v1379_v58 = vmul.bf16 1061961548, %v1315_v54  ;;  %v1317_v43 = vadd.bf16 %v4648_v42, %v3875_v40 }
 0x1e8   : > { %2959 = vtanh.bf16 %v1382_v34  ;;  %v4216_v31 = vadd.bf16 %v3502_v7, %v961_v55  ;;  %v1267_v30 = vmul.bf16 1027030327, %v4197_v32  ;;  %v4221_v14 = vadd.bf16 %v3504_v8, %v963_v9  ;;  %v4649_v34 = vld [vmem:[#allocation18_spill] sm:$0xff] }
 0x1e9   : > { %v1570_v41 = vmul.bf16 1056980736, %v1506_v23  ;;  %v1632_v35 = vmul.bf16 %v1568_v33, %v3831_v36  ;;  %2961 = vtanh.bf16 %v1379_v58  ;;  %v1381_v0 = vmul.bf16 1061961548, %v1317_v43 }
 0x1ea   : > { %v2954_v47 = vpop.eup %2953  ;;  %v962_v59 = vpack.c.bf16 %v4111_v57, %v4096_v29  ;;  %v1143_v36 = vmul.bf16 %v4216_v31, %v4216_v31  ;;  %v964_v26 = vpack.c.bf16 %v4113_v49, %v4098_v19  ;;  %v1145_v46 = vmul.bf16 %v4221_v14, %v4221_v14 }
 0x1eb   : > { %v1634_v51 = vmul.bf16 %v1570_v41, %v3839_v17  ;;  %2022 = vmatprep.mubr.bf16.mxu0 %v1632_v35  ;;  %v1503_v1 = vadd.bf16 1065369472, %v2954_v47  ;;  %2963 = vtanh.bf16 %v1381_v0  ;;  %v4650_v29 = vmul.bf16 1027030327, %v3975_v45 }
 0x1ec   : > { %v2956_v54 = vpop.eup %2955  ;;  %v4232_v23 = vadd.bf16 %v3506_v11, %v962_v59  ;;  %v4238_v58 = vmul.bf16 %v1142_v5, %v4190_v10  ;;  %v4241_v42 = vadd.bf16 %v3508_v12, %v964_v26  ;;  %v4651_v19 = vmul.bf16 1027030327, %v3986_v56 }
 0x1ed   : > { %2183 = vmatprep.mubr.bf16.mxu1 %v1634_v51  ;;  %v1505_v17 = vadd.bf16 1065369472, %v2956_v54  ;;  %v1320_v57 = vadd.bf16 %v4650_v29, %v4649_v34  ;;  %v1567_v33 = vmul.bf16 1056980736, %v1503_v1  ;;  %v1269_v55 = vmul.bf16 1027030327, %v4200_v37 }
 0x1ee   : > { %v1322_v49 = vadd.bf16 %v4651_v19, %v3949_v25  ;;  %v4248_v41 = vmul.bf16 %v1143_v36, %v4216_v31  ;;  %v1268_v35 = vmul.bf16 1027030327, %v4203_v60  ;;  %v4253_v5 = vmul.bf16 %v1145_v46, %v4221_v14  ;;  %v4653_v1 = vld [vmem:[#allocation19_spill] sm:$0xff]  ;;  %v4656_v46 = vld [vmem:[#allocation20_spill] sm:$0xff] }
 0x1ef   : > { %v1569_v43 = vmul.bf16 1056980736, %v1505_v17  ;;  %v1384_v9 = vmul.bf16 1061961548, %v1320_v57  ;;  %v1631_v45 = vmul.bf16 %v1567_v33, %v4641_v13  ;;  %v1144_v56 = vmul.bf16 %v4232_v23, %v4232_v23  ;;  %v4652_v13 = vld [vmem:[#allocation16_spill] sm:$0xff]  ;;  %v4655_v17 = vld [vmem:[#allocation17_spill] sm:$0xff] }
 0x1f0   : > { %v1386_v0 = vmul.bf16 1061961548, %v1322_v49  ;;  %v1146_v51 = vmul.bf16 %v4241_v42, %v4241_v42  ;;  %v1270_v54 = vmul.bf16 1027030327, %v4238_v58  ;;  %v4654_v36 = vmul.bf16 1027030327, %v4653_v1 }
 0x1f1   : > { %v1633_v47 = vmul.bf16 %v1569_v43, %v3827_v27  ;;  %2965 = vtanh.bf16 %v1384_v9  ;;  %v2958_v59 = vpop.eup %2957  ;;  %2023 = vmatmul.mubr.bf16.gmra.mrb[96].mxu0 %v1631_v45  ;;  %v4657_v29 = vmul.bf16 1027030327, %v4656_v46  ;;  %v1271_v33 = vmul.bf16 1027030327, %v4248_v41 }
 0x1f2   : > { %2967 = vtanh.bf16 %v1386_v0  ;;  %v1319_v26 = vadd.bf16 %v4654_v36, %v4652_v13  ;;  %v1508_v57 = vadd.bf16 1065369472, %v2958_v59  ;;  %v965_v19 = vpack.c.bf16 %v4162_v38, %v4141_v62 }
 0x1f3   : > { %v1321_v27 = vadd.bf16 %v4657_v29, %v4655_v17  ;;  %2184 = vmatmul.mubr.bf16.gmra.mrb[96].mxu1 %v1633_v47  ;;  %v967_v49 = vpack.c.bf16 %v4164_v3, %v4143_v61  ;;  %v2960_v43 = vpop.eup %2959  ;;  %v966_v1 = vpack.c.bf16 %v4171_v28, %v4154_v39  ;;  %v4276_v59 = vmul.bf16 %v1144_v56, %v4232_v23 }
 0x1f4   : > { %v1383_v45 = vmul.bf16 1061961548, %v1319_v26  ;;  %v2962_v36 = vpop.eup %2961  ;;  %v1572_v46 = vmul.bf16 1056980736, %v1508_v57  ;;  %v1510_v47 = vadd.bf16 1065369472, %v2960_v43  ;;  %v4279_v29 = vmul.bf16 %v1146_v51, %v4241_v42 }
 0x1f5   : > { %v1385_v0 = vmul.bf16 1061961548, %v1321_v27  ;;  %v1507_v62 = vadd.bf16 1065369472, %v2962_v36  ;;  %v4282_v61 = vadd.bf16 %v3506_v11, %v966_v1  ;;  %v968_v38 = vpack.c.bf16 %v4173_v48, %v4156_v16 }
 0x1f6   : > { %2969 = vtanh.bf16 %v1383_v45  ;;  %v2964_v3 = vpop.eup %2963  ;;  %v1636_v39 = vmul.bf16 %v1572_v46, %v3886_v2  ;;  %v1574_v28 = vmul.bf16 1056980736, %v1510_v47  ;;  %v4288_v26 = vadd.bf16 %v3502_v7, %v965_v19 }
 0x1f7   : > { %2971 = vtanh.bf16 %v1385_v0  ;;  %v1571_v56 = vmul.bf16 1056980736, %v1507_v62  ;;  %v1509_v27 = vadd.bf16 1065369472, %v2964_v3  ;;  %v4291_v51 = vadd.bf16 %v3504_v8, %v967_v49  ;;  %v4659_v0 = vld [vmem:[#allocation24_spill] sm:$0xff]  ;;  %v4661_v62 = vld [vmem:[#allocation21_spill] sm:$0xff] }
 0x1f8   : > { %v1148_v11 = vmul.bf16 %v4282_v61, %v4282_v61  ;;  %2030 = vmatprep.mubr.bf16.mxu0 %v1636_v39  ;;  %v1638_v57 = vmul.bf16 %v1574_v28, %v3889_v50  ;;  %v1272_v16 = vmul.bf16 1027030327, %v4276_v59  ;;  %v4298_v2 = vadd.bf16 %v3508_v12, %v968_v38  ;;  %v4662_v38 = vld [vmem:[#allocation23_spill] sm:$0xff] }
 0x1f9   : > { %v4658_v7 = vmul.bf16 1027030327, %v4059_v20  ;;  %v1635_v19 = vmul.bf16 %v1571_v56, %v4646_v52  ;;  %v1573_v43 = vmul.bf16 1056980736, %v1509_v27  ;;  %v1274_v8 = vmul.bf16 1027030327, %v4279_v29 }
 0x1fa   : > { %v4306_v49 = vmul.bf16 %v1148_v11, %v4282_v61  ;;  %2191 = vmatprep.mubr.bf16.mxu1 %v1638_v57  ;;  %v1147_v50 = vmul.bf16 %v4288_v26, %v4288_v26  ;;  %v1150_v12 = vmul.bf16 %v4298_v2, %v4298_v2  ;;  %v4660_v20 = vmul.bf16 1027030327, %v4068_v6 }
 0x1fb   : > { %v1324_v48 = vadd.bf16 %v4658_v7, %v4008_v44  ;;  %2031 = vmatmul.mubr.bf16.gmra.mrb[100].mxu0 %v1635_v19  ;;  %v1637_v52 = vmul.bf16 %v1573_v43, %v3875_v40  ;;  %v1149_v46 = vmul.bf16 %v4291_v51, %v4291_v51  ;;  %v4663_v3 = vmul.bf16 1027030327, %v4662_v38  ;;  %v4664_v40 = vld [vmem:[#allocation22_spill] sm:$0xff]  ;;  %v4665_v7 = vld [vmem:[#allocation25_spill] sm:$0xff] }
 0x1fc   : > { %v1326_v1 = vadd.bf16 %v4660_v20, %v4659_v0  ;;  %v2966_v36 = vpop.eup %2965  ;;  %v1276_v47 = vmul.bf16 1027030327, %v4306_v49  ;;  %v4323_v27 = vmul.bf16 %v1150_v12, %v4298_v2  ;;  %v4667_v43 = vmul.bf16 1027030327, %v4126_v15 }
 0x1fd   : > { %v1388_v45 = vmul.bf16 1061961548, %v1324_v48  ;;  %v1323_v39 = vadd.bf16 %v4663_v3, %v4661_v62  ;;  %v2968_v28 = vpop.eup %2967  ;;  %v1512_v56 = vadd.bf16 1065369472, %v2966_v36  ;;  %2192 = vmatmul.mubr.bf16.gmra.mrb[100].mxu1 %v1637_v52  ;;  %v4666_v48 = vmul.bf16 1027030327, %v4665_v7 }
 0x1fe   : > { %v1390_v6 = vmul.bf16 1061961548, %v1326_v1  ;;  %v1514_v11 = vadd.bf16 1065369472, %v2968_v28  ;;  %v1328_v49 = vadd.bf16 %v4667_v43, %v4079_v63  ;;  %v1278_v38 = vmul.bf16 1027030327, %v4323_v27 }
 0x1ff   : > { %2973 = vtanh.bf16 %v1388_v45  ;;  %v1387_v57 = vmul.bf16 1061961548, %v1323_v39  ;;  %v1325_v19 = vadd.bf16 %v4666_v48, %v4664_v40  ;;  %v1576_v20 = vmul.bf16 1056980736, %v1512_v56  ;;  %v4668_v28 = vld [vmem:[#allocation12_spill] sm:$0xff]  ;;  %v4669_v7 = vld [vmem:[#allocation26_spill] sm:$0xff] }
 0x200   : > { %2975 = vtanh.bf16 %v1390_v6  ;;  %v1330_v12 = vadd.bf16 %v1266_v21, %v4091_v24  ;;  %v1578_v45 = vmul.bf16 1056980736, %v1514_v11  ;;  %v1392_v36 = vmul.bf16 1061961548, %v1328_v49  ;;  %v4671_v56 = vld [vmem:[#allocation13_spill] sm:$0xff]  ;;  %v4672_v43 = vld [vmem:[#allocation27_spill] sm:$0xff] }
 0x201   : > { %2977 = vtanh.bf16 %v1387_v57  ;;  %v1389_v1 = vmul.bf16 1061961548, %v1325_v19  ;;  %v2970_v52 = vpop.eup %2969  ;;  %v1640_v3 = vmul.bf16 %v1576_v20, %v4649_v34  ;;  %v4670_v15 = vmul.bf16 1027030327, %v4669_v7 }
 0x202   : > { %v1394_v39 = vmul.bf16 1061961548, %v1330_v12  ;;  %v4673_v27 = vmul.bf16 1027030327, %v4672_v43  ;;  %v2972_v9 = vpop.eup %2971  ;;  %v1642_v53 = vmul.bf16 %v1578_v45, %v3949_v25  ;;  %v1511_v21 = vadd.bf16 1065369472, %v2970_v52 }
 0x203   : > { %v1327_v48 = vadd.bf16 %v4670_v15, %v4668_v28  ;;  %2979 = vtanh.bf16 %v1389_v1  ;;  %v1332_v11 = vadd.bf16 %v1268_v35, %v4152_v18  ;;  %2038 = vmatprep.mubr.bf16.mxu0 %v1640_v3  ;;  %v1513_v34 = vadd.bf16 1065369472, %v2972_v9 }
 0x204   : > { %v1329_v6 = vadd.bf16 %v4673_v27, %v4671_v56  ;;  %2981 = vtanh.bf16 %v1392_v36  ;;  %2199 = vmatprep.mubr.bf16.mxu1 %v1642_v53  ;;  %v1575_v49 = vmul.bf16 1056980736, %v1511_v21  ;;  %v1334_v12 = vadd.bf16 %v1270_v54, %v4190_v10 }
 0x205   : > { %v1391_v57 = vmul.bf16 1061961548, %v1327_v48  ;;  %2983 = vtanh.bf16 %v1394_v39  ;;  %v1396_v20 = vmul.bf16 1061961548, %v1332_v11  ;;  %v1577_v25 = vmul.bf16 1056980736, %v1513_v34 }
 0x206   : > { %v1393_v19 = vmul.bf16 1061961548, %v1329_v6  ;;  %v1331_v60 = vadd.bf16 %v1267_v30, %v4146_v22  ;;  %v1333_v35 = vadd.bf16 %v1269_v55, %v4149_v4  ;;  %v1639_v9 = vmul.bf16 %v1575_v49, %v4652_v13 }
 0x207   : > { %2985 = vtanh.bf16 %v1391_v57  ;;  %v1398_v45 = vmul.bf16 1061961548, %v1334_v12  ;;  %v1336_v1 = vadd.bf16 %v1272_v16, %v4232_v23  ;;  %v1641_v58 = vmul.bf16 %v1577_v25, %v4655_v17 }
 0x208   : > { %2987 = vtanh.bf16 %v1393_v19  ;;  %v1395_v54 = vmul.bf16 1061961548, %v1331_v60  ;;  %v1397_v36 = vmul.bf16 1061961548, %v1333_v35  ;;  %2039 = vmatmul.mubr.bf16.gmra.mrb[104].mxu0 %v1639_v9  ;;  %v1338_v37 = vadd.bf16 %v1274_v8, %v4241_v42 }
 0x209   : > { %2989 = vtanh.bf16 %v1396_v20  ;;  %v1400_v32 = vmul.bf16 1061961548, %v1336_v1  ;;  %v1335_v30 = vadd.bf16 %v1271_v33, %v4216_v31  ;;  %2200 = vmatmul.mubr.bf16.gmra.mrb[104].mxu1 %v1641_v58  ;;  %v1211_v55 = vmul.bf16 %v1147_v50, %v4288_v26 }
 0x20a   : > { %v2974_v52 = vpop.eup %2973  ;;  %2991 = vtanh.bf16 %v1398_v45  ;;  %v1340_v17 = vadd.bf16 %v1276_v47, %v4282_v61  ;;  %v1213_v29 = vmul.bf16 %v1149_v46, %v4291_v51  ;;  %v1402_v16 = vmul.bf16 1061961548, %v1338_v37 }
 0x20b   : > { %v1516_v13 = vadd.bf16 1065369472, %v2974_v52  ;;  %2993 = vtanh.bf16 %v1395_v54  ;;  %v2976_v59 = vpop.eup %2975  ;;  %v4674_v41 = vmul.bf16 1027030327, %v4253_v5  ;;  %v1342_v50 = vadd.bf16 %v1278_v38, %v4298_v2 }
 0x20c   : > { %2995 = vtanh.bf16 %v1397_v36  ;;  %v2978_v8 = vpop.eup %2977  ;;  %v1518_v39 = vadd.bf16 1065369472, %v2976_v59  ;;  %v1399_v47 = vmul.bf16 1061961548, %v1335_v30  ;;  %v1275_v48 = vmul.bf16 1027030327, %v1211_v55 }
 0x20d   : > { %v1337_v33 = vadd.bf16 %v4674_v41, %v4221_v14  ;;  %v1580_v3 = vmul.bf16 1056980736, %v1516_v13  ;;  %2997 = vtanh.bf16 %v1400_v32  ;;  %v1515_v7 = vadd.bf16 1065369472, %v2978_v8 }
 0x20e   : > { %2999 = vtanh.bf16 %v1402_v16  ;;  %v2980_v15 = vpop.eup %2979  ;;  %v1582_v46 = vmul.bf16 1056980736, %v1518_v39  ;;  %v1404_v27 = vmul.bf16 1061961548, %v1340_v17  ;;  %v1277_v34 = vmul.bf16 1027030327, %v1213_v29 }
 0x20f   : > { %v1644_v43 = vmul.bf16 %v1580_v3, %v4008_v44  ;;  %v2982_v6 = vpop.eup %2981  ;;  %v1579_v53 = vmul.bf16 1056980736, %v1515_v7  ;;  %v1517_v21 = vadd.bf16 1065369472, %v2980_v15  ;;  %v1401_v5 = vmul.bf16 1061961548, %v1337_v33 }
 0x210   : > { %v2984_v11 = vpop.eup %2983  ;;  %v1646_v57 = vmul.bf16 %v1582_v46, %v4659_v0  ;;  %v1520_v19 = vadd.bf16 1065369472, %v2982_v6  ;;  %v1406_v38 = vmul.bf16 1061961548, %v1342_v50  ;;  %3001 = vtanh.bf16 %v1399_v47 }
 0x211   : > { %2046 = vmatprep.mubr.bf16.mxu0 %v1644_v43  ;;  %v1643_v20 = vmul.bf16 %v1579_v53, %v4661_v62  ;;  %v1581_v12 = vmul.bf16 1056980736, %v1517_v21  ;;  %v1522_v25 = vadd.bf16 1065369472, %v2984_v11  ;;  %3003 = vtanh.bf16 %v1404_v27 }
 0x212   : > { %v2986_v49 = vpop.eup %2985  ;;  %2207 = vmatprep.mubr.bf16.mxu1 %v1646_v57  ;;  %v1584_v60 = vmul.bf16 1056980736, %v1520_v19  ;;  %v1339_v9 = vadd.bf16 %v1275_v48, %v4288_v26  ;;  %3005 = vtanh.bf16 %v1401_v5  ;;  %v1341_v55 = vadd.bf16 %v1277_v34, %v4291_v51 }
 0x213   : > { %v2988_v44 = vpop.eup %2987  ;;  %v1519_v35 = vadd.bf16 1065369472, %v2986_v49  ;;  %2047 = vmatmul.mubr.bf16.gmra.mrb[108].mxu0 %v1643_v20  ;;  %v1645_v1 = vmul.bf16 %v1581_v12, %v4664_v40  ;;  %v1586_v0 = vmul.bf16 1056980736, %v1522_v25  ;;  %3007 = vtanh.bf16 %v1406_v38 }
 0x214   : > { %v2990_v45 = vpop.eup %2989  ;;  %v1521_v58 = vadd.bf16 1065369472, %v2988_v44  ;;  %v1648_v62 = vmul.bf16 %v1584_v60, %v4079_v63  ;;  %v1403_v16 = vmul.bf16 1061961548, %v1339_v9 }
 0x215   : > { %v2992_v54 = vpop.eup %2991  ;;  %v1524_v36 = vadd.bf16 1065369472, %v2990_v45  ;;  %2208 = vmatmul.mubr.bf16.gmra.mrb[108].mxu1 %v1645_v1  ;;  %v1650_v32 = vmul.bf16 %v1586_v0, %v4091_v24  ;;  %v1583_v37 = vmul.bf16 1056980736, %v1519_v35  ;;  %v1405_v24 = vmul.bf16 1061961548, %v1341_v55 }
 0x216   : > { %v2994_v52 = vpop.eup %2993  ;;  %v1526_v30 = vadd.bf16 1065369472, %v2992_v54  ;;  %2054 = vmatprep.mubr.bf16.mxu0 %v1648_v62  ;;  %v1585_v59 = vmul.bf16 1056980736, %v1521_v58  ;;  %3009 = vtanh.bf16 %v1403_v16 }
 0x217   : > { %v2996_v13 = vpop.eup %2995  ;;  %v1588_v17 = vmul.bf16 1056980736, %v1524_v36  ;;  %2215 = vmatprep.mubr.bf16.mxu1 %v1650_v32  ;;  %v1647_v8 = vmul.bf16 %v1583_v37, %v4668_v28  ;;  %v1523_v3 = vadd.bf16 1065369472, %v2994_v52  ;;  %3011 = vtanh.bf16 %v1405_v24 }
 0x218   : > { %v2998_v40 = vpop.eup %2997  ;;  %v1590_v29 = vmul.bf16 1056980736, %v1526_v30  ;;  %v1649_v7 = vmul.bf16 %v1585_v59, %v4671_v56  ;;  %v1525_v47 = vadd.bf16 1065369472, %v2996_v13  ;;  %v3013_v13 = vld [vmem:[%s3425_s6] sm:$0xff] }
 0x219   : > { %v3000_v41 = vpop.eup %2999  ;;  %v1652_v63 = vmul.bf16 %v1588_v17, %v4152_v18  ;;  %v1528_v33 = vadd.bf16 1065369472, %v2998_v40  ;;  %v1587_v46 = vmul.bf16 1056980736, %v1523_v3 }
 0x21a   : > { %v1654_v39 = vmul.bf16 %v1590_v29, %v4190_v10  ;;  %v1530_v50 = vadd.bf16 1065369472, %v3000_v41  ;;  %v1589_v6 = vmul.bf16 1056980736, %v1525_v47 }
 0x21b   : > { %2055 = vmatmul.mubr.bf16.gmra.mrb[112].mxu0 %v1647_v8  ;;  %v3002_v15 = vpop.eup %3001  ;;  %v1592_v48 = vmul.bf16 1056980736, %v1528_v33  ;;  %v1651_v21 = vmul.bf16 %v1587_v46, %v4146_v22 }
 0x21c   : > { %2062 = vmatprep.mubr.bf16.mxu0 %v1652_v63  ;;  %v3004_v43 = vpop.eup %3003  ;;  %v1594_v28 = vmul.bf16 1056980736, %v1530_v50  ;;  %v1527_v56 = vadd.bf16 1065369472, %v3002_v15  ;;  %v1653_v34 = vmul.bf16 %v1589_v6, %v4149_v4  ;;  %v3014_v63 = vld [vmem:[%s3425_s6 + $0x8] sm:$0xff]  ;;  %v3016_v6 = vld [vmem:[%s3425_s6 + $0x18] sm:$0xff] }
 0x21d   : > { %2216 = vmatmul.mubr.bf16.gmra.mrb[112].mxu1 %v1649_v7  ;;  %v3006_v18 = vpop.eup %3005  ;;  %v1656_v10 = vmul.bf16 %v1592_v48, %v4232_v23  ;;  %v1532_v53 = vadd.bf16 1065369472, %v3004_v43 }
 0x21e   : > { %2223 = vmatprep.mubr.bf16.mxu1 %v1654_v39  ;;  %v3008_v27 = vpop.eup %3007  ;;  %v1658_v5 = vmul.bf16 %v1594_v28, %v4241_v42  ;;  %v1529_v57 = vadd.bf16 1065369472, %v3006_v18  ;;  %v1591_v38 = vmul.bf16 1056980736, %v1527_v56  ;;  %v3015_v18 = vld [vmem:[%s3425_s6 + $0x10] sm:$0xff] }
 0x21f   : > { %v1534_v11 = vadd.bf16 1065369472, %v3008_v27  ;;  %v1596_v19 = vmul.bf16 1056980736, %v1532_v53 }
 0x220   : > { %v1593_v12 = vmul.bf16 1056980736, %v1529_v57  ;;  %v1655_v22 = vmul.bf16 %v1591_v38, %v4216_v31 }
 0x221   : > { %v3010_v49 = vpop.eup %3009  ;;  %v1598_v20 = vmul.bf16 1056980736, %v1534_v11  ;;  %v1660_v25 = vmul.bf16 %v1596_v19, %v4282_v61 }
 0x222   : > { %v3012_v23 = vpop.eup %3011  ;;  %v1531_v44 = vadd.bf16 1065369472, %v3010_v49  ;;  %v1657_v4 = vmul.bf16 %v1593_v12, %v4221_v14 }
 0x223   : > { %2063 = vmatmul.mubr.bf16.gmra.mrb[116].mxu0 %v1651_v21  ;;  %v1662_v42 = vmul.bf16 %v1598_v20, %v4298_v2  ;;  %v1533_v60 = vadd.bf16 1065369472, %v3012_v23  ;;  %v4404_v2 = vld [vmem:[%s4561_s4] ss:$0 sm:$0xff] }
 0x224   : > { %2070 = vmatprep.mubr.bf16.mxu0 %v1656_v10  ;;  %v1595_v35 = vmul.bf16 1056980736, %v1531_v44  ;;  %v3017_v44 = vld [vmem:[%s3425_s6 + $0x20] sm:$0xff] }
 0x225   : > { %2224 = vmatmul.mubr.bf16.gmra.mrb[116].mxu1 %v1653_v34  ;;  %v1597_v9 = vmul.bf16 1056980736, %v1533_v60 }
 0x226   : > { %2231 = vmatprep.mubr.bf16.mxu1 %v1658_v5  ;;  %v1659_v45 = vmul.bf16 %v1595_v35, %v4288_v26  ;;  %v3018_v35 = vld [vmem:[%s3425_s6 + $0x28] sm:$0xff] }
 0x227   : > { %v1661_v1 = vmul.bf16 %v1597_v9, %v4291_v51 }
 0x22b   : > { %2071 = vmatmul.mubr.bf16.gmra.mrb[120].mxu0 %v1655_v22 }
 0x22c   : > { %2078 = vmatprep.mubr.bf16.mxu0 %v1660_v25 }
 0x22d   : > { %2232 = vmatmul.mubr.bf16.gmra.mrb[120].mxu1 %v1657_v4 }
 0x22e   : > { %2239 = vmatprep.mubr.bf16.mxu1 %v1662_v42 }
 0x233   : > { %2079 = vmatmul.mubr.bf16.gmra.mrb[124].mxu0 %v1659_v45 }
 0x235   : > { %2240 = vmatmul.mubr.bf16.gmra.mrb[124].mxu1 %v1661_v1 }
 0x25f   : > { %v2520_v61 = vpop.f32.mrb[64].mxu0 }
 0x260   : > { %v2632_v31 = vpop.f32.mrb[64].mxu1  ;;  %v2521_v14 = vpop.f32.mrb[65].mxu0 }
 0x261   : > { %v2633_v0 = vpop.f32.mrb[65].mxu1  ;;  %v2522_v58 = vadd.f32 %v2521_v14, %v2520_v61  ;;  %v2523_v62 = vpop.f32.mrb[66].mxu0 }
 0x262   : > { %v2634_v54 = vadd.f32 %v2633_v0, %v2632_v31  ;;  %v2635_v36 = vpop.f32.mrb[66].mxu1  ;;  %v2524_v26 = vpop.f32.mrb[67].mxu0 }
 0x263   : > { %v2636_v52 = vpop.f32.mrb[67].mxu1  ;;  %v1961_v51 = vadd.f32 %v2522_v58, %v4404_v2  ;;  %v2525_v32 = vadd.f32 %v2524_v26, %v2523_v62 }
 0x264   : > { %v2637_v37 = vadd.f32 %v2636_v52, %v2635_v36 }
 0x265   : > { %v2122_v30 = vadd.f32 %v2634_v54, %v1961_v51  ;;  %v1964_v55 = vadd.f32 %v2525_v32, %v4404_v2 }
 0x267   : > { %v2248_v17 = vadd.f32 %v3013_v13, %v2122_v30  ;;  %v2125_v40 = vadd.f32 %v2637_v37, %v1964_v55  ;;  %v2526_v59 = vpop.f32.mrb[68].mxu0  ;;  %v3019_v37 = vld [vmem:[%s3425_s6 + $0x30] sm:$0xff]  ;;  %v3020_v13 = vld [vmem:[%s3425_s6 + $0x38] sm:$0xff] }
 0x268   : > { %v2638_v29 = vpop.f32.mrb[68].mxu1  ;;  %v2527_v16 = vpop.f32.mrb[69].mxu0 }
 0x269   : > { %v2639_v41 = vpop.f32.mrb[69].mxu1  ;;  %2280 = vst [vmem:[%s4411_s12] sm:$0xff] %v2248_v17  ;;  %v2249_v33 = vadd.f32 %v3014_v63, %v2125_v40  ;;  %v2528_v8 = vadd.f32 %v2527_v16, %v2526_v59  ;;  %v2529_v24 = vpop.f32.mrb[70].mxu0 }
 0x26a   : > { %v2640_v3 = vadd.f32 %v2639_v41, %v2638_v29  ;;  %v2641_v39 = vpop.f32.mrb[70].mxu1  ;;  %v2530_v50 = vpop.f32.mrb[71].mxu0 }
 0x26b   : > { %v2642_v7 = vpop.f32.mrb[71].mxu1  ;;  %2281 = vst [vmem:[%s4411_s12 + $0x8] sm:$0xff] %v2249_v33  ;;  %v1969_v47 = vadd.f32 %v2528_v8, %v4404_v2  ;;  %v2531_v15 = vadd.f32 %v2530_v50, %v2529_v24 }
 0x26c   : > { %v2643_v48 = vadd.f32 %v2642_v7, %v2641_v39 }
 0x26d   : > { %v2130_v43 = vadd.f32 %v2640_v3, %v1969_v47  ;;  %v1972_v46 = vadd.f32 %v2531_v15, %v4404_v2 }
 0x26f   : > { %v2250_v28 = vadd.f32 %v3015_v18, %v2130_v43  ;;  %v2133_v27 = vadd.f32 %v2643_v48, %v1972_v46  ;;  %v3021_v48 = vld [vmem:[%s3425_s6 + $0x40] sm:$0xff] }
 0x271   : > { %2282 = vst [vmem:[%s4411_s12 + $0x10] sm:$0xff] %v2250_v28  ;;  %v2251_v10 = vadd.f32 %v3016_v6, %v2133_v27  ;;  %v3022_v27 = vld [vmem:[%s3425_s6 + $0x48] sm:$0xff] }
 0x273   : > { %2283 = vst [vmem:[%s4411_s12 + $0x18] sm:$0xff] %v2251_v10 }
 0x27c   : > { %v2532_v53 = vpop.f32.mrb[72].mxu0 }
 0x27d   : > { %v2533_v21 = vpop.f32.mrb[73].mxu0 }
 0x27e   : > { %v2534_v5 = vadd.f32 %v2533_v21, %v2532_v53  ;;  %v2535_v11 = vpop.f32.mrb[74].mxu0 }
 0x27f   : > { %v2644_v56 = vpop.f32.mrb[72].mxu1  ;;  %v2536_v57 = vpop.f32.mrb[75].mxu0 }
 0x280   : > { %v2645_v34 = vpop.f32.mrb[73].mxu1  ;;  %v1977_v19 = vadd.f32 %v2534_v5, %v4404_v2  ;;  %v2537_v20 = vadd.f32 %v2536_v57, %v2535_v11 }
 0x281   : > { %v2646_v38 = vadd.f32 %v2645_v34, %v2644_v56  ;;  %v2647_v49 = vpop.f32.mrb[74].mxu1 }
 0x282   : > { %v2648_v12 = vpop.f32.mrb[75].mxu1  ;;  %v1980_v25 = vadd.f32 %v2537_v20, %v4404_v2 }
 0x283   : > { %v2138_v23 = vadd.f32 %v2646_v38, %v1977_v19  ;;  %v2649_v22 = vadd.f32 %v2648_v12, %v2647_v49 }
 0x284   : > { %v2538_v60 = vpop.f32.mrb[76].mxu0 }
 0x285   : > { %v2252_v42 = vadd.f32 %v3017_v44, %v2138_v23  ;;  %v2141_v4 = vadd.f32 %v2649_v22, %v1980_v25  ;;  %v2539_v45 = vpop.f32.mrb[77].mxu0  ;;  %v3023_v23 = vld [vmem:[%s3425_s6 + $0x50] sm:$0xff]  ;;  %v3024_v44 = vld [vmem:[%s3425_s6 + $0x58] sm:$0xff] }
 0x286   : > { %v2540_v61 = vadd.f32 %v2539_v45, %v2538_v60  ;;  %v2541_v31 = vpop.f32.mrb[78].mxu0 }
 0x287   : > { %2284 = vst [vmem:[%s4411_s12 + $0x20] sm:$0xff] %v2252_v42  ;;  %v2253_v9 = vadd.f32 %v3018_v35, %v2141_v4  ;;  %v2542_v0 = vpop.f32.mrb[79].mxu0 }
 0x288   : > { %v2650_v1 = vpop.f32.mrb[76].mxu1  ;;  %v1985_v58 = vadd.f32 %v2540_v61, %v4404_v2  ;;  %v2543_v36 = vadd.f32 %v2542_v0, %v2541_v31 }
 0x289   : > { %2285 = vst [vmem:[%s4411_s12 + $0x28] sm:$0xff] %v2253_v9  ;;  %v2651_v14 = vpop.f32.mrb[77].mxu1 }
 0x28a   : > { %v2652_v54 = vadd.f32 %v2651_v14, %v2650_v1  ;;  %v2653_v62 = vpop.f32.mrb[78].mxu1  ;;  %v1988_v51 = vadd.f32 %v2543_v36, %v4404_v2 }
 0x28b   : > { %v2654_v26 = vpop.f32.mrb[79].mxu1 }
 0x28c   : > { %v2146_v52 = vadd.f32 %v2652_v54, %v1985_v58  ;;  %v2655_v32 = vadd.f32 %v2654_v26, %v2653_v62 }
 0x28e   : > { %v2254_v30 = vadd.f32 %v3019_v37, %v2146_v52  ;;  %v2149_v55 = vadd.f32 %v2655_v32, %v1988_v51  ;;  %v3025_v52 = vld [vmem:[%s3425_s6 + $0x60] sm:$0xff] }
 0x290   : > { %2286 = vst [vmem:[%s4411_s12 + $0x30] sm:$0xff] %v2254_v30  ;;  %v2255_v17 = vadd.f32 %v3020_v13, %v2149_v55  ;;  %v3026_v55 = vld [vmem:[%s3425_s6 + $0x68] sm:$0xff] }
 0x292   : > { %2287 = vst [vmem:[%s4411_s12 + $0x38] sm:$0xff] %v2255_v17 }
 0x296   : > { %v2544_v40 = vpop.f32.mrb[80].mxu0 }
 0x297   : > { %v2656_v59 = vpop.f32.mrb[80].mxu1  ;;  %v2545_v29 = vpop.f32.mrb[81].mxu0 }
 0x298   : > { %v2546_v16 = vadd.f32 %v2545_v29, %v2544_v40  ;;  %v2657_v41 = vpop.f32.mrb[81].mxu1  ;;  %v2547_v63 = vpop.f32.mrb[82].mxu0 }
 0x299   : > { %v2658_v33 = vadd.f32 %v2657_v41, %v2656_v59  ;;  %v2659_v8 = vpop.f32.mrb[82].mxu1  ;;  %v2548_v3 = vpop.f32.mrb[83].mxu0 }
 0x29a   : > { %v1993_v24 = vadd.f32 %v2546_v16, %v4404_v2  ;;  %v2549_v39 = vadd.f32 %v2548_v3, %v2547_v63  ;;  %v2660_v50 = vpop.f32.mrb[83].mxu1 }
 0x29b   : > { %v2661_v7 = vadd.f32 %v2660_v50, %v2659_v8 }
 0x29c   : > { %v2154_v47 = vadd.f32 %v2658_v33, %v1993_v24  ;;  %v1996_v15 = vadd.f32 %v2549_v39, %v4404_v2 }
 0x29e   : > { %v2256_v43 = vadd.f32 %v3021_v48, %v2154_v47  ;;  %v2157_v46 = vadd.f32 %v2661_v7, %v1996_v15  ;;  %v2550_v18 = vpop.f32.mrb[84].mxu0  ;;  %v3027_v7 = vld [vmem:[%s3425_s6 + $0x70] sm:$0xff]  ;;  %v3028_v48 = vld [vmem:[%s3425_s6 + $0x78] sm:$0xff] }
 0x29f   : > { %v2551_v28 = vpop.f32.mrb[85].mxu0 }
 0x2a0   : > { %2288 = vst [vmem:[%s4411_s12 + $0x40] sm:$0xff] %v2256_v43  ;;  %v2257_v6 = vadd.f32 %v3022_v27, %v2157_v46  ;;  %v2552_v10 = vadd.f32 %v2551_v28, %v2550_v18  ;;  %v2553_v53 = vpop.f32.mrb[86].mxu0  ;;  %v2662_v21 = vpop.f32.mrb[84].mxu1 }
 0x2a1   : > { %v2554_v56 = vpop.f32.mrb[87].mxu0  ;;  %v2663_v11 = vpop.f32.mrb[85].mxu1 }
 0x2a2   : > { %2289 = vst [vmem:[%s4411_s12 + $0x48] sm:$0xff] %v2257_v6  ;;  %v2001_v5 = vadd.f32 %v2552_v10, %v4404_v2  ;;  %v2555_v34 = vadd.f32 %v2554_v56, %v2553_v53  ;;  %v2664_v57 = vadd.f32 %v2663_v11, %v2662_v21  ;;  %v2665_v19 = vpop.f32.mrb[86].mxu1 }
 0x2a3   : > { %v2666_v49 = vpop.f32.mrb[87].mxu1 }
 0x2a4   : > { %v2004_v38 = vadd.f32 %v2555_v34, %v4404_v2  ;;  %v2162_v20 = vadd.f32 %v2664_v57, %v2001_v5  ;;  %v2667_v12 = vadd.f32 %v2666_v49, %v2665_v19  ;;  %v3029_v49 = vld [vmem:[%s3425_s6 + $0x80] sm:$0xff] }
 0x2a6   : > { %v2258_v25 = vadd.f32 %v3023_v23, %v2162_v20  ;;  %v2165_v22 = vadd.f32 %v2667_v12, %v2004_v38  ;;  %v3030_v23 = vld [vmem:[%s3425_s6 + $0x88] sm:$0xff] }
 0x2a8   : > { %2290 = vst [vmem:[%s4411_s12 + $0x50] sm:$0xff] %v2258_v25  ;;  %v2259_v42 = vadd.f32 %v3024_v44, %v2165_v22 }
 0x2aa   : > { %2291 = vst [vmem:[%s4411_s12 + $0x58] sm:$0xff] %v2259_v42 }
 0x2ad   : > { %v2556_v4 = vpop.f32.mrb[88].mxu0 }
 0x2ae   : > { %v2557_v35 = vpop.f32.mrb[89].mxu0 }
 0x2af   : > { %v2668_v60 = vpop.f32.mrb[88].mxu1  ;;  %v2558_v9 = vadd.f32 %v2557_v35, %v2556_v4  ;;  %v2559_v1 = vpop.f32.mrb[90].mxu0 }
 0x2b0   : > { %v2669_v45 = vpop.f32.mrb[89].mxu1  ;;  %v2560_v14 = vpop.f32.mrb[91].mxu0 }
 0x2b1   : > { %v2670_v61 = vadd.f32 %v2669_v45, %v2668_v60  ;;  %v2671_v31 = vpop.f32.mrb[90].mxu1  ;;  %v2009_v0 = vadd.f32 %v2558_v9, %v4404_v2  ;;  %v2561_v58 = vadd.f32 %v2560_v14, %v2559_v1 }
 0x2b2   : > { %v2672_v54 = vpop.f32.mrb[91].mxu1 }
 0x2b3   : > { %v2673_v62 = vadd.f32 %v2672_v54, %v2671_v31  ;;  %v2170_v36 = vadd.f32 %v2670_v61, %v2009_v0  ;;  %v2012_v26 = vadd.f32 %v2561_v58, %v4404_v2 }
 0x2b5   : > { %v2260_v51 = vadd.f32 %v3025_v52, %v2170_v36  ;;  %v2173_v32 = vadd.f32 %v2673_v62, %v2012_v26  ;;  %v3031_v62 = vld [vmem:[%s3425_s6 + $0x90] sm:$0xff]  ;;  %v3032_v52 = vld [vmem:[%s3425_s6 + $0x98] sm:$0xff] }
 0x2b6   : > { %v2562_v37 = vpop.f32.mrb[92].mxu0 }
 0x2b7   : > { %v2563_v30 = vpop.f32.mrb[93].mxu0  ;;  %2292 = vst [vmem:[%s4411_s12 + $0x60] sm:$0xff] %v2260_v51  ;;  %v2261_v13 = vadd.f32 %v3026_v55, %v2173_v32 }
 0x2b8   : > { %v2564_v17 = vadd.f32 %v2563_v30, %v2562_v37  ;;  %v2565_v40 = vpop.f32.mrb[94].mxu0 }
 0x2b9   : > { %v2674_v59 = vpop.f32.mrb[92].mxu1  ;;  %v2566_v29 = vpop.f32.mrb[95].mxu0  ;;  %2293 = vst [vmem:[%s4411_s12 + $0x68] sm:$0xff] %v2261_v13 }
 0x2ba   : > { %v2017_v16 = vadd.f32 %v2564_v17, %v4404_v2  ;;  %v2675_v41 = vpop.f32.mrb[93].mxu1  ;;  %v2567_v63 = vadd.f32 %v2566_v29, %v2565_v40 }
 0x2bb   : > { %v2676_v33 = vadd.f32 %v2675_v41, %v2674_v59  ;;  %v2677_v8 = vpop.f32.mrb[94].mxu1 }
 0x2bc   : > { %v2020_v3 = vadd.f32 %v2567_v63, %v4404_v2  ;;  %v2678_v24 = vpop.f32.mrb[95].mxu1 }
 0x2bd   : > { %v2178_v39 = vadd.f32 %v2676_v33, %v2017_v16  ;;  %v2679_v50 = vadd.f32 %v2678_v24, %v2677_v8  ;;  %v3033_v24 = vld [vmem:[%s3425_s6 + $0xa0] sm:$0xff] }
 0x2bf   : > { %v2262_v47 = vadd.f32 %v3027_v7, %v2178_v39  ;;  %v2181_v15 = vadd.f32 %v2679_v50, %v2020_v3  ;;  %v3034_v7 = vld [vmem:[%s3425_s6 + $0xa8] sm:$0xff] }
 0x2c1   : > { %2294 = vst [vmem:[%s4411_s12 + $0x70] sm:$0xff] %v2262_v47  ;;  %v2263_v43 = vadd.f32 %v3028_v48, %v2181_v15 }
 0x2c3   : > { %2295 = vst [vmem:[%s4411_s12 + $0x78] sm:$0xff] %v2263_v43 }
 0x2c4   : > { %v2568_v46 = vpop.f32.mrb[96].mxu0 }
 0x2c5   : > { %v2569_v28 = vpop.f32.mrb[97].mxu0 }
 0x2c6   : > { %v2680_v18 = vpop.f32.mrb[96].mxu1  ;;  %v2570_v27 = vadd.f32 %v2569_v28, %v2568_v46  ;;  %v2571_v10 = vpop.f32.mrb[98].mxu0 }
 0x2c7   : > { %v2681_v6 = vpop.f32.mrb[97].mxu1  ;;  %v2572_v56 = vpop.f32.mrb[99].mxu0 }
 0x2c8   : > { %v2682_v53 = vadd.f32 %v2681_v6, %v2680_v18  ;;  %v2683_v21 = vpop.f32.mrb[98].mxu1  ;;  %v2025_v5 = vadd.f32 %v2570_v27, %v4404_v2  ;;  %v2573_v11 = vadd.f32 %v2572_v56, %v2571_v10 }
 0x2c9   : > { %v2684_v34 = vpop.f32.mrb[99].mxu1 }
 0x2ca   : > { %v2685_v57 = vadd.f32 %v2684_v34, %v2683_v21  ;;  %v2186_v19 = vadd.f32 %v2682_v53, %v2025_v5  ;;  %v2028_v38 = vadd.f32 %v2573_v11, %v4404_v2 }
 0x2cc   : > { %v2264_v20 = vadd.f32 %v3029_v49, %v2186_v19  ;;  %v2189_v12 = vadd.f32 %v2685_v57, %v2028_v38  ;;  %v3035_v57 = vld [vmem:[%s3425_s6 + $0xb0] sm:$0xff] }
 0x2ce   : > { %2296 = vst [vmem:[%s4411_s12 + $0x80] sm:$0xff] %v2264_v20  ;;  %v2265_v25 = vadd.f32 %v3030_v23, %v2189_v12  ;;  %v2574_v22 = vpop.f32.mrb[100].mxu0  ;;  %v3036_v12 = vld [vmem:[%s3425_s6 + $0xb8] sm:$0xff] }
 0x2cf   : > { %v2575_v44 = vpop.f32.mrb[101].mxu0 }
 0x2d0   : > { %2297 = vst [vmem:[%s4411_s12 + $0x88] sm:$0xff] %v2265_v25  ;;  %v2686_v42 = vpop.f32.mrb[100].mxu1  ;;  %v2576_v4 = vadd.f32 %v2575_v44, %v2574_v22  ;;  %v2577_v60 = vpop.f32.mrb[102].mxu0 }
 0x2d1   : > { %v2687_v35 = vpop.f32.mrb[101].mxu1  ;;  %v2578_v9 = vpop.f32.mrb[103].mxu0 }
 0x2d2   : > { %v2033_v45 = vadd.f32 %v2576_v4, %v4404_v2  ;;  %v2688_v1 = vadd.f32 %v2687_v35, %v2686_v42  ;;  %v2689_v61 = vpop.f32.mrb[102].mxu1  ;;  %v2579_v31 = vadd.f32 %v2578_v9, %v2577_v60 }
 0x2d3   : > { %v2690_v14 = vpop.f32.mrb[103].mxu1 }
 0x2d4   : > { %v2194_v0 = vadd.f32 %v2688_v1, %v2033_v45  ;;  %v2036_v58 = vadd.f32 %v2579_v31, %v4404_v2  ;;  %v2691_v54 = vadd.f32 %v2690_v14, %v2689_v61 }
 0x2d6   : > { %v2266_v36 = vadd.f32 %v3031_v62, %v2194_v0  ;;  %v2197_v26 = vadd.f32 %v2691_v54, %v2036_v58  ;;  %v3037_v0 = vld [vmem:[%s3425_s6 + $0xc0] sm:$0xff] }
 0x2d8   : > { %2298 = vst [vmem:[%s4411_s12 + $0x90] sm:$0xff] %v2266_v36  ;;  %v2267_v51 = vadd.f32 %v3032_v52, %v2197_v26  ;;  %v3038_v26 = vld [vmem:[%s3425_s6 + $0xc8] sm:$0xff] }
 0x2da   : > { %2299 = vst [vmem:[%s4411_s12 + $0x98] sm:$0xff] %v2267_v51 }
 0x2db   : > { %v2580_v32 = vpop.f32.mrb[104].mxu0 }
 0x2dc   : > { %v2692_v37 = vpop.f32.mrb[104].mxu1  ;;  %v2581_v30 = vpop.f32.mrb[105].mxu0 }
 0x2dd   : > { %v2582_v55 = vadd.f32 %v2581_v30, %v2580_v32  ;;  %v2693_v13 = vpop.f32.mrb[105].mxu1  ;;  %v2583_v17 = vpop.f32.mrb[106].mxu0 }
 0x2de   : > { %v2694_v40 = vadd.f32 %v2693_v13, %v2692_v37  ;;  %v2695_v59 = vpop.f32.mrb[106].mxu1  ;;  %v2584_v29 = vpop.f32.mrb[107].mxu0 }
 0x2df   : > { %v2041_v16 = vadd.f32 %v2582_v55, %v4404_v2  ;;  %v2585_v41 = vadd.f32 %v2584_v29, %v2583_v17  ;;  %v2696_v63 = vpop.f32.mrb[107].mxu1 }
 0x2e0   : > { %v2697_v33 = vadd.f32 %v2696_v63, %v2695_v59 }
 0x2e1   : > { %v2202_v8 = vadd.f32 %v2694_v40, %v2041_v16  ;;  %v2044_v3 = vadd.f32 %v2585_v41, %v4404_v2 }
 0x2e3   : > { %v2268_v39 = vadd.f32 %v3033_v24, %v2202_v8  ;;  %v2205_v50 = vadd.f32 %v2697_v33, %v2044_v3  ;;  %v3039_v33 = vld [vmem:[%s3425_s6 + $0xd0] sm:$0xff] }
 0x2e5   : > { %2300 = vst [vmem:[%s4411_s12 + $0xa0] sm:$0xff] %v2268_v39  ;;  %v2269_v47 = vadd.f32 %v3034_v7, %v2205_v50  ;;  %v3040_v50 = vld [vmem:[%s3425_s6 + $0xd8] sm:$0xff] }
 0x2e6   : > { %v2586_v15 = vpop.f32.mrb[108].mxu0 }
 0x2e7   : > { %v2587_v48 = vpop.f32.mrb[109].mxu0  ;;  %2301 = vst [vmem:[%s4411_s12 + $0xa8] sm:$0xff] %v2269_v47 }
 0x2e8   : > { %v2698_v43 = vpop.f32.mrb[108].mxu1  ;;  %v2588_v46 = vadd.f32 %v2587_v48, %v2586_v15  ;;  %v2589_v18 = vpop.f32.mrb[110].mxu0 }
 0x2e9   : > { %v2699_v28 = vpop.f32.mrb[109].mxu1  ;;  %v2590_v27 = vpop.f32.mrb[111].mxu0 }
 0x2ea   : > { %v2049_v6 = vadd.f32 %v2588_v46, %v4404_v2  ;;  %v2700_v10 = vadd.f32 %v2699_v28, %v2698_v43  ;;  %v2701_v53 = vpop.f32.mrb[110].mxu1  ;;  %v2591_v21 = vadd.f32 %v2590_v27, %v2589_v18 }
 0x2eb   : > { %v2702_v56 = vpop.f32.mrb[111].mxu1 }
 0x2ec   : > { %v2210_v5 = vadd.f32 %v2700_v10, %v2049_v6  ;;  %v2052_v11 = vadd.f32 %v2591_v21, %v4404_v2  ;;  %v2703_v34 = vadd.f32 %v2702_v56, %v2701_v53 }
 0x2ee   : > { %v2270_v19 = vadd.f32 %v3035_v57, %v2210_v5  ;;  %v2213_v38 = vadd.f32 %v2703_v34, %v2052_v11  ;;  %v2592_v49 = vpop.f32.mrb[112].mxu0  ;;  %v3041_v5 = vld [vmem:[%s3425_s6 + $0xe0] sm:$0xff] }
 0x2ef   : > { %v2593_v20 = vpop.f32.mrb[113].mxu0 }
 0x2f0   : > { %2302 = vst [vmem:[%s4411_s12 + $0xb0] sm:$0xff] %v2270_v19  ;;  %v2271_v23 = vadd.f32 %v3036_v12, %v2213_v38  ;;  %v2704_v25 = vpop.f32.mrb[112].mxu1  ;;  %v2594_v22 = vadd.f32 %v2593_v20, %v2592_v49  ;;  %v2595_v44 = vpop.f32.mrb[114].mxu0  ;;  %v3042_v38 = vld [vmem:[%s3425_s6 + $0xe8] sm:$0xff] }
 0x2f1   : > { %v2705_v42 = vpop.f32.mrb[113].mxu1  ;;  %v2596_v4 = vpop.f32.mrb[115].mxu0 }
 0x2f2   : > { %2303 = vst [vmem:[%s4411_s12 + $0xb8] sm:$0xff] %v2271_v23  ;;  %v2057_v60 = vadd.f32 %v2594_v22, %v4404_v2  ;;  %v2706_v35 = vadd.f32 %v2705_v42, %v2704_v25  ;;  %v2707_v9 = vpop.f32.mrb[114].mxu1  ;;  %v2597_v45 = vadd.f32 %v2596_v4, %v2595_v44 }
 0x2f3   : > { %v2708_v1 = vpop.f32.mrb[115].mxu1 }
 0x2f4   : > { %v2218_v61 = vadd.f32 %v2706_v35, %v2057_v60  ;;  %v2060_v31 = vadd.f32 %v2597_v45, %v4404_v2  ;;  %v2709_v14 = vadd.f32 %v2708_v1, %v2707_v9 }
 0x2f6   : > { %v2272_v58 = vadd.f32 %v3037_v0, %v2218_v61  ;;  %v2221_v54 = vadd.f32 %v2709_v14, %v2060_v31  ;;  %v2598_v62 = vpop.f32.mrb[116].mxu0  ;;  %v3043_v61 = vld [vmem:[%s3425_s6 + $0xf0] sm:$0xff]  ;;  %v3044_v0 = vld [vmem:[%s3425_s6 + $0xf8] sm:$0xff] }
 0x2f7   : > { %v2599_v36 = vpop.f32.mrb[117].mxu0 }
 0x2f8   : > { %2304 = vst [vmem:[%s4411_s12 + $0xc0] sm:$0xff] %v2272_v58  ;;  %v2273_v52 = vadd.f32 %v3038_v26, %v2221_v54  ;;  %v2710_v51 = vpop.f32.mrb[116].mxu1  ;;  %v2600_v32 = vadd.f32 %v2599_v36, %v2598_v62  ;;  %v2601_v37 = vpop.f32.mrb[118].mxu0 }
 0x2f9   : > { %v2711_v30 = vpop.f32.mrb[117].mxu1  ;;  %v2602_v55 = vpop.f32.mrb[119].mxu0 }
 0x2fa   : > { %2305 = vst [vmem:[%s4411_s12 + $0xc8] sm:$0xff] %v2273_v52  ;;  %v2065_v13 = vadd.f32 %v2600_v32, %v4404_v2  ;;  %v2712_v17 = vadd.f32 %v2711_v30, %v2710_v51  ;;  %v2713_v40 = vpop.f32.mrb[118].mxu1  ;;  %v2603_v59 = vadd.f32 %v2602_v55, %v2601_v37 }
 0x2fb   : > { %v2714_v29 = vpop.f32.mrb[119].mxu1 }
 0x2fc   : > { %v2226_v16 = vadd.f32 %v2712_v17, %v2065_v13  ;;  %v2068_v41 = vadd.f32 %v2603_v59, %v4404_v2  ;;  %v2715_v63 = vadd.f32 %v2714_v29, %v2713_v40 }
 0x2fe   : > { %v2274_v8 = vadd.f32 %v3039_v33, %v2226_v16  ;;  %v2229_v3 = vadd.f32 %v2715_v63, %v2068_v41  ;;  %v2604_v24 = vpop.f32.mrb[120].mxu0 }
 0x2ff   : > { %v2605_v39 = vpop.f32.mrb[121].mxu0 }
 0x300   : > { %2306 = vst [vmem:[%s4411_s12 + $0xd0] sm:$0xff] %v2274_v8  ;;  %v2275_v7 = vadd.f32 %v3040_v50, %v2229_v3  ;;  %v2716_v47 = vpop.f32.mrb[120].mxu1  ;;  %v2606_v15 = vadd.f32 %v2605_v39, %v2604_v24  ;;  %v2607_v48 = vpop.f32.mrb[122].mxu0 }
 0x301   : > { %v2717_v43 = vpop.f32.mrb[121].mxu1  ;;  %v2608_v46 = vpop.f32.mrb[123].mxu0 }
 0x302   : > { %2307 = vst [vmem:[%s4411_s12 + $0xd8] sm:$0xff] %v2275_v7  ;;  %v2073_v18 = vadd.f32 %v2606_v15, %v4404_v2  ;;  %v2718_v28 = vadd.f32 %v2717_v43, %v2716_v47  ;;  %v2719_v27 = vpop.f32.mrb[122].mxu1  ;;  %v2609_v6 = vadd.f32 %v2608_v46, %v2607_v48 }
 0x303   : > { %v2720_v10 = vpop.f32.mrb[123].mxu1 }
 0x304   : > { %v2234_v53 = vadd.f32 %v2718_v28, %v2073_v18  ;;  %v2076_v21 = vadd.f32 %v2609_v6, %v4404_v2  ;;  %v2721_v56 = vadd.f32 %v2720_v10, %v2719_v27 }
 0x306   : > { %v2276_v11 = vadd.f32 %v3041_v5, %v2234_v53  ;;  %v2237_v34 = vadd.f32 %v2721_v56, %v2076_v21  ;;  %v2610_v57 = vpop.f32.mrb[124].mxu0 }
 0x307   : > { %v2611_v19 = vpop.f32.mrb[125].mxu0 }
 0x308   : > { %2308 = vst [vmem:[%s4411_s12 + $0xe0] sm:$0xff] %v2276_v11  ;;  %v2277_v49 = vadd.f32 %v3042_v38, %v2237_v34  ;;  %v2722_v20 = vpop.f32.mrb[124].mxu1  ;;  %v2612_v12 = vadd.f32 %v2611_v19, %v2610_v57  ;;  %v2613_v23 = vpop.f32.mrb[126].mxu0 }
 0x309   : > { %v2723_v25 = vpop.f32.mrb[125].mxu1  ;;  %v2614_v22 = vpop.f32.mrb[127].mxu0 }
 0x30a   : > { %2309 = vst [vmem:[%s4411_s12 + $0xe8] sm:$0xff] %v2277_v49  ;;  %v2081_v44 = vadd.f32 %v2612_v12, %v4404_v2  ;;  %v2724_v42 = vadd.f32 %v2723_v25, %v2722_v20  ;;  %v2725_v4 = vpop.f32.mrb[126].mxu1  ;;  %v2615_v60 = vadd.f32 %v2614_v22, %v2613_v23 }
 0x30b   : > { %v2726_v35 = vpop.f32.mrb[127].mxu1 }
 0x30c   : > { %v2242_v9 = vadd.f32 %v2724_v42, %v2081_v44  ;;  %v2084_v45 = vadd.f32 %v2615_v60, %v4404_v2  ;;  %v2727_v1 = vadd.f32 %v2726_v35, %v2725_v4 }
 0x30e   : > { %v2278_v31 = vadd.f32 %v3043_v61, %v2242_v9  ;;  %v2245_v14 = vadd.f32 %v2727_v1, %v2084_v45 }
 0x310   : > { %2310 = vst [vmem:[%s4411_s12 + $0xf0] sm:$0xff] %v2278_v31  ;;  %v2279_v2 = vadd.f32 %v3044_v0, %v2245_v14 }
 0x312   : > { %2311 = vst [vmem:[%s4411_s12 + $0xf8] sm:$0xff] %v2279_v2 }
 0x313   : > { %3144 = shalt.err (!%p3141_p2)
}
 0x314   : > { %s3145_s6 = scalar_lea.hbm %s4508_s11, 4096  ;;  %s3149_s10 = scalar_lea.hbm %s4562_s5, 8192 }
 0x315   : > { %p3146_p13 = scmp.ne.s32.totalorder %s4508_s11, %s3145_s6  ;;  %p3150_p4 = scmp.lt.u32.totalorder %s4508_s11, %s4562_s5 }
 0x316   : > { %p3151_p7 = scmp.lt.u32.totalorder %s3149_s10, %s3145_s6  ;;  %p3153_p11 = scmp.lt.u32.totalorder %s3145_s6, %s4508_s11 }
 0x317   : > { %p3147_p6 = pnand %p3146_p13, %p4675_p0 }
 0x318   : > { %p3152_p8 = por %p3151_p7, %p3150_p4 }
 0x319   : > { %p3148_p10 = pneg %p3147_p6 }
 0x31a   : > { %p3154_p1 = por %p3153_p11, %p3152_p8 }
 0x31c   : > { %p3155_p3 = pnand %p3154_p1, %p3148_p10 }
 0x31e   : > { %3158 = shalt.err (!%p3155_p3)
}
 0x31f   : > { %s3215_s13 = smov 128   ;;  %s3216_s8 = smov 8  }
 0x320   : > { %2738 = dma.vmem_to_hbm [thread:$0]  (%p4675_p0), %s4510_s29, 4096, %s4508_s11, %s2313_s14, %s3215_s13, %s3215_s13, %s3216_s8  }
 0x321 PF: > { %s2341_s9 = sand.u32 1, %s3189_s18   ;;  %p4676_p5 = scmp.ne.s32.totalorder %s4596_s25, 0 }
 0x322   : > { %p4677_p9 = scmp.ge.s32.totalorder %s3201_s21, 2  ;;  %s2342_s22 = scalar_lea.sflag [#allocation4], %s2341_s9 }
 0x324   : > { %p2752_p12 = pnand %p4677_p9, %p4676_p5 }
 0x326   : > { %3184 = dma.done.wait (!%p2752_p12), %s2342_s22, 4096  }
 0x327   : > { %3186 = vsyncadd (!%p2752_p12), %s2342_s22, 4294963200  ;;  %p19_p2 = scmp.ge.s32.totalorder %s3357_s16, 4   ;;  %s4678_s18 = smov %s3193_s19 }
 0x328   : > { %s4679_s19 = smov %s3197_s20  ;;  %s4680_s20 = smov %s3366_s27 }
 0x329   : > { %s4681_s21 = smov %s3357_s16  ;;  %21 = sbr.rel (!%p19_p2) target bundleno = 6 (0x6), region = 93 }
 0x330   :  { %2347 = vsyncpa [#allocation3], 1 }
 0x331   :  { %2349 = vsyncpa [#allocation3 + $0x1], 1 }
 0x332   :  { %2350 = vsyncpa [#allocation6], 1 }
 0x333   :  { %2351 = vsyncpa [#allocation4], 1 }
 0x334   :  { %2353 = vsyncpa [#allocation4 + $0x1], 1 }

</bundles_post_ra>
